<compile_context>
chip_gen: v6e
topology: v6e:2x2x1
jax: 0.10.0
libtpu: 0.0.40
codegen_flags: <defaults>
</compile_context>

<pallas_src>
import functools

import jax
import jax.numpy as jnp
from jax.experimental import pallas as pl
from jax.experimental.pallas import tpu as pltpu


def _round_up(x, m):
    return ((x + m - 1) // m) * m


# ---------------------------------------------------------------------------
# Pallas kernel: in-VMEM patch extraction + KH*KW sub-matmuls + bias + ReLU
# ---------------------------------------------------------------------------
def _conv_bn_relu_kernel(x_ref, w_ref, bias_ref, o_ref, acc_ref, *,
                         kh, kw, stride, dilation, h_out, w_out, apply_relu):
    """One grid step = one image.

    x_ref:    (1, Hp, Wp, C_in)          zero-padded input, bf16
    w_ref:    (KH*KW, C_in, C_out_p)     BN-scale-folded weights, bf16
    bias_ref: (1, C_out_p)               folded BN(+conv) bias, f32
    o_ref:    (1, H_out*W_out, C_out_p)  f32 output (lane-dense last dim)
    acc_ref:  (H_out*W_out, C_out_p)     f32 VMEM accumulator scratch
    """
    for t in range(kh * kw):
        i, j = divmod(t, kw)
        r0, c0 = i * dilation, j * dilation
        if stride == 1:
            patch = x_ref[0, r0:r0 + h_out, c0:c0 + w_out, :]
        else:
            patch = x_ref[0,
                          pl.ds(r0, h_out, stride),
                          pl.ds(c0, w_out, stride), :]
        # (h_out, w_out, c_in) -> (h_out*w_out, c_in): leading-dim merge only,
        # lane dim unchanged.
        patch = patch.reshape(h_out * w_out, patch.shape[-1])
        contrib = jnp.dot(patch, w_ref[t], preferred_element_type=jnp.float32)
        if t == 0:
            acc_ref[...] = contrib
        else:
            acc_ref[...] += contrib

    y = acc_ref[...] + bias_ref[...]          # folded BN/conv bias
    if apply_relu:
        y = jnp.maximum(y, 0.0)
    o_ref[0] = y.astype(o_ref.dtype)


# ---------------------------------------------------------------------------
# Wrapper: layout glue + parameter folding + pallas_call
# ---------------------------------------------------------------------------
@functools.partial(
    jax.jit,
    static_argnames=("stride", "pad", "dilation", "has_bn", "has_relu"))
def conv_bn_relu(x_nchw, weight_oihw, gamma, beta, run_mean, run_var,
                 conv_bias=None, *, stride=1, pad=1, dilation=1,
                 bn_eps=1e-5, has_bn=True, has_relu=True):
    """ConvBnRelu forward. x_nchw: (N, C_in, H, W); weight: (C_out, C_in, KH, KW)."""
    c_out, c_in, kh, kw = weight_oihw.shape
    n, _, h, w = x_nchw.shape

    h_out = (h + 2 * pad - dilation * (kh - 1) - 1) // stride + 1
    w_out = (w + 2 * pad - dilation * (kw - 1) - 1) // stride + 1
    hp, wp = h + 2 * pad, w + 2 * pad

    # Lane-dense output channel dim (multiple of 128); sliced off afterwards.
    c_out_p = _round_up(c_out, 128)

    # ---- host-side glue: NCHW -> zero-padded NHWC, bf16 MXU operands ----
    x_nhwc = jnp.transpose(x_nchw, (0, 2, 3, 1))
    x_pad = jnp.pad(x_nhwc, ((0, 0), (pad, pad), (pad, pad), (0, 0)))
    x_pad = x_pad.astype(jnp.bfloat16)

    # ---- fold BN (inference) + optional conv bias into scale / bias ----
    if has_bn:
        scale = gamma / jnp.sqrt(run_var + bn_eps)            # (C_out,)
        bias = beta - run_mean * scale
    else:
        scale = jnp.ones((c_out,), jnp.float32)
        bias = jnp.zeros((c_out,), jnp.float32)
    if conv_bias is not None:
        bias = bias + scale * conv_bias

    # weight (C_out, C_in, KH, KW) -> per-tap (KH*KW, C_in, C_out_p), scale folded.
    w_taps = jnp.transpose(weight_oihw, (2, 3, 1, 0)).reshape(kh * kw, c_in, c_out)
    w_taps = w_taps * scale[None, None, :]
    w_taps = jnp.pad(w_taps, ((0, 0), (0, 0), (0, c_out_p - c_out)))
    w_taps = w_taps.astype(jnp.bfloat16)

    bias_p = jnp.pad(bias, (0, c_out_p - c_out)).reshape(1, c_out_p)
    bias_p = bias_p.astype(jnp.float32)

    kernel = functools.partial(
        _conv_bn_relu_kernel,
        kh=kh, kw=kw, stride=stride, dilation=dilation,
        h_out=h_out, w_out=w_out, apply_relu=has_relu)

    out = pl.pallas_call(
        kernel,
        out_shape=jax.ShapeDtypeStruct((n, h_out * w_out, c_out_p), jnp.float32),
        grid_spec=pltpu.PrefetchScalarGridSpec(
            num_scalar_prefetch=0,
            grid=(n,),
            in_specs=[
                pl.BlockSpec((1, hp, wp, c_in), lambda b: (b, 0, 0, 0)),
                pl.BlockSpec((kh * kw, c_in, c_out_p), lambda b: (0, 0, 0)),
                pl.BlockSpec((1, c_out_p), lambda b: (0, 0)),
            ],
            out_specs=pl.BlockSpec((1, h_out * w_out, c_out_p),
                                   lambda b: (b, 0, 0)),
            scratch_shapes=[pltpu.VMEM((h_out * w_out, c_out_p), jnp.float32)],
        ),
        compiler_params=pltpu.CompilerParams(
            dimension_semantics=("parallel",),
            vmem_limit_bytes=32 * 1024 * 1024),
    )(x_pad, w_taps, bias_p)

    # (N, H_out*W_out, C_out_p) -> NHWC -> NCHW
    out = out[:, :, :c_out].reshape(n, h_out, w_out, c_out)
    return jnp.transpose(out, (0, 3, 1, 2)).astype(x_nchw.dtype)


# ---------------------------------------------------------------------------
# Pure-JAX reference (f32) for correctness check
# ---------------------------------------------------------------------------
def conv_bn_relu_ref(x_nchw, weight_oihw, gamma, beta, run_mean, run_var,
                     *, stride=1, pad=1, dilation=1, bn_eps=1e-5):
    x_nhwc = jnp.transpose(x_nchw, (0, 2, 3, 1)).astype(jnp.float32)
    w_hwio = jnp.transpose(weight_oihw, (2, 3, 1, 0)).astype(jnp.float32)
    y = jax.lax.conv_general_dilated(
        x_nhwc, w_hwio,
        window_strides=(stride, stride),
        padding=[(pad, pad), (pad, pad)],
        rhs_dilation=(dilation, dilation),
        dimension_numbers=("NHWC", "HWIO", "NHWC"),
    )
    scale = gamma / jnp.sqrt(run_var + bn_eps)
    bias = beta - run_mean * scale
    y = y * scale[None, None, None, :] + bias[None, None, None, :]
    y = jnp.maximum(y, 0.0)
    return jnp.transpose(y, (0, 3, 1, 2))


if __name__ == "__main__":
    # ConvBnRelu(in_planes=4, out_planes=8, ksize=3, stride=1, pad=1)
    N, C_IN, H, W = 2, 4, 16, 16
    C_OUT, KSIZE, STRIDE, PAD = 8, 3, 1, 1

    key = jax.random.PRNGKey(0)
    kx, kw_, kg, kb, km, kv = jax.random.split(key, 6)

    x = jax.random.normal(kx, (N, C_IN, H, W), dtype=jnp.float32)
    weight = jax.random.normal(kw_, (C_OUT, C_IN, KSIZE, KSIZE), dtype=jnp.float32) * 0.1
    gamma = 1.0 + 0.1 * jax.random.normal(kg, (C_OUT,), dtype=jnp.float32)
    beta = 0.1 * jax.random.normal(kb, (C_OUT,), dtype=jnp.float32)
    run_mean = 0.1 * jax.random.normal(km, (C_OUT,), dtype=jnp.float32)
    run_var = jnp.abs(jax.random.normal(kv, (C_OUT,), dtype=jnp.float32)) + 0.5

    out = conv_bn_relu(x, weight, gamma, beta, run_mean, run_var,
                       stride=STRIDE, pad=PAD)
    out = jax.block_until_ready(out)

    ref = conv_bn_relu_ref(x, weight, gamma, beta, run_mean, run_var,
                           stride=STRIDE, pad=PAD)
    assert out.shape == (N, C_OUT, H, W), out.shape
    # bf16 matmul operands -> loosened tolerance vs the f32 reference.
    max_err = float(jnp.max(jnp.abs(out - ref)))
    assert jnp.allclose(out, ref, atol=5e-2, rtol=5e-2), max_err

    print("KERNEL_OK")
</pallas_src>

<mosaic_0001>
module attributes {stable_mosaic.version = 11 : i64} {
  func.func @_conv_bn_relu_kernel(%arg0: i32, %arg1: memref<1x18x18x4xbf16, #tpu.memory_space<vmem>>, %arg2: memref<9x4x128xbf16, #tpu.memory_space<vmem>>, %arg3: memref<1x128xf32, #tpu.memory_space<vmem>>, %arg4: memref<1x256x128xf32, #tpu.memory_space<vmem>>, %arg5: memref<256x128xf32, #tpu.memory_space<vmem>>) attributes {dimension_semantics = [#tpu.dimension_semantics<parallel>], iteration_bounds = array<i64: 2>, scalar_prefetch = 0 : i64, scratch_operands = 1 : i64, tpu.core_type = #tpu.core_type<tc>, window_params = [{transform_indices = @transform_0, window_bounds = array<i64: 1, 18, 18, 4>}, {pipeline_mode = #tpu.pipeline_mode<synchronous>, transform_indices = @transform_1, window_bounds = array<i64: 9, 4, 128>}, {pipeline_mode = #tpu.pipeline_mode<synchronous>, transform_indices = @transform_2, window_bounds = array<i64: 1, 128>}, {transform_indices = @transform_3, window_bounds = array<i64: 1, 256, 128>}]} {
    %c0 = arith.constant 0 : index
    %c0_0 = arith.constant 0 : index
    %c0_1 = arith.constant 0 : index
    %c0_2 = arith.constant 0 : index
    %0 = vector.load %arg1[%c0, %c0_0, %c0_1, %c0_2] : memref<1x18x18x4xbf16, #tpu.memory_space<vmem>>, vector<1x16x16x4xbf16>
    %1 = vector.shape_cast %0 : vector<1x16x16x4xbf16> to vector<16x16x4xbf16>
    %2 = vector.shape_cast %1 : vector<16x16x4xbf16> to vector<256x4xbf16>
    %c0_3 = arith.constant 0 : index
    %c0_4 = arith.constant 0 : index
    %c0_5 = arith.constant 0 : index
    %3 = vector.load %arg2[%c0_3, %c0_4, %c0_5] : memref<9x4x128xbf16, #tpu.memory_space<vmem>>, vector<1x4x128xbf16>
    %4 = vector.shape_cast %3 : vector<1x4x128xbf16> to vector<4x128xbf16>
    %cst = arith.constant dense<0.000000e+00> : vector<256x128xf32>
    %5 = tpu.matmul %2, %4, %cst {dimension_numbers = #tpu.dot_dimension_numbers<[1], [0], [0], [1], [0, 0, 1, 1], [], []>} : vector<256x4xbf16>, vector<4x128xbf16>, vector<256x128xf32> -> vector<256x128xf32>
    %c0_6 = arith.constant 0 : index
    %c0_7 = arith.constant 0 : index
    %6 = vector.load %arg5[%c0_6, %c0_7] : memref<256x128xf32, #tpu.memory_space<vmem>>, vector<256x128xf32>
    tpu.vector_store %arg5[%c0_6, %c0_7], %5 {strides = array<i32>} : memref<256x128xf32, #tpu.memory_space<vmem>>, vector<256x128xf32>,
    %c0_8 = arith.constant 0 : index
    %c0_9 = arith.constant 0 : index
    %c1 = arith.constant 1 : index
    %c0_10 = arith.constant 0 : index
    %7 = vector.load %arg1[%c0_8, %c0_9, %c1, %c0_10] : memref<1x18x18x4xbf16, #tpu.memory_space<vmem>>, vector<1x16x16x4xbf16>
    %8 = vector.shape_cast %7 : vector<1x16x16x4xbf16> to vector<16x16x4xbf16>
    %9 = vector.shape_cast %8 : vector<16x16x4xbf16> to vector<256x4xbf16>
    %c1_11 = arith.constant 1 : index
    %c0_12 = arith.constant 0 : index
    %c0_13 = arith.constant 0 : index
    %10 = vector.load %arg2[%c1_11, %c0_12, %c0_13] : memref<9x4x128xbf16, #tpu.memory_space<vmem>>, vector<1x4x128xbf16>
    %11 = vector.shape_cast %10 : vector<1x4x128xbf16> to vector<4x128xbf16>
    %cst_14 = arith.constant dense<0.000000e+00> : vector<256x128xf32>
    %12 = tpu.matmul %9, %11, %cst_14 {dimension_numbers = #tpu.dot_dimension_numbers<[1], [0], [0], [1], [0, 0, 1, 1], [], []>} : vector<256x4xbf16>, vector<4x128xbf16>, vector<256x128xf32> -> vector<256x128xf32>
    %c0_15 = arith.constant 0 : index
    %c0_16 = arith.constant 0 : index
    %13 = vector.load %arg5[%c0_15, %c0_16] : memref<256x128xf32, #tpu.memory_space<vmem>>, vector<256x128xf32>
    %14 = arith.addf %13, %12 : vector<256x128xf32>
    %c0_17 = arith.constant 0 : index
    %c0_18 = arith.constant 0 : index
    %15 = vector.load %arg5[%c0_17, %c0_18] : memref<256x128xf32, #tpu.memory_space<vmem>>, vector<256x128xf32>
    tpu.vector_store %arg5[%c0_17, %c0_18], %14 {strides = array<i32>} : memref<256x128xf32, #tpu.memory_space<vmem>>, vector<256x128xf32>,
    %c0_19 = arith.constant 0 : index
    %c0_20 = arith.constant 0 : index
    %c2 = arith.constant 2 : index
    %c0_21 = arith.constant 0 : index
    %16 = vector.load %arg1[%c0_19, %c0_20, %c2, %c0_21] : memref<1x18x18x4xbf16, #tpu.memory_space<vmem>>, vector<1x16x16x4xbf16>
    %17 = vector.shape_cast %16 : vector<1x16x16x4xbf16> to vector<16x16x4xbf16>
    %18 = vector.shape_cast %17 : vector<16x16x4xbf16> to vector<256x4xbf16>
    %c2_22 = arith.constant 2 : index
    %c0_23 = arith.constant 0 : index
    %c0_24 = arith.constant 0 : index
    %19 = vector.load %arg2[%c2_22, %c0_23, %c0_24] : memref<9x4x128xbf16, #tpu.memory_space<vmem>>, vector<1x4x128xbf16>
    %20 = vector.shape_cast %19 : vector<1x4x128xbf16> to vector<4x128xbf16>
    %cst_25 = arith.constant dense<0.000000e+00> : vector<256x128xf32>
    %21 = tpu.matmul %18, %20, %cst_25 {dimension_numbers = #tpu.dot_dimension_numbers<[1], [0], [0], [1], [0, 0, 1, 1], [], []>} : vector<256x4xbf16>, vector<4x128xbf16>, vector<256x128xf32> -> vector<256x128xf32>
    %c0_26 = arith.constant 0 : index
    %c0_27 = arith.constant 0 : index
    %22 = vector.load %arg5[%c0_26, %c0_27] : memref<256x128xf32, #tpu.memory_space<vmem>>, vector<256x128xf32>
    %23 = arith.addf %22, %21 : vector<256x128xf32>
    %c0_28 = arith.constant 0 : index
    %c0_29 = arith.constant 0 : index
    %24 = vector.load %arg5[%c0_28, %c0_29] : memref<256x128xf32, #tpu.memory_space<vmem>>, vector<256x128xf32>
    tpu.vector_store %arg5[%c0_28, %c0_29], %23 {strides = array<i32>} : memref<256x128xf32, #tpu.memory_space<vmem>>, vector<256x128xf32>,
    %c0_30 = arith.constant 0 : index
    %c1_31 = arith.constant 1 : index
    %c0_32 = arith.constant 0 : index
    %c0_33 = arith.constant 0 : index
    %25 = vector.load %arg1[%c0_30, %c1_31, %c0_32, %c0_33] : memref<1x18x18x4xbf16, #tpu.memory_space<vmem>>, vector<1x16x16x4xbf16>
    %26 = vector.shape_cast %25 : vector<1x16x16x4xbf16> to vector<16x16x4xbf16>
    %27 = vector.shape_cast %26 : vector<16x16x4xbf16> to vector<256x4xbf16>
    %c3 = arith.constant 3 : index
    %c0_34 = arith.constant 0 : index
    %c0_35 = arith.constant 0 : index
    %28 = vector.load %arg2[%c3, %c0_34, %c0_35] : memref<9x4x128xbf16, #tpu.memory_space<vmem>>, vector<1x4x128xbf16>
    %29 = vector.shape_cast %28 : vector<1x4x128xbf16> to vector<4x128xbf16>
    %cst_36 = arith.constant dense<0.000000e+00> : vector<256x128xf32>
    %30 = tpu.matmul %27, %29, %cst_36 {dimension_numbers = #tpu.dot_dimension_numbers<[1], [0], [0], [1], [0, 0, 1, 1], [], []>} : vector<256x4xbf16>, vector<4x128xbf16>, vector<256x128xf32> -> vector<256x128xf32>
    %c0_37 = arith.constant 0 : index
    %c0_38 = arith.constant 0 : index
    %31 = vector.load %arg5[%c0_37, %c0_38] : memref<256x128xf32, #tpu.memory_space<vmem>>, vector<256x128xf32>
    %32 = arith.addf %31, %30 : vector<256x128xf32>
    %c0_39 = arith.constant 0 : index
    %c0_40 = arith.constant 0 : index
    %33 = vector.load %arg5[%c0_39, %c0_40] : memref<256x128xf32, #tpu.memory_space<vmem>>, vector<256x128xf32>
    tpu.vector_store %arg5[%c0_39, %c0_40], %32 {strides = array<i32>} : memref<256x128xf32, #tpu.memory_space<vmem>>, vector<256x128xf32>,
    %c0_41 = arith.constant 0 : index
    %c1_42 = arith.constant 1 : index
    %c1_43 = arith.constant 1 : index
    %c0_44 = arith.constant 0 : index
    %34 = vector.load %arg1[%c0_41, %c1_42, %c1_43, %c0_44] : memref<1x18x18x4xbf16, #tpu.memory_space<vmem>>, vector<1x16x16x4xbf16>
    %35 = vector.shape_cast %34 : vector<1x16x16x4xbf16> to vector<16x16x4xbf16>
    %36 = vector.shape_cast %35 : vector<16x16x4xbf16> to vector<256x4xbf16>
    %c4 = arith.constant 4 : index
    %c0_45 = arith.constant 0 : index
    %c0_46 = arith.constant 0 : index
    %37 = vector.load %arg2[%c4, %c0_45, %c0_46] : memref<9x4x128xbf16, #tpu.memory_space<vmem>>, vector<1x4x128xbf16>
    %38 = vector.shape_cast %37 : vector<1x4x128xbf16> to vector<4x128xbf16>
    %cst_47 = arith.constant dense<0.000000e+00> : vector<256x128xf32>
    %39 = tpu.matmul %36, %38, %cst_47 {dimension_numbers = #tpu.dot_dimension_numbers<[1], [0], [0], [1], [0, 0, 1, 1], [], []>} : vector<256x4xbf16>, vector<4x128xbf16>, vector<256x128xf32> -> vector<256x128xf32>
    %c0_48 = arith.constant 0 : index
    %c0_49 = arith.constant 0 : index
    %40 = vector.load %arg5[%c0_48, %c0_49] : memref<256x128xf32, #tpu.memory_space<vmem>>, vector<256x128xf32>
    %41 = arith.addf %40, %39 : vector<256x128xf32>
    %c0_50 = arith.constant 0 : index
    %c0_51 = arith.constant 0 : index
    %42 = vector.load %arg5[%c0_50, %c0_51] : memref<256x128xf32, #tpu.memory_space<vmem>>, vector<256x128xf32>
    tpu.vector_store %arg5[%c0_50, %c0_51], %41 {strides = array<i32>} : memref<256x128xf32, #tpu.memory_space<vmem>>, vector<256x128xf32>,
    %c0_52 = arith.constant 0 : index
    %c1_53 = arith.constant 1 : index
    %c2_54 = arith.constant 2 : index
    %c0_55 = arith.constant 0 : index
    %43 = vector.load %arg1[%c0_52, %c1_53, %c2_54, %c0_55] : memref<1x18x18x4xbf16, #tpu.memory_space<vmem>>, vector<1x16x16x4xbf16>
    %44 = vector.shape_cast %43 : vector<1x16x16x4xbf16> to vector<16x16x4xbf16>
    %45 = vector.shape_cast %44 : vector<16x16x4xbf16> to vector<256x4xbf16>
    %c5 = arith.constant 5 : index
    %c0_56 = arith.constant 0 : index
    %c0_57 = arith.constant 0 : index
    %46 = vector.load %arg2[%c5, %c0_56, %c0_57] : memref<9x4x128xbf16, #tpu.memory_space<vmem>>, vector<1x4x128xbf16>
    %47 = vector.shape_cast %46 : vector<1x4x128xbf16> to vector<4x128xbf16>
    %cst_58 = arith.constant dense<0.000000e+00> : vector<256x128xf32>
    %48 = tpu.matmul %45, %47, %cst_58 {dimension_numbers = #tpu.dot_dimension_numbers<[1], [0], [0], [1], [0, 0, 1, 1], [], []>} : vector<256x4xbf16>, vector<4x128xbf16>, vector<256x128xf32> -> vector<256x128xf32>
    %c0_59 = arith.constant 0 : index
    %c0_60 = arith.constant 0 : index
    %49 = vector.load %arg5[%c0_59, %c0_60] : memref<256x128xf32, #tpu.memory_space<vmem>>, vector<256x128xf32>
    %50 = arith.addf %49, %48 : vector<256x128xf32>
    %c0_61 = arith.constant 0 : index
    %c0_62 = arith.constant 0 : index
    %51 = vector.load %arg5[%c0_61, %c0_62] : memref<256x128xf32, #tpu.memory_space<vmem>>, vector<256x128xf32>
    tpu.vector_store %arg5[%c0_61, %c0_62], %50 {strides = array<i32>} : memref<256x128xf32, #tpu.memory_space<vmem>>, vector<256x128xf32>,
    %c0_63 = arith.constant 0 : index
    %c2_64 = arith.constant 2 : index
    %c0_65 = arith.constant 0 : index
    %c0_66 = arith.constant 0 : index
    %52 = vector.load %arg1[%c0_63, %c2_64, %c0_65, %c0_66] : memref<1x18x18x4xbf16, #tpu.memory_space<vmem>>, vector<1x16x16x4xbf16>
    %53 = vector.shape_cast %52 : vector<1x16x16x4xbf16> to vector<16x16x4xbf16>
    %54 = vector.shape_cast %53 : vector<16x16x4xbf16> to vector<256x4xbf16>
    %c6 = arith.constant 6 : index
    %c0_67 = arith.constant 0 : index
    %c0_68 = arith.constant 0 : index
    %55 = vector.load %arg2[%c6, %c0_67, %c0_68] : memref<9x4x128xbf16, #tpu.memory_space<vmem>>, vector<1x4x128xbf16>
    %56 = vector.shape_cast %55 : vector<1x4x128xbf16> to vector<4x128xbf16>
    %cst_69 = arith.constant dense<0.000000e+00> : vector<256x128xf32>
    %57 = tpu.matmul %54, %56, %cst_69 {dimension_numbers = #tpu.dot_dimension_numbers<[1], [0], [0], [1], [0, 0, 1, 1], [], []>} : vector<256x4xbf16>, vector<4x128xbf16>, vector<256x128xf32> -> vector<256x128xf32>
    %c0_70 = arith.constant 0 : index
    %c0_71 = arith.constant 0 : index
    %58 = vector.load %arg5[%c0_70, %c0_71] : memref<256x128xf32, #tpu.memory_space<vmem>>, vector<256x128xf32>
    %59 = arith.addf %58, %57 : vector<256x128xf32>
    %c0_72 = arith.constant 0 : index
    %c0_73 = arith.constant 0 : index
    %60 = vector.load %arg5[%c0_72, %c0_73] : memref<256x128xf32, #tpu.memory_space<vmem>>, vector<256x128xf32>
    tpu.vector_store %arg5[%c0_72, %c0_73], %59 {strides = array<i32>} : memref<256x128xf32, #tpu.memory_space<vmem>>, vector<256x128xf32>,
    %c0_74 = arith.constant 0 : index
    %c2_75 = arith.constant 2 : index
    %c1_76 = arith.constant 1 : index
    %c0_77 = arith.constant 0 : index
    %61 = vector.load %arg1[%c0_74, %c2_75, %c1_76, %c0_77] : memref<1x18x18x4xbf16, #tpu.memory_space<vmem>>, vector<1x16x16x4xbf16>
    %62 = vector.shape_cast %61 : vector<1x16x16x4xbf16> to vector<16x16x4xbf16>
    %63 = vector.shape_cast %62 : vector<16x16x4xbf16> to vector<256x4xbf16>
    %c7 = arith.constant 7 : index
    %c0_78 = arith.constant 0 : index
    %c0_79 = arith.constant 0 : index
    %64 = vector.load %arg2[%c7, %c0_78, %c0_79] : memref<9x4x128xbf16, #tpu.memory_space<vmem>>, vector<1x4x128xbf16>
    %65 = vector.shape_cast %64 : vector<1x4x128xbf16> to vector<4x128xbf16>
    %cst_80 = arith.constant dense<0.000000e+00> : vector<256x128xf32>
    %66 = tpu.matmul %63, %65, %cst_80 {dimension_numbers = #tpu.dot_dimension_numbers<[1], [0], [0], [1], [0, 0, 1, 1], [], []>} : vector<256x4xbf16>, vector<4x128xbf16>, vector<256x128xf32> -> vector<256x128xf32>
    %c0_81 = arith.constant 0 : index
    %c0_82 = arith.constant 0 : index
    %67 = vector.load %arg5[%c0_81, %c0_82] : memref<256x128xf32, #tpu.memory_space<vmem>>, vector<256x128xf32>
    %68 = arith.addf %67, %66 : vector<256x128xf32>
    %c0_83 = arith.constant 0 : index
    %c0_84 = arith.constant 0 : index
    %69 = vector.load %arg5[%c0_83, %c0_84] : memref<256x128xf32, #tpu.memory_space<vmem>>, vector<256x128xf32>
    tpu.vector_store %arg5[%c0_83, %c0_84], %68 {strides = array<i32>} : memref<256x128xf32, #tpu.memory_space<vmem>>, vector<256x128xf32>,
    %c0_85 = arith.constant 0 : index
    %c2_86 = arith.constant 2 : index
    %c2_87 = arith.constant 2 : index
    %c0_88 = arith.constant 0 : index
    %70 = vector.load %arg1[%c0_85, %c2_86, %c2_87, %c0_88] : memref<1x18x18x4xbf16, #tpu.memory_space<vmem>>, vector<1x16x16x4xbf16>
    %71 = vector.shape_cast %70 : vector<1x16x16x4xbf16> to vector<16x16x4xbf16>
    %72 = vector.shape_cast %71 : vector<16x16x4xbf16> to vector<256x4xbf16>
    %c8 = arith.constant 8 : index
    %c0_89 = arith.constant 0 : index
    %c0_90 = arith.constant 0 : index
    %73 = vector.load %arg2[%c8, %c0_89, %c0_90] : memref<9x4x128xbf16, #tpu.memory_space<vmem>>, vector<1x4x128xbf16>
    %74 = vector.shape_cast %73 : vector<1x4x128xbf16> to vector<4x128xbf16>
    %cst_91 = arith.constant dense<0.000000e+00> : vector<256x128xf32>
    %75 = tpu.matmul %72, %74, %cst_91 {dimension_numbers = #tpu.dot_dimension_numbers<[1], [0], [0], [1], [0, 0, 1, 1], [], []>} : vector<256x4xbf16>, vector<4x128xbf16>, vector<256x128xf32> -> vector<256x128xf32>
    %c0_92 = arith.constant 0 : index
    %c0_93 = arith.constant 0 : index
    %76 = vector.load %arg5[%c0_92, %c0_93] : memref<256x128xf32, #tpu.memory_space<vmem>>, vector<256x128xf32>
    %77 = arith.addf %76, %75 : vector<256x128xf32>
    %c0_94 = arith.constant 0 : index
    %c0_95 = arith.constant 0 : index
    %78 = vector.load %arg5[%c0_94, %c0_95] : memref<256x128xf32, #tpu.memory_space<vmem>>, vector<256x128xf32>
    tpu.vector_store %arg5[%c0_94, %c0_95], %77 {strides = array<i32>} : memref<256x128xf32, #tpu.memory_space<vmem>>, vector<256x128xf32>,
    %c0_96 = arith.constant 0 : index
    %c0_97 = arith.constant 0 : index
    %79 = vector.load %arg5[%c0_96, %c0_97] : memref<256x128xf32, #tpu.memory_space<vmem>>, vector<256x128xf32>
    %c0_98 = arith.constant 0 : index
    %c0_99 = arith.constant 0 : index
    %80 = vector.load %arg3[%c0_98, %c0_99] : memref<1x128xf32, #tpu.memory_space<vmem>>, vector<1x128xf32>
    %81 = vector.broadcast %80 : vector<1x128xf32> to vector<256x128xf32>
    %82 = arith.addf %79, %81 : vector<256x128xf32>
    %cst_100 = arith.constant 0.000000e+00 : f32
    %83 = vector.broadcast %cst_100 : f32 to vector<256x128xf32>
    %84 = arith.maximumf %82, %83 : vector<256x128xf32>
    %c0_101 = arith.constant 0 : index
    %c0_102 = arith.constant 0 : index
    %c0_103 = arith.constant 0 : index
    %85 = vector.load %arg4[%c0_101, %c0_102, %c0_103] : memref<1x256x128xf32, #tpu.memory_space<vmem>>, vector<1x256x128xf32>
    %86 = vector.shape_cast %85 : vector<1x256x128xf32> to vector<256x128xf32>
    %87 = vector.shape_cast %84 : vector<256x128xf32> to vector<1x256x128xf32>
    tpu.vector_store %arg4[%c0_101, %c0_102, %c0_103], %87 {strides = array<i32>} : memref<1x256x128xf32, #tpu.memory_space<vmem>>, vector<1x256x128xf32>,
    return
  }
  func.func @transform_0(%arg0: i32) -> (i32, i32, i32, i32) {
    %c0_i32 = arith.constant 0 : i32
    %c0_i32_0 = arith.constant 0 : i32
    %c0_i32_1 = arith.constant 0 : i32
    %c0_i32_2 = arith.constant 0 : i32
    return %arg0, %c0_i32, %c0_i32_0, %c0_i32_1 : i32, i32, i32, i32
  }
  func.func @transform_1(%arg0: i32) -> (i32, i32, i32) {
    %c0_i32 = arith.constant 0 : i32
    %c0_i32_0 = arith.constant 0 : i32
    %c0_i32_1 = arith.constant 0 : i32
    %c0_i32_2 = arith.constant 0 : i32
    return %c0_i32, %c0_i32_0, %c0_i32_1 : i32, i32, i32
  }
  func.func @transform_2(%arg0: i32) -> (i32, i32) {
    %c0_i32 = arith.constant 0 : i32
    %c0_i32_0 = arith.constant 0 : i32
    %c0_i32_1 = arith.constant 0 : i32
    return %c0_i32, %c0_i32_0 : i32, i32
  }
  func.func @transform_3(%arg0: i32) -> (i32, i32, i32) {
    %c0_i32 = arith.constant 0 : i32
    %c0_i32_0 = arith.constant 0 : i32
    %c0_i32_1 = arith.constant 0 : i32
    return %arg0, %c0_i32, %c0_i32_0 : i32, i32, i32
  }
}

</mosaic_0001>

<bundles_post_ra>
// kernel: conv_bn_relu.1
= control target key start
LH: loop header
LB: loop body
LE: loop exit
PB: predicated region body
PF: predicated region fallthrough
CT: control target
= control target key end

     0   :  { %s6809_s12 = smov 0   ;;  %s8525_s0 = inlined_call_operand.vmem [shape: bf16[2,18,18,4], index: 0, kind: input, shape index: {}]   ;;  %s8526_s1 = inlined_call_operand.vmem [shape: bf16[9,4,128], index: 1, kind: input, shape index: {}]   ;;  %s8527_s2 = inlined_call_operand.vmem [shape: f32[1,128], index: 2, kind: input, shape index: {}]   ;;  %s8528_s3 = inlined_call_operand.vmem [shape: f32[2,256,128], index: 3, kind: output, shape index: {}]  }
   0x1 LB: > { %s5641_s13 = sadd.s32 4294967295, %s6787_s12   ;;  %p5645_p0 = scmp.ge.s32.totalorder %s6787_s12, 1  ;;  %s6787_s12 = sphi %s6809_s12, %s13_s12  }
   0x2   : > { %p137_p1 = scmp.lt.s32.totalorder %s6787_s12, 3 }
   0x4   : > { %p138_p2 = pnand %p5645_p0, %p137_p1 }
   0x6   : > { %141 = sbr.rel (%p138_p2) target bundleno = 548 (0x224), region = 32 }
   0xb   : > { %v204_v0 = vld [vmem:[%s8526_s1] sm:$0x3]  ;;  %vm334_vm0 = vcmask 1041408   ;;  %p161_p3 = scmp.lt.s32.totalorder %s5641_s13, 1  ;;  %v5681_v2 = vld [vmem:[%s8526_s1 + $0x2] sm:$0x3] }
   0xc   : > { %6715 = vmatprep.subr.msk.bf16.mxu1 %vm334_vm0, %v204_v0  ;;  %6714 = vmatprep.subr.msk.bf16.mxu0 %vm334_vm0, %v204_v0  ;;  %v336_v1 = vsel %vm334_vm0, %v204_v0, 0  ;;  %v5730_v3 = vld [vmem:[%s8526_s1 + $0x4] sm:$0x3]  ;;  %vm285_vm1 = vcmask 31744   ;;  %v5795_v8 = vld [vmem:[%s8526_s1 + $0x6] sm:$0x3] }
   0xd   : > { %6713 = vmatpush3.bf16.msra.mxu1 %v336_v1  ;;  %6407 = vmatpush3.bf16.msra.mxu0 %v336_v1  ;;  %s8634_s13 = smov (!%p161_p3, %s5641_s13), 1  ;;  %v1634_v7 = vsel %vm334_vm0, %v5730_v3, 0  ;;  %v1065_v10 = vsel %vm334_vm0, %v5681_v2, 0  ;;  %v5876_v11 = vld [vmem:[%s8526_s1 + $0x8] sm:$0x3]  ;;  %vm1420_vm2 = vcmask 1042432  }
   0xe   : > { %6716 = vmatprep.subr.msk.bf16.mxu1 %vm334_vm0, %v5681_v2  ;;  %6717 = vmatprep.subr.msk.bf16.mxu0 %vm334_vm0, %v5730_v3  ;;  %s6724_s20 = smul.u32 216, %s8634_s13  ;;  %vm579_vm3 = vsmask.f32 3328  ;;  %vm580_vm4 = vsmask.f32 7440  ;;  %vm1421_vm5 = vcmask 1046532  }
   0xf   : > { %v6869_v18 = vld [vmem:[%s8526_s1 + $0xa] sm:$0x3]  ;;  %v6874_v19 = vsel %vm334_vm0, %v5795_v8, 0  ;;  %v6879_v21 = vsel %vm334_vm0, %v5876_v11, 0  ;;  %vm6896_vm6 = vmor %vm1420_vm2, %vm1421_vm5  ;;  %s6252_s11 = sshll.u32 %s8634_s13, 8 }
  0x10   : > { %s6837_s23 = scalar_lea.vmem %s8525_s0, %s6724_s20  ;;  %v6885_v24 = vsel %vm334_vm0, %v6869_v18, 0  ;;  %vm6910_vm7 = vmor %vm579_vm3, %vm580_vm4  ;;  %s8399_s15 = scalar_lea.vmem %s8528_s3, %s6252_s11 }
  0x11   : > { %v6733_v4 = vld [vmem:[%s6837_s23] sm:$0xff]   ;;  %v6735_v6 = vld [vmem:[%s6837_s23 + $0xc] sm:$0xff]   ;;  %v6737_v12 = vld [vmem:[%s6837_s23 + $0x18] sm:$0xff]  }
  0x12   : > { %v6734_v5 = vld [vmem:[%s6837_s23 + $0x60] sm:$0xff]   ;;  %6408 = vmatprep.mubr.msk.bf16.mxu0 %vm285_vm1, %v6733_v4  ;;  %v6736_v9 = vld [vmem:[%s6837_s23 + $0x6c] sm:$0xff]   ;;  %v6738_v13 = vld [vmem:[%s6837_s23 + $0x78] sm:$0xff]  }
  0x13   : > { %6424 = vmatprep.mubr.msk.bf16.mxu1 %vm285_vm1, %v6734_v5  ;;  %6409 = vmatmul.mubr.msk.bf16.vlgmr.msra.gmra.mxu0 %vm285_vm1, %v6735_v6  ;;  %v6739_v14 = vld [vmem:[%s6837_s23 + $0x24] sm:$0xff]   ;;  %v6741_v16 = vld [vmem:[%s6837_s23 + $0x30] sm:$0xff]   ;;  %v6743_v20 = vld [vmem:[%s6837_s23 + $0x3c] sm:$0xff]  }
  0x14   : > { %6425 = vmatmul.mubr.msk.bf16.vlgmr.msra.gmra.mxu1 %vm285_vm1, %v6736_v9  ;;  %6475 = vmatpush3.bf16.msra.mxu0 %v1634_v7  ;;  %v6740_v15 = vld [vmem:[%s6837_s23 + $0x84] sm:$0xff]   ;;  %v6742_v17 = vld [vmem:[%s6837_s23 + $0x90] sm:$0xff]   ;;  %v6744_v22 = vld [vmem:[%s6837_s23 + $0x9c] sm:$0xff]  }
  0x15   : > { %6441 = vmatpush3.bf16.msra.mxu1 %v1065_v10  ;;  %6412 = vmatprep.mubr.msk.bf16.mxu0 %vm285_vm1, %v6737_v12  ;;  %v6745_v23 = vld [vmem:[%s6837_s23 + $0x48] sm:$0xff]   ;;  %v531_v26 = vld [vmem:[%s6837_s23] sm:$0xf]  ;;  %v532_v27 = vld [vmem:[%s6837_s23 + $0x4] sm:$0xf] }
  0x16   : > { %6428 = vmatprep.mubr.msk.bf16.mxu1 %vm285_vm1, %v6738_v13  ;;  %6718 = vmatprep.subr.msk.bf16.mxu1 %vm334_vm0, %v5795_v8  ;;  %v6746_v25 = vld [vmem:[%s6837_s23 + $0xa8] sm:$0xff]   ;;  %v583_v29 = vshrl.u32 %v531_v26, 16  ;;  %v586_v30 = vshll.u32 %v531_v26, 16  ;;  %v592_v31 = vshll.u32 %v532_v27, 16  ;;  %v596_v32 = vshrl.u32 %v532_v27, 16  ;;  %v6747_v2 = vld [vmem:[%s6837_s23 + $0x54] sm:$0xff]  }
  0x17   : > { %6719 = vmatprep.subr.msk.bf16.mxu0 %vm334_vm0, %v5876_v11  ;;  %v533_v28 = vld [vmem:[%s6837_s23 + $0x8] sm:$0x1]  ;;  %v1324_v33 = vld [vmem:[%s6837_s23] sm:$0xe]  ;;  %v1325_v35 = vld [vmem:[%s6837_s23 + $0x4] sm:$0xf] }
  0x18   : > { %v602_v34 = vshll.u32 %v533_v28, 16  ;;  %v1326_v36 = vld [vmem:[%s6837_s23 + $0x8] sm:$0x1]  ;;  %v5714_v37 = vrot.slane %v1324_v33, 9  ;;  %v585_v38 = vrot.slane %v583_v29, 4  ;;  %v588_v39 = vrot.slane %v586_v30, 5 }
  0x19   : > { %v594_v40 = vrot.slane %v592_v31, 5  ;;  %v598_v41 = vrot.slane %v596_v32, 4  ;;  %v534_v43 = vld [vmem:[%s6837_s23 + $0xc] sm:$0xf]  ;;  %v1425_v45 = vrot.slane %v1325_v35, 5  ;;  %v1428_v46 = vrot.slane %v1326_v36, 5 }
  0x1a   : > { %v604_v44 = vrot.slane %v602_v34, 5  ;;  %v535_v47 = vld [vmem:[%s6837_s23 + $0x10] sm:$0xf]  ;;  %v607_v48 = vshrl.u32 %v534_v43, 16  ;;  %v589_v49 = vor.u32 %v588_v39, %v585_v38  ;;  %v536_v51 = vld [vmem:[%s6837_s23 + $0x14] sm:$0x1] }
  0x1b   : > { %6413 = vmatmul.mubr.msk.bf16.gmra.mxu0 %vm285_vm1, %v6739_v14  ;;  %v599_v50 = vor.u32 %v598_v41, %v594_v40  ;;  %v610_v52 = vshll.u32 %v534_v43, 16  ;;  %v616_v53 = vshll.u32 %v535_v47, 16  ;;  %v1327_v54 = vld [vmem:[%s6837_s23 + $0xc] sm:$0xe]  ;;  %v1426_v56 = vsel %vm6896_vm6, %v5714_v37, %v1425_v45  ;;  %v1328_v60 = vld [vmem:[%s6837_s23 + $0x10] sm:$0xf] }
  0x1c   : > { %6429 = vmatmul.mubr.msk.bf16.gmra.mxu1 %vm285_vm1, %v6740_v15  ;;  %6416 = vmatprep.mubr.msk.bf16.mxu0 %vm285_vm1, %v6741_v16  ;;  %v1427_v57 = vrot.slane %v1425_v45, 4  ;;  %v609_v58 = vrot.slane %v607_v48, 4  ;;  %v620_v59 = vshrl.u32 %v535_v47, 16  ;;  %v590_v61 = vrot.slane %v589_v49, 4  ;;  %v1329_v1 = vld [vmem:[%s6837_s23 + $0x14] sm:$0x1] }
  0x1d   : > { %6432 = vmatprep.mubr.msk.bf16.mxu1 %vm285_vm1, %v6742_v17  ;;  %v600_v62 = vrot.slane %v599_v50, 4  ;;  %v612_v63 = vrot.slane %v610_v52, 5  ;;  %v618_v0 = vrot.slane %v616_v53, 5  ;;  %v626_v5 = vshll.u32 %v536_v51, 16  ;;  %v537_v7 = vld [vmem:[%s6837_s23 + $0x18] sm:$0xf] }
  0x1e   : > { %v1429_v3 = vsel %vm6896_vm6, %v1427_v57, %v1428_v46  ;;  %v622_v4 = vrot.slane %v620_v59, 4  ;;  %v5715_v6 = vrot.slane %v1327_v54, 9  ;;  %v6748_v8 = vld [vmem:[%s6837_s23 + $0xb4] sm:$0xff]   ;;  %v595_v9 = vsel %vm6910_vm7, %v590_v61, %v594_v40  ;;  %v538_v13 = vld [vmem:[%s6837_s23 + $0x1c] sm:$0xf] }
  0x1f   : > { %v605_v10 = vsel %vm6910_vm7, %v600_v62, %v604_v44  ;;  %v5731_v11 = vcombine.low %v1426_v56, %v1429_v3  ;;  %v613_v12 = vor.u32 %v612_v63, %v609_v58  ;;  %v628_v16 = vrot.slane %v626_v5, 5  ;;  %v1330_v27 = vld [vmem:[%s6837_s23 + $0x18] sm:$0xe]  ;;  %v1331_v32 = vld [vmem:[%s6837_s23 + $0x1c] sm:$0xf] }
  0x20   : > { %v5682_v14 = vcombine.low %v595_v9, %v605_v10  ;;  %v623_v15 = vor.u32 %v622_v4, %v618_v0  ;;  %v1432_v17 = vrot.slane %v1328_v60, 5  ;;  %v634_v26 = vshll.u32 %v537_v7, 16  ;;  %v1332_v37 = vld [vmem:[%s6837_s23 + $0x20] sm:$0x1]  ;;  %v540_v43 = vld [vmem:[%s6837_s23 + $0x24] sm:$0xf] }
  0x21   : > { %v640_v31 = vshll.u32 %v538_v13, 16  ;;  %v644_v36 = vshrl.u32 %v538_v13, 16  ;;  %v541_v48 = vld [vmem:[%s6837_s23 + $0x28] sm:$0xf]  ;;  %v5716_v50 = vrot.slane %v1330_v27, 9  ;;  %v1439_v51 = vrot.slane %v1331_v32, 5 }
  0x22   : > { %v624_v28 = vrot.slane %v623_v15, 4  ;;  %v1433_v29 = vsel %vm6896_vm6, %v5715_v6, %v1432_v17  ;;  %v1434_v30 = vrot.slane %v1432_v17, 4  ;;  %v636_v35 = vrot.slane %v634_v26, 5  ;;  %v542_v53 = vld [vmem:[%s6837_s23 + $0x2c] sm:$0x1] }
  0x23   : > { %6417 = vmatmul.mubr.msk.bf16.gmra.mxu0 %vm285_vm1, %v6743_v20  ;;  %v539_v20 = vld [vmem:[%s6837_s23 + $0x20] sm:$0x1]  ;;  %v642_v40 = vrot.slane %v640_v31, 5  ;;  %v646_v47 = vrot.slane %v644_v36, 4  ;;  %v1442_v52 = vrot.slane %v1332_v37, 5  ;;  %v655_v57 = vshrl.u32 %v540_v43, 16 }
  0x24   : > { %6433 = vmatmul.mubr.msk.bf16.gmra.mxu1 %vm285_vm1, %v6744_v22  ;;  %6420 = vmatprep.mubr.msk.bf16.mxu0 %vm285_vm1, %v6745_v23  ;;  %v614_v22 = vrot.slane %v613_v12, 4  ;;  %v1435_v23 = vrot.slane %v1329_v1, 5  ;;  %v629_v38 = vsel %vm6910_vm7, %v624_v28, %v628_v16  ;;  %v650_v41 = vshll.u32 %v539_v20, 16  ;;  %v1333_v59 = vld [vmem:[%s6837_s23 + $0x24] sm:$0xe] }
  0x25   : > { %6436 = vmatprep.mubr.msk.bf16.mxu1 %vm285_vm1, %v6746_v25  ;;  %v631_v25 = vshrl.u32 %v537_v7, 16  ;;  %v647_v56 = vor.u32 %v646_v47, %v642_v40  ;;  %v658_v58 = vshll.u32 %v540_v43, 16  ;;  %v1440_v60 = vsel %vm6896_vm6, %v5716_v50, %v1439_v51  ;;  %v1335_v5 = vld [vmem:[%s6837_s23 + $0x2c] sm:$0x1]  ;;  %v543_v10 = vld [vmem:[%s6837_s23 + $0x30] sm:$0xf] }
  0x26   : > { %v619_v33 = vsel %vm6910_vm7, %v614_v22, %v618_v0  ;;  %v1436_v39 = vsel %vm6896_vm6, %v1434_v30, %v1435_v23  ;;  %v652_v49 = vrot.slane %v650_v41, 5  ;;  %v1441_v61 = vrot.slane %v1439_v51, 4  ;;  %v1334_v0 = vld [vmem:[%s6837_s23 + $0x28] sm:$0xf]  ;;  %v544_v15 = vld [vmem:[%s6837_s23 + $0x34] sm:$0xf] }
  0x27   : > { %v633_v34 = vrot.slane %v631_v25, 4  ;;  %v5683_v44 = vcombine.low %v619_v33, %v629_v38  ;;  %v5732_v45 = vcombine.low %v1433_v29, %v1436_v39  ;;  %v664_v62 = vshll.u32 %v541_v48, 16  ;;  %v545_v23 = vld [vmem:[%s6837_s23 + $0x38] sm:$0x1]  ;;  %v1336_v28 = vld [vmem:[%s6837_s23 + $0x30] sm:$0xe] }
  0x28   : > { %v668_v63 = vshrl.u32 %v541_v48, 16  ;;  %v657_v3 = vrot.slane %v655_v57, 4  ;;  %v660_v4 = vrot.slane %v658_v58, 5  ;;  %v1443_v6 = vsel %vm6896_vm6, %v1441_v61, %v1442_v52  ;;  %v1337_v32 = vld [vmem:[%s6837_s23 + $0x34] sm:$0xf] }
  0x29   : > { %v637_v46 = vor.u32 %v636_v35, %v633_v34  ;;  %v666_v7 = vrot.slane %v664_v62, 5  ;;  %v674_v9 = vshll.u32 %v542_v53, 16  ;;  %v5733_v12 = vcombine.low %v1440_v60, %v1443_v6  ;;  %v1338_v37 = vld [vmem:[%s6837_s23 + $0x38] sm:$0x1]  ;;  %v546_v41 = vld [vmem:[%s6837_s23 + $0x3c] sm:$0xf] }
  0x2a   : > { %v661_v13 = vor.u32 %v660_v4, %v657_v3  ;;  %v1446_v22 = vrot.slane %v1334_v0, 5  ;;  %v679_v26 = vshrl.u32 %v543_v10, 16  ;;  %v682_v27 = vshll.u32 %v543_v10, 16  ;;  %v547_v47 = vld [vmem:[%s6837_s23 + $0x40] sm:$0xf] }
  0x2b   : > { %6421 = vmatmul.mubr.msk.bf16.gmra.mxu0 %vm285_vm1, %v6747_v2  ;;  %v638_v54 = vrot.slane %v637_v46, 4  ;;  %v648_v2 = vrot.slane %v647_v56, 4  ;;  %v676_v20 = vrot.slane %v674_v9, 5  ;;  %v688_v31 = vshll.u32 %v544_v15, 16  ;;  %v548_v52 = vld [vmem:[%s6837_s23 + $0x44] sm:$0x1] }
  0x2c   : > { %6437 = vmatmul.mubr.msk.bf16.gmra.mxu1 %vm285_vm1, %v6748_v8  ;;  %6476 = vmatprep.mubr.msk.bf16.mxu0 %vm285_vm1, %v5731_v11  ;;  %v670_v8 = vrot.slane %v668_v63, 4  ;;  %v662_v25 = vrot.slane %v661_v13, 4  ;;  %v1448_v30 = vrot.slane %v1446_v22, 4  ;;  %v681_v34 = vrot.slane %v679_v26, 4  ;;  %v1339_v58 = vld [vmem:[%s6837_s23 + $0x3c] sm:$0xe] }
  0x2d   : > { %6442 = vmatprep.mubr.msk.bf16.mxu1 %vm285_vm1, %v5682_v14  ;;  %v643_v1 = vsel %vm6910_vm7, %v638_v54, %v642_v40  ;;  %v653_v11 = vsel %vm6910_vm7, %v648_v2, %v652_v49  ;;  %v5717_v14 = vrot.slane %v1333_v59, 9  ;;  %v684_v35 = vrot.slane %v682_v27, 5  ;;  %v1340_v63 = vld [vmem:[%s6837_s23 + $0x40] sm:$0xf]  ;;  %v1341_v4 = vld [vmem:[%s6837_s23 + $0x44] sm:$0x1] }
  0x2e   : > { %v5684_v16 = vcombine.low %v643_v1, %v653_v11  ;;  %v671_v17 = vor.u32 %v670_v8, %v666_v7  ;;  %v667_v33 = vsel %vm6910_vm7, %v662_v25, %v666_v7  ;;  %v692_v36 = vshrl.u32 %v544_v15, 16  ;;  %v549_v9 = vld [vmem:[%s6837_s23 + $0x48] sm:$0xf] }
  0x2f   : > { %v1447_v29 = vsel %vm6896_vm6, %v5717_v14, %v1446_v22  ;;  %v690_v39 = vrot.slane %v688_v31, 5  ;;  %v698_v40 = vshll.u32 %v545_v23, 16  ;;  %v5718_v49 = vrot.slane %v1336_v28, 9  ;;  %v550_v14 = vld [vmem:[%s6837_s23 + $0x4c] sm:$0xf] }
  0x30   : > { %v694_v46 = vrot.slane %v692_v36, 4  ;;  %v1453_v50 = vrot.slane %v1337_v32, 5  ;;  %v1456_v51 = vrot.slane %v1338_v37, 5  ;;  %v703_v56 = vshrl.u32 %v546_v41, 16  ;;  %v551_v22 = vld [vmem:[%s6837_s23 + $0x50] sm:$0x1] }
  0x31   : > { %v700_v48 = vrot.slane %v698_v40, 5  ;;  %v706_v57 = vshll.u32 %v546_v41, 16  ;;  %v712_v61 = vshll.u32 %v547_v47, 16  ;;  %v716_v62 = vshrl.u32 %v547_v47, 16  ;;  %v1342_v27 = vld [vmem:[%s6837_s23 + $0x48] sm:$0xe] }
  0x32   : > { %v695_v54 = vor.u32 %v694_v46, %v690_v39  ;;  %v1454_v59 = vsel %vm6896_vm6, %v5718_v49, %v1453_v50  ;;  %v1455_v60 = vrot.slane %v1453_v50, 4  ;;  %v705_v2 = vrot.slane %v703_v56, 4  ;;  %v1343_v31 = vld [vmem:[%s6837_s23 + $0x4c] sm:$0xf]  ;;  %v1344_v36 = vld [vmem:[%s6837_s23 + $0x50] sm:$0x1] }
  0x33   : > { %6477 = vmatmul.mubr.msk.bf16.vlgmr.msra.gmra.mxu0 %vm285_vm1, %v5732_v45  ;;  %v685_v45 = vor.u32 %v684_v35, %v681_v34  ;;  %v708_v3 = vrot.slane %v706_v57, 5  ;;  %v714_v6 = vrot.slane %v712_v61, 5  ;;  %v718_v7 = vrot.slane %v716_v62, 4  ;;  %v552_v40 = vld [vmem:[%s6837_s23 + $0x54] sm:$0xf] }
  0x34   : > { %6443 = vmatmul.mubr.msk.bf16.vlgmr.msra.gmra.mxu1 %vm285_vm1, %v5683_v44  ;;  %6543 = vmatpush3.bf16.msra.mxu0 %v6879_v21  ;;  %v1449_v21 = vrot.slane %v1335_v5, 5  ;;  %v696_v1 = vrot.slane %v695_v54, 4  ;;  %v1457_v5 = vsel %vm6896_vm6, %v1455_v60, %v1456_v51  ;;  %v722_v8 = vshll.u32 %v548_v52, 16  ;;  %v553_v46 = vld [vmem:[%s6837_s23 + $0x58] sm:$0xf] }
  0x35   : > { %6509 = vmatpush3.bf16.msra.mxu1 %v6874_v19  ;;  %6480 = vmatprep.mubr.msk.bf16.mxu0 %vm285_vm1, %v5733_v12  ;;  %v672_v19 = vrot.slane %v671_v17, 4  ;;  %v686_v53 = vrot.slane %v685_v45, 4  ;;  %v5735_v11 = vcombine.low %v1454_v59, %v1457_v5  ;;  %v709_v12 = vor.u32 %v708_v3, %v705_v2  ;;  %v554_v51 = vld [vmem:[%s6837_s23 + $0x5c] sm:$0x1]  ;;  %v1345_v57 = vld [vmem:[%s6837_s23 + $0x54] sm:$0xe] }
  0x36   : > { %6720 = vmatprep.subr.msk.bf16.mxu1 %vm334_vm0, %v6869_v18  ;;  %6446 = vmatprep.mubr.msk.bf16.mxu1 %vm285_vm1, %v5684_v16  ;;  %v1450_v38 = vsel %vm6896_vm6, %v1448_v30, %v1449_v21  ;;  %v701_v10 = vsel %vm6910_vm7, %v696_v1, %v700_v48  ;;  %v5719_v13 = vrot.slane %v1339_v58, 9  ;;  %v719_v16 = vor.u32 %v718_v7, %v714_v6  ;;  %v1346_v62 = vld [vmem:[%s6837_s23 + $0x58] sm:$0xf]  ;;  %v1347_v3 = vld [vmem:[%s6837_s23 + $0x5c] sm:$0x1] }
  0x37   : > { %v677_v18 = vsel %vm6910_vm7, %v672_v19, %v676_v20  ;;  %v5734_v44 = vcombine.low %v1447_v29, %v1450_v38  ;;  %v691_v0 = vsel %vm6910_vm7, %v686_v53, %v690_v39  ;;  %v724_v17 = vrot.slane %v722_v8, 5  ;;  %v555_v8 = vld [vmem:[%s6837_s23 + $0x60] sm:$0xf] }
  0x38   : > { %v5685_v43 = vcombine.low %v667_v33, %v677_v18  ;;  %v5686_v15 = vcombine.low %v691_v0, %v701_v10  ;;  %v1460_v20 = vrot.slane %v1340_v63, 5  ;;  %v710_v23 = vrot.slane %v709_v12, 4 }
  0x39   : > { %v1463_v25 = vrot.slane %v1341_v4, 5  ;;  %v727_v21 = vshrl.u32 %v549_v9, 16  ;;  %v730_v26 = vshll.u32 %v549_v9, 16  ;;  %v720_v28 = vrot.slane %v719_v16, 4 }
  0x3a   : > { %v1461_v19 = vsel %vm6896_vm6, %v5719_v13, %v1460_v20  ;;  %v1462_v29 = vrot.slane %v1460_v20, 4  ;;  %v736_v30 = vshll.u32 %v550_v14, 16  ;;  %v715_v32 = vsel %vm6910_vm7, %v710_v23, %v714_v6  ;;  %v556_v13 = vld [vmem:[%s6837_s23 + $0x64] sm:$0xf]  ;;  %v557_v20 = vld [vmem:[%s6837_s23 + $0x68] sm:$0x1] }
  0x3b   : > { %6481 = vmatmul.mubr.msk.bf16.gmra.mxu0 %vm285_vm1, %v5734_v44  ;;  %v729_v33 = vrot.slane %v727_v21, 4  ;;  %v732_v34 = vrot.slane %v730_v26, 5  ;;  %v740_v35 = vshrl.u32 %v550_v14, 16  ;;  %v725_v37 = vsel %vm6910_vm7, %v720_v28, %v724_v17  ;;  %v1348_v26 = vld [vmem:[%s6837_s23 + $0x60] sm:$0xe] }
  0x3c   : > { %6447 = vmatmul.mubr.msk.bf16.gmra.mxu1 %vm285_vm1, %v5685_v43  ;;  %6484 = vmatprep.mubr.msk.bf16.mxu0 %vm285_vm1, %v5735_v11  ;;  %v1464_v18 = vsel %vm6896_vm6, %v1462_v29, %v1463_v25  ;;  %v738_v38 = vrot.slane %v736_v30, 5  ;;  %v746_v39 = vshll.u32 %v551_v22, 16  ;;  %v5687_v41 = vcombine.low %v715_v32, %v725_v37  ;;  %v1349_v30 = vld [vmem:[%s6837_s23 + $0x64] sm:$0xf] }
  0x3d   : > { %6450 = vmatprep.mubr.msk.bf16.mxu1 %vm285_vm1, %v5686_v15  ;;  %v5736_v43 = vcombine.low %v1461_v19, %v1464_v18  ;;  %v733_v44 = vor.u32 %v732_v34, %v729_v33  ;;  %v742_v45 = vrot.slane %v740_v35, 4  ;;  %v5720_v48 = vrot.slane %v1342_v27, 9  ;;  %v1350_v35 = vld [vmem:[%s6837_s23 + $0x68] sm:$0x1] }
  0x3e   : > { %v748_v47 = vrot.slane %v746_v39, 5  ;;  %v1467_v49 = vrot.slane %v1343_v31, 5  ;;  %v1470_v50 = vrot.slane %v1344_v36, 5  ;;  %v751_v54 = vshrl.u32 %v552_v40, 16  ;;  %v558_v39 = vld [vmem:[%s6837_s23 + $0x6c] sm:$0xf] }
  0x3f   : > { %v734_v52 = vrot.slane %v733_v44, 4  ;;  %v743_v53 = vor.u32 %v742_v45, %v738_v38  ;;  %v754_v56 = vshll.u32 %v552_v40, 16  ;;  %v760_v60 = vshll.u32 %v553_v46, 16  ;;  %v559_v45 = vld [vmem:[%s6837_s23 + $0x70] sm:$0xf] }
  0x40   : > { %v1468_v58 = vsel %vm6896_vm6, %v5720_v48, %v1467_v49  ;;  %v1469_v59 = vrot.slane %v1467_v49, 4  ;;  %v764_v61 = vshrl.u32 %v553_v46, 16  ;;  %v753_v1 = vrot.slane %v751_v54, 4 }
  0x41   : > { %v739_v63 = vsel %vm6910_vm7, %v734_v52, %v738_v38  ;;  %v744_v0 = vrot.slane %v743_v53, 4  ;;  %v756_v2 = vrot.slane %v754_v56, 5  ;;  %v762_v5 = vrot.slane %v760_v60, 5  ;;  %v1351_v56 = vld [vmem:[%s6837_s23 + $0x6c] sm:$0xe] }
  0x42   : > { %v1471_v4 = vsel %vm6896_vm6, %v1469_v59, %v1470_v50  ;;  %v766_v6 = vrot.slane %v764_v61, 4  ;;  %v770_v7 = vshll.u32 %v554_v51, 16  ;;  %v5721_v12 = vrot.slane %v1345_v57, 9  ;;  %v560_v50 = vld [vmem:[%s6837_s23 + $0x74] sm:$0x1] }
  0x43   : > { %6485 = vmatmul.mubr.msk.bf16.gmra.mxu0 %vm285_vm1, %v5736_v43  ;;  %v749_v9 = vsel %vm6910_vm7, %v744_v0, %v748_v47  ;;  %v5737_v10 = vcombine.low %v1468_v58, %v1471_v4  ;;  %v757_v11 = vor.u32 %v756_v2, %v753_v1  ;;  %v1474_v17 = vrot.slane %v1346_v62, 5  ;;  %v1352_v61 = vld [vmem:[%s6837_s23 + $0x70] sm:$0xf]  ;;  %v1353_v2 = vld [vmem:[%s6837_s23 + $0x74] sm:$0x1] }
  0x44   : > { %6451 = vmatmul.mubr.msk.bf16.gmra.mxu1 %vm285_vm1, %v5687_v41  ;;  %v5688_v14 = vcombine.low %v739_v63, %v749_v9  ;;  %v767_v15 = vor.u32 %v766_v6, %v762_v5  ;;  %v772_v16 = vrot.slane %v770_v7, 5  ;;  %v1477_v23 = vrot.slane %v1347_v3, 5  ;;  %v561_v7 = vld [vmem:[%s6837_s23 + $0x78] sm:$0xf] }
  0x45   : > { %6488 = vmatprep.mubr.msk.bf16.mxu0 %vm285_vm1, %v5737_v10  ;;  %v758_v22 = vrot.slane %v757_v11, 4  ;;  %v775_v25 = vshrl.u32 %v555_v8, 16  ;;  %v778_v21 = vshll.u32 %v555_v8, 16  ;;  %v1475_v28 = vsel %vm6896_vm6, %v5721_v12, %v1474_v17  ;;  %v562_v12 = vld [vmem:[%s6837_s23 + $0x7c] sm:$0xf] }
  0x46   : > { %6454 = vmatprep.mubr.msk.bf16.mxu1 %vm285_vm1, %v5688_v14  ;;  %v768_v27 = vrot.slane %v767_v15, 4  ;;  %v1476_v19 = vrot.slane %v1474_v17, 4  ;;  %v784_v29 = vshll.u32 %v556_v13, 16  ;;  %v788_v34 = vshrl.u32 %v556_v13, 16  ;;  %v563_v17 = vld [vmem:[%s6837_s23 + $0x80] sm:$0x1] }
  0x47   : > { %v763_v31 = vsel %vm6910_vm7, %v758_v22, %v762_v5  ;;  %v777_v32 = vrot.slane %v775_v25, 4  ;;  %v780_v33 = vrot.slane %v778_v21, 5  ;;  %v794_v38 = vshll.u32 %v557_v20, 16  ;;  %v1354_v21 = vld [vmem:[%s6837_s23 + $0x78] sm:$0xe] }
  0x48   : > { %v773_v36 = vsel %vm6910_vm7, %v768_v27, %v772_v16  ;;  %v1478_v37 = vsel %vm6896_vm6, %v1476_v19, %v1477_v23  ;;  %v786_v18 = vrot.slane %v784_v29, 5  ;;  %v790_v44 = vrot.slane %v788_v34, 4  ;;  %v1355_v29 = vld [vmem:[%s6837_s23 + $0x7c] sm:$0xf]  ;;  %v1356_v34 = vld [vmem:[%s6837_s23 + $0x80] sm:$0x1] }
  0x49   : > { %v5689_v40 = vcombine.low %v763_v31, %v773_v36  ;;  %v5738_v41 = vcombine.low %v1475_v28, %v1478_v37  ;;  %v781_v43 = vor.u32 %v780_v33, %v777_v32  ;;  %v796_v46 = vrot.slane %v794_v38, 5  ;;  %v564_v38 = vld [vmem:[%s6837_s23 + $0x84] sm:$0xf] }
  0x4a   : > { %v5722_v47 = vrot.slane %v1348_v26, 9  ;;  %v1481_v48 = vrot.slane %v1349_v30, 5  ;;  %v1484_v49 = vrot.slane %v1350_v35, 5  ;;  %v791_v52 = vor.u32 %v790_v44, %v786_v18  ;;  %v565_v44 = vld [vmem:[%s6837_s23 + $0x88] sm:$0xf] }
  0x4b   : > { %6489 = vmatmul.mubr.msk.bf16.gmra.mxu0 %vm285_vm1, %v5738_v41  ;;  %v782_v51 = vrot.slane %v781_v43, 4  ;;  %v799_v53 = vshrl.u32 %v558_v39, 16  ;;  %v802_v54 = vshll.u32 %v558_v39, 16  ;;  %v808_v59 = vshll.u32 %v559_v45, 16 }
  0x4c   : > { %6455 = vmatmul.mubr.msk.bf16.gmra.mxu1 %vm285_vm1, %v5689_v40  ;;  %v1482_v57 = vsel %vm6896_vm6, %v5722_v47, %v1481_v48  ;;  %v1483_v58 = vrot.slane %v1481_v48, 4  ;;  %v812_v60 = vshrl.u32 %v559_v45, 16  ;;  %v792_v63 = vrot.slane %v791_v52, 4 }
  0x4d   : > { %v787_v62 = vsel %vm6910_vm7, %v782_v51, %v786_v18  ;;  %v801_v0 = vrot.slane %v799_v53, 4  ;;  %v804_v1 = vrot.slane %v802_v54, 5  ;;  %v810_v4 = vrot.slane %v808_v59, 5  ;;  %v1357_v54 = vld [vmem:[%s6837_s23 + $0x84] sm:$0xe] }
  0x4e   : > { %v1485_v3 = vsel %vm6896_vm6, %v1483_v58, %v1484_v49  ;;  %v814_v5 = vrot.slane %v812_v60, 4  ;;  %v818_v6 = vshll.u32 %v560_v50, 16  ;;  %v797_v8 = vsel %vm6910_vm7, %v792_v63, %v796_v46  ;;  %v566_v49 = vld [vmem:[%s6837_s23 + $0x8c] sm:$0x1]  ;;  %v1358_v60 = vld [vmem:[%s6837_s23 + $0x88] sm:$0xf] }
  0x4f   : > { %v5739_v9 = vcombine.low %v1482_v57, %v1485_v3  ;;  %v805_v10 = vor.u32 %v804_v1, %v801_v0  ;;  %v5723_v11 = vrot.slane %v1351_v56, 9  ;;  %v5690_v13 = vcombine.low %v787_v62, %v797_v8  ;;  %v1359_v1 = vld [vmem:[%s6837_s23 + $0x8c] sm:$0x1] }
  0x50   : > { %v815_v14 = vor.u32 %v814_v5, %v810_v4  ;;  %v820_v15 = vrot.slane %v818_v6, 5  ;;  %v1488_v16 = vrot.slane %v1352_v61, 5  ;;  %v1491_v22 = vrot.slane %v1353_v2, 5  ;;  %v567_v6 = vld [vmem:[%s6837_s23 + $0x90] sm:$0xf] }
  0x51   : > { %6492 = vmatprep.mubr.msk.bf16.mxu0 %vm285_vm1, %v5739_v9  ;;  %v806_v20 = vrot.slane %v805_v10, 4  ;;  %v823_v23 = vshrl.u32 %v561_v7, 16  ;;  %v826_v25 = vshll.u32 %v561_v7, 16  ;;  %6458 = vmatprep.mubr.msk.bf16.mxu1 %vm285_vm1, %v5690_v13  ;;  %v832_v19 = vshll.u32 %v562_v12, 16 }
  0x52   : > { %v816_v26 = vrot.slane %v815_v14, 4  ;;  %v1489_v27 = vsel %vm6896_vm6, %v5723_v11, %v1488_v16  ;;  %v1490_v28 = vrot.slane %v1488_v16, 4  ;;  %v836_v33 = vshrl.u32 %v562_v12, 16  ;;  %v568_v11 = vld [vmem:[%s6837_s23 + $0x94] sm:$0xf] }
  0x53   : > { %v811_v30 = vsel %vm6910_vm7, %v806_v20, %v810_v4  ;;  %v825_v31 = vrot.slane %v823_v23, 4  ;;  %v828_v32 = vrot.slane %v826_v25, 5  ;;  %v834_v37 = vrot.slane %v832_v19, 5  ;;  %v569_v12 = vld [vmem:[%s6837_s23 + $0x98] sm:$0x1] }
  0x54   : > { %v821_v35 = vsel %vm6910_vm7, %v816_v26, %v820_v15  ;;  %v1492_v36 = vsel %vm6896_vm6, %v1490_v28, %v1491_v22  ;;  %v842_v18 = vshll.u32 %v563_v17, 16  ;;  %v838_v43 = vrot.slane %v836_v33, 4  ;;  %v1360_v25 = vld [vmem:[%s6837_s23 + $0x90] sm:$0xe] }
  0x55   : > { %v5691_v39 = vcombine.low %v811_v30, %v821_v35  ;;  %v5740_v40 = vcombine.low %v1489_v27, %v1492_v36  ;;  %v829_v41 = vor.u32 %v828_v32, %v825_v31  ;;  %v5724_v46 = vrot.slane %v1354_v21, 9  ;;  %v1361_v21 = vld [vmem:[%s6837_s23 + $0x94] sm:$0xf] }
  0x56   : > { %v844_v45 = vrot.slane %v842_v18, 5  ;;  %v1495_v47 = vrot.slane %v1355_v29, 5  ;;  %v1498_v48 = vrot.slane %v1356_v34, 5  ;;  %v839_v51 = vor.u32 %v838_v43, %v834_v37  ;;  %v1362_v29 = vld [vmem:[%s6837_s23 + $0x98] sm:$0x1] }
  0x57   : > { %6459 = vmatmul.mubr.msk.bf16.gmra.mxu1 %vm285_vm1, %v5691_v39  ;;  %6493 = vmatmul.mubr.msk.bf16.gmra.mxu0 %vm285_vm1, %v5740_v40  ;;  %v830_v50 = vrot.slane %v829_v41, 4  ;;  %v847_v52 = vshrl.u32 %v564_v38, 16  ;;  %v850_v53 = vshll.u32 %v564_v38, 16  ;;  %v856_v58 = vshll.u32 %v565_v44, 16  ;;  %v570_v34 = vld [vmem:[%s6837_s23 + $0x9c] sm:$0xf] }
  0x58   : > { %v1496_v56 = vsel %vm6896_vm6, %v5724_v46, %v1495_v47  ;;  %v1497_v57 = vrot.slane %v1495_v47, 4  ;;  %v860_v59 = vshrl.u32 %v565_v44, 16  ;;  %v840_v62 = vrot.slane %v839_v51, 4  ;;  %v571_v43 = vld [vmem:[%s6837_s23 + $0xa0] sm:$0xf] }
  0x59   : > { %v835_v61 = vsel %vm6910_vm7, %v830_v50, %v834_v37  ;;  %v849_v63 = vrot.slane %v847_v52, 4  ;;  %v852_v0 = vrot.slane %v850_v53, 5  ;;  %v858_v3 = vrot.slane %v856_v58, 5  ;;  %v572_v44 = vld [vmem:[%s6837_s23 + $0xa4] sm:$0x1] }
  0x5a   : > { %v1499_v2 = vsel %vm6896_vm6, %v1497_v57, %v1498_v48  ;;  %v862_v4 = vrot.slane %v860_v59, 4  ;;  %v866_v5 = vshll.u32 %v566_v49, 16  ;;  %v845_v7 = vsel %vm6910_vm7, %v840_v62, %v844_v45  ;;  %v1363_v49 = vld [vmem:[%s6837_s23 + $0x9c] sm:$0xe] }
  0x5b   : > { %v5741_v8 = vcombine.low %v1496_v56, %v1499_v2  ;;  %v853_v9 = vor.u32 %v852_v0, %v849_v63  ;;  %v5725_v10 = vrot.slane %v1357_v54, 9  ;;  %v5692_v13 = vcombine.low %v835_v61, %v845_v7  ;;  %v1364_v54 = vld [vmem:[%s6837_s23 + $0xa0] sm:$0xf]  ;;  %v7118_v56 = vld [vmem:[%s8526_s1 + $0xc] sm:$0x3] }
  0x5c   : > { %v863_v14 = vor.u32 %v862_v4, %v858_v3  ;;  %v868_v15 = vrot.slane %v866_v5, 5  ;;  %v1502_v16 = vrot.slane %v1358_v60, 5  ;;  %v1505_v20 = vrot.slane %v1359_v1, 5  ;;  %v1365_v61 = vld [vmem:[%s6837_s23 + $0xa4] sm:$0x1]  ;;  %6721 = vmatprep.subr.msk.bf16.mxu0 %vm334_vm0, %v7118_v56 }
  0x5d   : > { %6496 = vmatprep.mubr.msk.bf16.mxu0 %vm285_vm1, %v5741_v8  ;;  %v854_v17 = vrot.slane %v853_v9, 4  ;;  %v871_v22 = vshrl.u32 %v567_v6, 16  ;;  %v874_v23 = vshll.u32 %v567_v6, 16  ;;  %6462 = vmatprep.mubr.msk.bf16.mxu1 %vm285_vm1, %v5692_v13  ;;  %v880_v19 = vshll.u32 %v568_v11, 16  ;;  %v573_v6 = vld [vmem:[%s6837_s23 + $0xa8] sm:$0xf] }
  0x5e   : > { %v864_v26 = vrot.slane %v863_v14, 4  ;;  %v1503_v27 = vsel %vm6896_vm6, %v5725_v10, %v1502_v16  ;;  %v1504_v28 = vrot.slane %v1502_v16, 4  ;;  %v884_v33 = vshrl.u32 %v568_v11, 16  ;;  %v574_v11 = vld [vmem:[%s6837_s23 + $0xac] sm:$0xf] }
  0x5f   : > { %v859_v30 = vsel %vm6910_vm7, %v854_v17, %v858_v3  ;;  %v873_v31 = vrot.slane %v871_v22, 4  ;;  %v876_v32 = vrot.slane %v874_v23, 5  ;;  %v882_v37 = vrot.slane %v880_v19, 5 }
  0x60   : > { %v869_v35 = vsel %vm6910_vm7, %v864_v26, %v868_v15  ;;  %v1506_v36 = vsel %vm6896_vm6, %v1504_v28, %v1505_v20  ;;  %v890_v18 = vshll.u32 %v569_v12, 16  ;;  %v886_v41 = vrot.slane %v884_v33, 4  ;;  %v575_v12 = vld [vmem:[%s6837_s23 + $0xb0] sm:$0x1] }
  0x61   : > { %v5693_v38 = vcombine.low %v859_v30, %v869_v35  ;;  %v5742_v39 = vcombine.low %v1503_v27, %v1506_v36  ;;  %v877_v40 = vor.u32 %v876_v32, %v873_v31  ;;  %v5726_v46 = vrot.slane %v1360_v25, 9  ;;  %v1366_v25 = vld [vmem:[%s6837_s23 + $0xa8] sm:$0xe] }
  0x62   : > { %v892_v45 = vrot.slane %v890_v18, 5  ;;  %v1509_v47 = vrot.slane %v1361_v21, 5  ;;  %v1512_v48 = vrot.slane %v1362_v29, 5  ;;  %v887_v51 = vor.u32 %v886_v41, %v882_v37  ;;  %v1367_v21 = vld [vmem:[%s6837_s23 + $0xac] sm:$0xf] }
  0x63   : > { %6463 = vmatmul.mubr.msk.bf16.gmra.mxu1 %vm285_vm1, %v5693_v38  ;;  %6497 = vmatmul.mubr.msk.bf16.gmra.mxu0 %vm285_vm1, %v5742_v39  ;;  %v878_v50 = vrot.slane %v877_v40, 4  ;;  %v895_v52 = vshrl.u32 %v570_v34, 16  ;;  %v898_v53 = vshll.u32 %v570_v34, 16  ;;  %v904_v59 = vshll.u32 %v571_v43, 16  ;;  %v1368_v29 = vld [vmem:[%s6837_s23 + $0xb0] sm:$0x1] }
  0x64   : > { %v1510_v57 = vsel %vm6896_vm6, %v5726_v46, %v1509_v47  ;;  %v1511_v58 = vrot.slane %v1509_v47, 4  ;;  %v908_v60 = vshrl.u32 %v571_v43, 16  ;;  %v888_v63 = vrot.slane %v887_v51, 4  ;;  %v576_v34 = vld [vmem:[%s6837_s23 + $0xb4] sm:$0xf] }
  0x65   : > { %v883_v62 = vsel %vm6910_vm7, %v878_v50, %v882_v37  ;;  %v897_v0 = vrot.slane %v895_v52, 4  ;;  %v900_v1 = vrot.slane %v898_v53, 5  ;;  %v906_v3 = vrot.slane %v904_v59, 5  ;;  %v577_v43 = vld [vmem:[%s6837_s23 + $0xb8] sm:$0xf] }
  0x66   : > { %v1513_v2 = vsel %vm6896_vm6, %v1511_v58, %v1512_v48  ;;  %v910_v4 = vrot.slane %v908_v60, 4  ;;  %v914_v5 = vshll.u32 %v572_v44, 16  ;;  %v893_v7 = vsel %vm6910_vm7, %v888_v63, %v892_v45  ;;  %v578_v44 = vld [vmem:[%s6837_s23 + $0xbc] sm:$0x1] }
  0x67   : > { %v5743_v8 = vcombine.low %v1510_v57, %v1513_v2  ;;  %v901_v9 = vor.u32 %v900_v1, %v897_v0  ;;  %v5727_v10 = vrot.slane %v1363_v49, 9  ;;  %v5694_v13 = vcombine.low %v883_v62, %v893_v7  ;;  %v1369_v49 = vld [vmem:[%s6837_s23 + $0xb4] sm:$0xe]  ;;  %v1371_v1 = vld [vmem:[%s6837_s23 + $0xbc] sm:$0x1] }
  0x68   : > { %v911_v14 = vor.u32 %v910_v4, %v906_v3  ;;  %v916_v15 = vrot.slane %v914_v5, 5  ;;  %v1516_v16 = vrot.slane %v1364_v54, 5  ;;  %v1519_v20 = vrot.slane %v1365_v61, 5  ;;  %v1370_v54 = vld [vmem:[%s6837_s23 + $0xb8] sm:$0xf] }
  0x69   : > { %6500 = vmatprep.mubr.msk.bf16.mxu0 %vm285_vm1, %v5743_v8  ;;  %v902_v17 = vrot.slane %v901_v9, 4  ;;  %v919_v22 = vshrl.u32 %v573_v6, 16  ;;  %v922_v23 = vshll.u32 %v573_v6, 16  ;;  %6466 = vmatprep.mubr.msk.bf16.mxu1 %vm285_vm1, %v5694_v13  ;;  %v928_v19 = vshll.u32 %v574_v11, 16  ;;  %v5828_v6 = vld [vmem:[%s6837_s23 + $0xc] sm:$0xf] }
  0x6a   : > { %v912_v26 = vrot.slane %v911_v14, 4  ;;  %v1517_v27 = vsel %vm6896_vm6, %v5727_v10, %v1516_v16  ;;  %v1518_v28 = vrot.slane %v1516_v16, 4  ;;  %v932_v33 = vshrl.u32 %v574_v11, 16  ;;  %v5829_v11 = vld [vmem:[%s6837_s23 + $0x10] sm:$0xf] }
  0x6b   : > { %v907_v30 = vsel %vm6910_vm7, %v902_v17, %v906_v3  ;;  %v921_v31 = vrot.slane %v919_v22, 4  ;;  %v924_v32 = vrot.slane %v922_v23, 5  ;;  %v930_v37 = vrot.slane %v928_v19, 5  ;;  %v5830_v16 = vld [vmem:[%s6837_s23 + $0x14] sm:$0x1] }
  0x6c   : > { %v917_v35 = vsel %vm6910_vm7, %v912_v26, %v916_v15  ;;  %v1520_v36 = vsel %vm6896_vm6, %v1518_v28, %v1519_v20  ;;  %v938_v18 = vshll.u32 %v575_v12, 16  ;;  %v934_v41 = vrot.slane %v932_v33, 4  ;;  %v5832_v19 = vld [vmem:[%s6837_s23 + $0x1c] sm:$0xf] }
  0x6d   : > { %v5695_v38 = vcombine.low %v907_v30, %v917_v35  ;;  %v5744_v39 = vcombine.low %v1517_v27, %v1520_v36  ;;  %v925_v40 = vor.u32 %v924_v32, %v921_v31  ;;  %v5728_v46 = vrot.slane %v1366_v25, 9  ;;  %v5831_v25 = vld [vmem:[%s6837_s23 + $0x18] sm:$0xf]  ;;  %v6749_v30 = vld [vmem:[%s6837_s23 + $0xc] sm:$0xff]  }
  0x6e   : > { %v940_v45 = vrot.slane %v938_v18, 5  ;;  %v1523_v47 = vrot.slane %v1367_v21, 5  ;;  %v1526_v48 = vrot.slane %v1368_v29, 5  ;;  %v935_v51 = vor.u32 %v934_v41, %v930_v37  ;;  %v5833_v18 = vld [vmem:[%s6837_s23 + $0x20] sm:$0x1] }
  0x6f   : > { %6467 = vmatmul.mubr.msk.bf16.gmra.mxu1 %vm285_vm1, %v5695_v38  ;;  %6501 = vmatmul.mubr.msk.bf16.gmra.mxu0 %vm285_vm1, %v5744_v39  ;;  %v926_v50 = vrot.slane %v925_v40, 4  ;;  %v943_v52 = vshrl.u32 %v576_v34, 16  ;;  %v946_v53 = vshll.u32 %v576_v34, 16  ;;  %v952_v59 = vshll.u32 %v577_v43, 16 }
  0x70   : > { %v1524_v57 = vsel %vm6896_vm6, %v5728_v46, %v1523_v47  ;;  %v1525_v58 = vrot.slane %v1523_v47, 4  ;;  %v956_v60 = vshrl.u32 %v577_v43, 16  ;;  %v936_v62 = vrot.slane %v935_v51, 4  ;;  %v5834_v43 = vld [vmem:[%s6837_s23 + $0x24] sm:$0xf] }
  0x71   : > { %v931_v61 = vsel %vm6910_vm7, %v926_v50, %v930_v37  ;;  %v945_v63 = vrot.slane %v943_v52, 4  ;;  %v948_v0 = vrot.slane %v946_v53, 5  ;;  %v954_v3 = vrot.slane %v952_v59, 5  ;;  %v5836_v59 = vld [vmem:[%s6837_s23 + $0x2c] sm:$0x1] }
  0x72   : > { %v1527_v2 = vsel %vm6896_vm6, %v1525_v58, %v1526_v48  ;;  %v958_v4 = vrot.slane %v956_v60, 4  ;;  %v962_v5 = vshll.u32 %v578_v44, 16  ;;  %v941_v7 = vsel %vm6910_vm7, %v936_v62, %v940_v45  ;;  %v5835_v44 = vld [vmem:[%s6837_s23 + $0x28] sm:$0xf] }
  0x73   : > { %v5745_v8 = vcombine.low %v1524_v57, %v1527_v2  ;;  %v949_v9 = vor.u32 %v948_v0, %v945_v63  ;;  %v5729_v10 = vrot.slane %v1369_v49, 9  ;;  %v5696_v12 = vcombine.low %v931_v61, %v941_v7  ;;  %v6750_v0 = vld [vmem:[%s6837_s23 + $0x18] sm:$0xff]  }
  0x74   : > { %v959_v13 = vor.u32 %v958_v4, %v954_v3  ;;  %v964_v14 = vrot.slane %v962_v5, 5  ;;  %v1530_v15 = vrot.slane %v1370_v54, 5  ;;  %v1533_v20 = vrot.slane %v1371_v1, 5  ;;  %v5837_v5 = vld [vmem:[%s6837_s23 + $0x30] sm:$0xf] }
  0x75   : > { %6504 = vmatprep.mubr.msk.bf16.mxu0 %vm285_vm1, %v5745_v8  ;;  %v950_v17 = vrot.slane %v949_v9, 4  ;;  %v2365_v22 = vshrl.u32 %v5828_v6, 16  ;;  %v2368_v23 = vshll.u32 %v5828_v6, 16  ;;  %6470 = vmatprep.mubr.msk.bf16.mxu1 %vm285_vm1, %v5696_v12  ;;  %v2374_v28 = vshll.u32 %v5829_v11, 16 }
  0x76   : > { %v960_v21 = vrot.slane %v959_v13, 4  ;;  %v1531_v26 = vsel %vm6896_vm6, %v5729_v10, %v1530_v15  ;;  %v1532_v27 = vrot.slane %v1530_v15, 4  ;;  %v2378_v33 = vshrl.u32 %v5829_v11, 16  ;;  %v6751_v11 = vld [vmem:[%s6837_s23 + $0x24] sm:$0xff]  }
  0x77   : > { %v955_v29 = vsel %vm6910_vm7, %v950_v17, %v954_v3  ;;  %v2367_v31 = vrot.slane %v2365_v22, 4  ;;  %v2370_v32 = vrot.slane %v2368_v23, 5  ;;  %v2376_v36 = vrot.slane %v2374_v28, 5 }
  0x78   : > { %v965_v34 = vsel %vm6910_vm7, %v960_v21, %v964_v14  ;;  %v1534_v35 = vsel %vm6896_vm6, %v1532_v27, %v1533_v20  ;;  %v2384_v37 = vshll.u32 %v5830_v16, 16  ;;  %v2380_v41 = vrot.slane %v2378_v33, 4  ;;  %v5838_v14 = vld [vmem:[%s6837_s23 + $0x34] sm:$0xf] }
  0x79   : > { %v5697_v38 = vcombine.low %v955_v29, %v965_v34  ;;  %v5746_v39 = vcombine.low %v1531_v26, %v1534_v35  ;;  %v2371_v40 = vor.u32 %v2370_v32, %v2367_v31  ;;  %v2389_v46 = vshrl.u32 %v5831_v25, 16  ;;  %v5841_v35 = vld [vmem:[%s6837_s23 + $0x40] sm:$0xf] }
  0x7a   : > { %v2386_v45 = vrot.slane %v2384_v37, 5  ;;  %v2392_v47 = vshll.u32 %v5831_v25, 16  ;;  %v2398_v48 = vshll.u32 %v5832_v19, 16  ;;  %v2381_v50 = vor.u32 %v2380_v41, %v2376_v36  ;;  %v5839_v25 = vld [vmem:[%s6837_s23 + $0x38] sm:$0x1] }
  0x7b   : > { %6471 = vmatmul.mubr.msk.bf16.gmra.mxu1 %vm285_vm1, %v5697_v38  ;;  %6505 = vmatmul.mubr.msk.bf16.gmra.mxu0 %vm285_vm1, %v5746_v39  ;;  %v2372_v49 = vrot.slane %v2371_v40, 4  ;;  %v2402_v51 = vshrl.u32 %v5832_v19, 16  ;;  %v2408_v52 = vshll.u32 %v5833_v18, 16  ;;  %v2391_v53 = vrot.slane %v2389_v46, 4  ;;  %v5842_v39 = vld [vmem:[%s6837_s23 + $0x44] sm:$0x1] }
  0x7c   : > { %6510 = vmatprep.mubr.msk.bf16.mxu1 %vm285_vm1, %v6749_v30  ;;  %v2394_v54 = vrot.slane %v2392_v47, 5  ;;  %v2400_v57 = vrot.slane %v2398_v48, 5  ;;  %v3836_v58 = vsel %vm334_vm0, %v7118_v56, 0  ;;  %v2382_v61 = vrot.slane %v2381_v50, 4  ;;  %v5840_v30 = vld [vmem:[%s6837_s23 + $0x3c] sm:$0xf] }
  0x7d   : > { %v2377_v60 = vsel %vm6910_vm7, %v2372_v49, %v2376_v36  ;;  %v2404_v62 = vrot.slane %v2402_v51, 4  ;;  %v2410_v63 = vrot.slane %v2408_v52, 5  ;;  %v2413_v2 = vshrl.u32 %v5834_v43, 16  ;;  %v5843_v49 = vld [vmem:[%s6837_s23 + $0x48] sm:$0xf]  ;;  %v6753_v52 = vld [vmem:[%s6837_s23 + $0x3c] sm:$0xff]  }
  0x7e   : > { %v2395_v1 = vor.u32 %v2394_v54, %v2391_v53  ;;  %v2416_v3 = vshll.u32 %v5834_v43, 16  ;;  %v2422_v4 = vshll.u32 %v5835_v44, 16  ;;  %v2387_v6 = vsel %vm6910_vm7, %v2382_v61, %v2386_v45  ;;  %v6752_v45 = vld [vmem:[%s6837_s23 + $0x30] sm:$0xff]  }
  0x7f   : > { %v2405_v7 = vor.u32 %v2404_v62, %v2400_v57  ;;  %v2426_v56 = vshrl.u32 %v5835_v44, 16  ;;  %v2432_v8 = vshll.u32 %v5836_v59, 16  ;;  %v5877_v9 = vcombine.low %v2377_v60, %v2387_v6 }
  0x80   : > { %v2396_v10 = vrot.slane %v2395_v1, 4  ;;  %v2415_v12 = vrot.slane %v2413_v2, 4  ;;  %v2418_v13 = vrot.slane %v2416_v3, 5  ;;  %v2424_v16 = vrot.slane %v2422_v4, 5 }
  0x81   : > { %v2406_v15 = vrot.slane %v2405_v7, 4  ;;  %v2428_v17 = vrot.slane %v2426_v56, 4  ;;  %v2434_v20 = vrot.slane %v2432_v8, 5  ;;  %6544 = vmatprep.mubr.msk.bf16.mxu0 %vm285_vm1, %v5877_v9  ;;  %v2437_v21 = vshrl.u32 %v5837_v5, 16  ;;  %v5846_v7 = vld [vmem:[%s6837_s23 + $0x54] sm:$0xf] }
  0x82   : > { %v2401_v22 = vsel %vm6910_vm7, %v2396_v10, %v2400_v57  ;;  %v2419_v23 = vor.u32 %v2418_v13, %v2415_v12  ;;  %v2440_v26 = vshll.u32 %v5837_v5, 16  ;;  %v2446_v19 = vshll.u32 %v5838_v14, 16  ;;  %v5844_v57 = vld [vmem:[%s6837_s23 + $0x4c] sm:$0xf] }
  0x83   : > { %6511 = vmatmul.mubr.msk.bf16.vlgmr.msra.gmra.mxu1 %vm285_vm1, %v6750_v0  ;;  %v2411_v27 = vsel %vm6910_vm7, %v2406_v15, %v2410_v63  ;;  %v2429_v28 = vor.u32 %v2428_v17, %v2424_v16  ;;  %v2450_v29 = vshrl.u32 %v5838_v14, 16  ;;  %v2439_v33 = vrot.slane %v2437_v21, 4  ;;  %v5845_v0 = vld [vmem:[%s6837_s23 + $0x50] sm:$0x1]  ;;  %v6754_v13 = vld [vmem:[%s6837_s23 + $0x48] sm:$0xff]  }
  0x84   : > { %v5878_v31 = vcombine.low %v2401_v22, %v2411_v27  ;;  %6577 = vmatpush3.bf16.msra.mxu1 %v6885_v24  ;;  %6514 = vmatprep.mubr.msk.bf16.mxu1 %vm285_vm1, %v6751_v11  ;;  %v2420_v32 = vrot.slane %v2419_v23, 4  ;;  %v2442_v34 = vrot.slane %v2440_v26, 5  ;;  %v2448_v37 = vrot.slane %v2446_v19, 5  ;;  %v5847_v11 = vld [vmem:[%s6837_s23 + $0x58] sm:$0xf] }
  0x85   : > { %v2430_v36 = vrot.slane %v2429_v28, 4  ;;  %v2452_v18 = vrot.slane %v2450_v29, 4  ;;  %v2456_v38 = vshll.u32 %v5839_v25, 16  ;;  %v2461_v41 = vshrl.u32 %v5840_v30, 16  ;;  %v6755_v22 = vld [vmem:[%s6837_s23 + $0x54] sm:$0xff]  }
  0x86   : > { %6545 = vmatmul.mubr.msk.bf16.vlgmr.msra.gmra.mxu0 %vm285_vm1, %v5878_v31  ;;  %v2425_v40 = vsel %vm6910_vm7, %v2420_v32, %v2424_v16  ;;  %v2443_v24 = vor.u32 %v2442_v34, %v2439_v33  ;;  %v2464_v43 = vshll.u32 %v5840_v30, 16  ;;  %v2470_v48 = vshll.u32 %v5841_v35, 16  ;;  %v5848_v23 = vld [vmem:[%s6837_s23 + $0x5c] sm:$0x1]  ;;  %v5849_v29 = vld [vmem:[%s6837_s23 + $0x60] sm:$0xf] }
  0x87   : > { %6611 = vmatpush3.bf16.msra.mxu0 %v3836_v58  ;;  %v2435_v44 = vsel %vm6910_vm7, %v2430_v36, %v2434_v20  ;;  %v2453_v46 = vor.u32 %v2452_v18, %v2448_v37  ;;  %v2458_v47 = vrot.slane %v2456_v38, 5  ;;  %v2463_v53 = vrot.slane %v2461_v41, 4  ;;  %v5850_v34 = vld [vmem:[%s6837_s23 + $0x64] sm:$0xf]  ;;  %v5851_v41 = vld [vmem:[%s6837_s23 + $0x68] sm:$0x1] }
  0x88   : > { %v5879_v50 = vcombine.low %v2425_v40, %v2435_v44  ;;  %v2444_v51 = vrot.slane %v2443_v24, 4  ;;  %v2466_v54 = vrot.slane %v2464_v43, 5  ;;  %v2472_v60 = vrot.slane %v2470_v48, 5  ;;  %v5852_v43 = vld [vmem:[%s6837_s23 + $0x6c] sm:$0xf] }
  0x89   : > { %v2454_v59 = vrot.slane %v2453_v46, 4  ;;  %v2474_v61 = vshrl.u32 %v5841_v35, 16  ;;  %v2480_v58 = vshll.u32 %v5842_v39, 16  ;;  %v2485_v1 = vshrl.u32 %v5843_v49, 16  ;;  %v5853_v48 = vld [vmem:[%s6837_s23 + $0x70] sm:$0xf] }
  0x8a   : > { %6548 = vmatprep.mubr.msk.bf16.mxu0 %vm285_vm1, %v5879_v50  ;;  %v2449_v62 = vsel %vm6910_vm7, %v2444_v51, %v2448_v37  ;;  %v2467_v63 = vor.u32 %v2466_v54, %v2463_v53  ;;  %v2488_v2 = vshll.u32 %v5843_v49, 16  ;;  %v2494_v6 = vshll.u32 %v5844_v57, 16 }
  0x8b   : > { %6515 = vmatmul.mubr.msk.bf16.gmra.mxu1 %vm285_vm1, %v6752_v45  ;;  %v2459_v3 = vsel %vm6910_vm7, %v2454_v59, %v2458_v47  ;;  %v2476_v4 = vrot.slane %v2474_v61, 4  ;;  %v2482_v5 = vrot.slane %v2480_v58, 5  ;;  %v2487_v9 = vrot.slane %v2485_v1, 4 }
  0x8c   : > { %v5880_v56 = vcombine.low %v2449_v62, %v2459_v3  ;;  %6518 = vmatprep.mubr.msk.bf16.mxu1 %vm285_vm1, %v6753_v52  ;;  %v2468_v8 = vrot.slane %v2467_v63, 4  ;;  %v2490_v10 = vrot.slane %v2488_v2, 5  ;;  %v2496_v14 = vrot.slane %v2494_v6, 5  ;;  %v6756_v63 = vld [vmem:[%s6837_s23 + $0x60] sm:$0xff]   ;;  %v5854_v3 = vld [vmem:[%s6837_s23 + $0x74] sm:$0x1] }
  0x8d   : > { %v2477_v12 = vor.u32 %v2476_v4, %v2472_v60  ;;  %v2498_v15 = vshrl.u32 %v5844_v57, 16  ;;  %v2504_v16 = vshll.u32 %v5845_v0, 16  ;;  %v2509_v25 = vshrl.u32 %v5846_v7, 16  ;;  %v6757_v6 = vld [vmem:[%s6837_s23 + $0x6c] sm:$0xff]  }
  0x8e   : > { %6549 = vmatmul.mubr.msk.bf16.gmra.mxu0 %vm285_vm1, %v5880_v56  ;;  %v2473_v17 = vsel %vm6910_vm7, %v2468_v8, %v2472_v60  ;;  %v2491_v20 = vor.u32 %v2490_v10, %v2487_v9  ;;  %v2512_v21 = vshll.u32 %v5846_v7, 16  ;;  %v2518_v19 = vshll.u32 %v5847_v11, 16  ;;  %v5855_v9 = vld [vmem:[%s6837_s23 + $0x78] sm:$0xf] }
  0x8f   : > { %v2478_v26 = vrot.slane %v2477_v12, 4  ;;  %v2500_v27 = vrot.slane %v2498_v15, 4  ;;  %v2506_v28 = vrot.slane %v2504_v16, 5  ;;  %v2511_v31 = vrot.slane %v2509_v25, 4 }
  0x90   : > { %v2492_v30 = vrot.slane %v2491_v20, 4  ;;  %v2514_v32 = vrot.slane %v2512_v21, 5  ;;  %v2522_v33 = vshrl.u32 %v5847_v11, 16  ;;  %v2520_v37 = vrot.slane %v2518_v19, 5 }
  0x91   : > { %v2483_v35 = vsel %vm6910_vm7, %v2478_v26, %v2482_v5  ;;  %v2501_v36 = vor.u32 %v2500_v27, %v2496_v14  ;;  %v2528_v18 = vshll.u32 %v5848_v23, 16  ;;  %v2533_v46 = vshrl.u32 %v5849_v29, 16 }
  0x92   : > { %v5881_v38 = vcombine.low %v2473_v17, %v2483_v35  ;;  %v2497_v39 = vsel %vm6910_vm7, %v2492_v30, %v2496_v14  ;;  %v2515_v40 = vor.u32 %v2514_v32, %v2511_v31  ;;  %v2524_v24 = vrot.slane %v2522_v33, 4  ;;  %v5856_v14 = vld [vmem:[%s6837_s23 + $0x7c] sm:$0xf]  ;;  %v5858_v30 = vld [vmem:[%s6837_s23 + $0x84] sm:$0xf] }
  0x93   : > { %6519 = vmatmul.mubr.msk.bf16.gmra.mxu1 %vm285_vm1, %v6754_v13  ;;  %v2502_v44 = vrot.slane %v2501_v36, 4  ;;  %v2530_v45 = vrot.slane %v2528_v18, 5  ;;  %v2536_v47 = vshll.u32 %v5849_v29, 16  ;;  %v2542_v51 = vshll.u32 %v5850_v34, 16  ;;  %v7267_v31 = vld [vmem:[%s8526_s1 + $0xe] sm:$0x3] }
  0x94   : > { %6552 = vmatprep.mubr.msk.bf16.mxu0 %vm285_vm1, %v5881_v38  ;;  %6522 = vmatprep.mubr.msk.bf16.mxu1 %vm285_vm1, %v6755_v22  ;;  %v2516_v49 = vrot.slane %v2515_v40, 4  ;;  %v2525_v50 = vor.u32 %v2524_v24, %v2520_v37  ;;  %v2546_v52 = vshrl.u32 %v5850_v34, 16  ;;  %v2535_v54 = vrot.slane %v2533_v46, 4  ;;  %v5857_v22 = vld [vmem:[%s6837_s23 + $0x80] sm:$0x1]  ;;  %v6759_v46 = vld [vmem:[%s6837_s23 + $0x84] sm:$0xff]  }
  0x95   : > { %v2507_v53 = vsel %vm6910_vm7, %v2502_v44, %v2506_v28  ;;  %v2538_v57 = vrot.slane %v2536_v47, 5  ;;  %v2552_v59 = vshll.u32 %v5851_v41, 16  ;;  %v2544_v62 = vrot.slane %v2542_v51, 5  ;;  %v5859_v36 = vld [vmem:[%s6837_s23 + $0x88] sm:$0xf]  ;;  %6722 = vmatprep.subr.msk.bf16.mxu1 %vm334_vm0, %v7267_v31 }
  0x96   : > { %v5882_v60 = vcombine.low %v2497_v39, %v2507_v53  ;;  %v2521_v61 = vsel %vm6910_vm7, %v2516_v49, %v2520_v37  ;;  %v2526_v58 = vrot.slane %v2525_v50, 4  ;;  %v2548_v1 = vrot.slane %v2546_v52, 4  ;;  %v6758_v39 = vld [vmem:[%s6837_s23 + $0x78] sm:$0xff]   ;;  %v5860_v24 = vld [vmem:[%s6837_s23 + $0x8c] sm:$0x1] }
  0x97   : > { %v2539_v0 = vor.u32 %v2538_v57, %v2535_v54  ;;  %v2554_v2 = vrot.slane %v2552_v59, 5  ;;  %v2557_v4 = vshrl.u32 %v5852_v43, 16  ;;  %v2560_v7 = vshll.u32 %v5852_v43, 16  ;;  %v5861_v41 = vld [vmem:[%s6837_s23 + $0x90] sm:$0xf] }
  0x98   : > { %6553 = vmatmul.mubr.msk.bf16.gmra.mxu0 %vm285_vm1, %v5882_v60  ;;  %v2531_v5 = vsel %vm6910_vm7, %v2526_v58, %v2530_v45  ;;  %v2566_v56 = vshll.u32 %v5853_v48, 16  ;;  %v2570_v8 = vshrl.u32 %v5853_v48, 16  ;;  %v2549_v12 = vor.u32 %v2548_v1, %v2544_v62  ;;  %v7286_v52 = vld [vmem:[%s8526_s1 + $0x10] sm:$0x3]  ;;  %v5862_v60 = vld [vmem:[%s6837_s23 + $0x94] sm:$0xf] }
  0x99   : > { %v5883_v10 = vcombine.low %v2521_v61, %v2531_v5  ;;  %v2540_v11 = vrot.slane %v2539_v0, 4  ;;  %v2559_v13 = vrot.slane %v2557_v4, 4  ;;  %v2562_v15 = vrot.slane %v2560_v7, 5  ;;  %6723 = vmatprep.subr.msk.bf16.mxu0 %vm334_vm0, %v7286_v52  ;;  %v5863_v0 = vld [vmem:[%s6837_s23 + $0x98] sm:$0x1] }
  0x9a   : > { %v2568_v16 = vrot.slane %v2566_v56, 5  ;;  %v2572_v17 = vrot.slane %v2570_v8, 4  ;;  %v2576_v20 = vshll.u32 %v5854_v3, 16  ;;  %v2550_v25 = vrot.slane %v2549_v12, 4  ;;  %v5864_v1 = vld [vmem:[%s6837_s23 + $0x9c] sm:$0xf] }
  0x9b   : > { %6556 = vmatprep.mubr.msk.bf16.mxu0 %vm285_vm1, %v5883_v10  ;;  %6523 = vmatmul.mubr.msk.bf16.gmra.mxu1 %vm285_vm1, %v6756_v63  ;;  %v2545_v23 = vsel %vm6910_vm7, %v2540_v11, %v2544_v62  ;;  %v2581_v21 = vshrl.u32 %v5855_v9, 16  ;;  %v2584_v26 = vshll.u32 %v5855_v9, 16  ;;  %v2563_v27 = vor.u32 %v2562_v15, %v2559_v13 }
  0x9c   : > { %6526 = vmatprep.mubr.msk.bf16.mxu1 %vm285_vm1, %v6757_v6  ;;  %v2573_v28 = vor.u32 %v2572_v17, %v2568_v16  ;;  %v2578_v19 = vrot.slane %v2576_v20, 5  ;;  %v2590_v29 = vshll.u32 %v5856_v14, 16  ;;  %v2555_v32 = vsel %vm6910_vm7, %v2550_v25, %v2554_v2  ;;  %v6761_v20 = vld [vmem:[%s6837_s23 + $0x9c] sm:$0xff]  }
  0x9d   : > { %v2583_v33 = vrot.slane %v2581_v21, 4  ;;  %v2586_v34 = vrot.slane %v2584_v26, 5  ;;  %v2594_v35 = vshrl.u32 %v5856_v14, 16  ;;  %v5884_v37 = vcombine.low %v2545_v23, %v2555_v32 }
  0x9e   : > { %v2564_v18 = vrot.slane %v2563_v27, 4  ;;  %v2574_v38 = vrot.slane %v2573_v28, 4  ;;  %v2592_v40 = vrot.slane %v2590_v29, 5  ;;  %v2600_v45 = vshll.u32 %v5857_v22, 16  ;;  %v5865_v22 = vld [vmem:[%s6837_s23 + $0xa0] sm:$0xf] }
  0x9f   : > { %v2587_v43 = vor.u32 %v2586_v34, %v2583_v33  ;;  %v2596_v44 = vrot.slane %v2594_v35, 4  ;;  %v2605_v47 = vshrl.u32 %v5858_v30, 16  ;;  %v2608_v50 = vshll.u32 %v5858_v30, 16  ;;  %v5866_v29 = vld [vmem:[%s6837_s23 + $0xa4] sm:$0x1] }
  0xa0   : > { %6557 = vmatmul.mubr.msk.bf16.gmra.mxu0 %vm285_vm1, %v5884_v37  ;;  %v2569_v48 = vsel %vm6910_vm7, %v2564_v18, %v2568_v16  ;;  %v2579_v49 = vsel %vm6910_vm7, %v2574_v38, %v2578_v19  ;;  %v2614_v51 = vshll.u32 %v5859_v36, 16  ;;  %v2602_v59 = vrot.slane %v2600_v45, 5  ;;  %v6760_v16 = vld [vmem:[%s6837_s23 + $0x90] sm:$0xff]  }
  0xa1   : > { %v5885_v53 = vcombine.low %v2569_v48, %v2579_v49  ;;  %v2588_v54 = vrot.slane %v2587_v43, 4  ;;  %v2597_v57 = vor.u32 %v2596_v44, %v2592_v40  ;;  %v2607_v61 = vrot.slane %v2605_v47, 4  ;;  %v5869_v48 = vld [vmem:[%s6837_s23 + $0xb0] sm:$0x1] }
  0xa2   : > { %v2610_v58 = vrot.slane %v2608_v50, 5  ;;  %v2616_v62 = vrot.slane %v2614_v51, 5  ;;  %v2618_v63 = vshrl.u32 %v5859_v36, 16  ;;  %v2624_v4 = vshll.u32 %v5860_v24, 16  ;;  %v5867_v36 = vld [vmem:[%s6837_s23 + $0xa8] sm:$0xf] }
  0xa3   : > { %6560 = vmatprep.mubr.msk.bf16.mxu0 %vm285_vm1, %v5885_v53  ;;  %6527 = vmatmul.mubr.msk.bf16.gmra.mxu1 %vm285_vm1, %v6758_v39  ;;  %v2593_v2 = vsel %vm6910_vm7, %v2588_v54, %v2592_v40  ;;  %v2598_v3 = vrot.slane %v2597_v57, 4  ;;  %v2629_v5 = vshrl.u32 %v5861_v41, 16  ;;  %v2632_v56 = vshll.u32 %v5861_v41, 16  ;;  %v5868_v40 = vld [vmem:[%s6837_s23 + $0xac] sm:$0xf] }
  0xa4   : > { %6530 = vmatprep.mubr.msk.bf16.mxu1 %vm285_vm1, %v6759_v46  ;;  %v2611_v6 = vor.u32 %v2610_v58, %v2607_v61  ;;  %v2620_v7 = vrot.slane %v2618_v63, 4  ;;  %v2638_v8 = vshll.u32 %v5862_v60, 16  ;;  %v2626_v10 = vrot.slane %v2624_v4, 5  ;;  %v6762_v53 = vld [vmem:[%s6837_s23 + $0xa8] sm:$0xff]   ;;  %v5871_v63 = vld [vmem:[%s6837_s23 + $0xb8] sm:$0xf] }
  0xa5   : > { %v2603_v9 = vsel %vm6910_vm7, %v2598_v3, %v2602_v59  ;;  %v2631_v11 = vrot.slane %v2629_v5, 4  ;;  %v2642_v12 = vshrl.u32 %v5862_v60, 16  ;;  %v2634_v17 = vrot.slane %v2632_v56, 5  ;;  %v5870_v59 = vld [vmem:[%s6837_s23 + $0xb4] sm:$0xf] }
  0xa6   : > { %v5886_v13 = vcombine.low %v2593_v2, %v2603_v9  ;;  %v2612_v14 = vrot.slane %v2611_v6, 4  ;;  %v2621_v15 = vor.u32 %v2620_v7, %v2616_v62  ;;  %v2640_v23 = vrot.slane %v2638_v8, 5  ;;  %v6763_v6 = vld [vmem:[%s6837_s23 + $0xb4] sm:$0xff]   ;;  %v5872_v7 = vld [vmem:[%s6837_s23 + $0xbc] sm:$0x1] }
  0xa7   : > { %v2644_v25 = vrot.slane %v2642_v12, 4  ;;  %v2648_v21 = vshll.u32 %v5863_v0, 16  ;;  %v2653_v26 = vshrl.u32 %v5864_v1, 16  ;;  %v2635_v19 = vor.u32 %v2634_v17, %v2631_v11 }
  0xa8   : > { %6561 = vmatmul.mubr.msk.bf16.gmra.mxu0 %vm285_vm1, %v5886_v13  ;;  %v2617_v27 = vsel %vm6910_vm7, %v2612_v14, %v2616_v62  ;;  %v2622_v28 = vrot.slane %v2621_v15, 4  ;;  %v2656_v30 = vshll.u32 %v5864_v1, 16  ;;  %v2662_v35 = vshll.u32 %v5865_v22, 16  ;;  %v5873_v13 = vld [vmem:[%s6837_s23 + $0xc0] sm:$0xf] }
  0xa9   : > { %v2645_v32 = vor.u32 %v2644_v25, %v2640_v23  ;;  %v2650_v33 = vrot.slane %v2648_v21, 5  ;;  %v2655_v34 = vrot.slane %v2653_v26, 4  ;;  %v2636_v18 = vrot.slane %v2635_v19, 4  ;;  %v5875_v26 = vld [vmem:[%s6837_s23 + $0xc8] sm:$0x1] }
  0xaa   : > { %v2627_v37 = vsel %vm6910_vm7, %v2622_v28, %v2626_v10  ;;  %v2658_v38 = vrot.slane %v2656_v30, 5  ;;  %v2666_v39 = vshrl.u32 %v5865_v22, 16  ;;  %v2664_v43 = vrot.slane %v2662_v35, 5  ;;  %v5909_v30 = vld [vmem:[%s6837_s23 + $0xc] sm:$0xe] }
  0xab   : > { %v5887_v24 = vcombine.low %v2617_v27, %v2627_v37  ;;  %6531 = vmatmul.mubr.msk.bf16.gmra.mxu1 %vm285_vm1, %v6760_v16  ;;  %v2646_v41 = vrot.slane %v2645_v32, 4  ;;  %v2672_v44 = vshll.u32 %v5866_v29, 16  ;;  %v2641_v45 = vsel %vm6910_vm7, %v2636_v18, %v2640_v23  ;;  %v5910_v32 = vld [vmem:[%s6837_s23 + $0x10] sm:$0xf]  ;;  %v5911_v37 = vld [vmem:[%s6837_s23 + $0x14] sm:$0x1] }
  0xac   : > { %6534 = vmatprep.mubr.msk.bf16.mxu1 %vm285_vm1, %v6761_v20  ;;  %v2659_v46 = vor.u32 %v2658_v38, %v2655_v34  ;;  %v2668_v47 = vrot.slane %v2666_v39, 4  ;;  %v2677_v49 = vshrl.u32 %v5867_v36, 16  ;;  %v2680_v54 = vshll.u32 %v5867_v36, 16  ;;  %v5874_v20 = vld [vmem:[%s6837_s23 + $0xc4] sm:$0xf] }
  0xad   : > { %6564 = vmatprep.mubr.msk.bf16.mxu0 %vm285_vm1, %v5887_v24  ;;  %v2651_v50 = vsel %vm6910_vm7, %v2646_v41, %v2650_v33  ;;  %v2674_v51 = vrot.slane %v2672_v44, 5  ;;  %v2686_v57 = vshll.u32 %v5868_v40, 16  ;;  %v2690_v2 = vshrl.u32 %v5868_v40, 16  ;;  %v5912_v24 = vld [vmem:[%s6837_s23 + $0x18] sm:$0xe] }
  0xae   : > { %v5888_v60 = vcombine.low %v2641_v45, %v2651_v50  ;;  %v2660_v61 = vrot.slane %v2659_v46, 4  ;;  %v2669_v58 = vor.u32 %v2668_v47, %v2664_v43  ;;  %v2679_v62 = vrot.slane %v2677_v49, 4  ;;  %v5913_v47 = vld [vmem:[%s6837_s23 + $0x1c] sm:$0xf] }
  0xaf   : > { %v2682_v0 = vrot.slane %v2680_v54, 5  ;;  %v2688_v1 = vrot.slane %v2686_v57, 5  ;;  %v2696_v3 = vshll.u32 %v5869_v48, 16  ;;  %v2701_v56 = vshrl.u32 %v5870_v59, 16  ;;  %v5914_v48 = vld [vmem:[%s6837_s23 + $0x20] sm:$0x1] }
  0xb0   : > { %6565 = vmatmul.mubr.msk.bf16.gmra.mxu0 %vm285_vm1, %v5888_v60  ;;  %v2665_v4 = vsel %vm6910_vm7, %v2660_v61, %v2664_v43  ;;  %v2670_v5 = vrot.slane %v2669_v58, 4  ;;  %v2704_v8 = vshll.u32 %v5870_v59, 16  ;;  %v2692_v10 = vrot.slane %v2690_v2, 4  ;;  %v6764_v43 = vld [vmem:[%s6837_s23 + $0xc0] sm:$0xff]   ;;  %v5916_v58 = vld [vmem:[%s6837_s23 + $0x28] sm:$0xf] }
  0xb1   : > { %v2683_v9 = vor.u32 %v2682_v0, %v2679_v62  ;;  %v2698_v11 = vrot.slane %v2696_v3, 5  ;;  %v2710_v12 = vshll.u32 %v5871_v63, 16  ;;  %v2703_v15 = vrot.slane %v2701_v56, 4  ;;  %v5915_v54 = vld [vmem:[%s6837_s23 + $0x24] sm:$0xe] }
  0xb2   : > { %v2675_v14 = vsel %vm6910_vm7, %v2670_v5, %v2674_v51  ;;  %v2706_v16 = vrot.slane %v2704_v8, 5  ;;  %v2714_v17 = vshrl.u32 %v5871_v63, 16  ;;  %v2693_v25 = vor.u32 %v2692_v10, %v2688_v1  ;;  %v5917_v2 = vld [vmem:[%s6837_s23 + $0x2c] sm:$0x1]  ;;  %v5918_v3 = vld [vmem:[%s6837_s23 + $0x30] sm:$0xe] }
  0xb3   : > { %v5889_v22 = vcombine.low %v2665_v4, %v2675_v14  ;;  %6535 = vmatmul.mubr.msk.bf16.gmra.mxu1 %vm285_vm1, %v6762_v53  ;;  %v2684_v23 = vrot.slane %v2683_v9, 4  ;;  %v2712_v21 = vrot.slane %v2710_v12, 5  ;;  %v2720_v19 = vshll.u32 %v5872_v7, 16  ;;  %v5920_v12 = vld [vmem:[%s6837_s23 + $0x38] sm:$0x1] }
  0xb4   : > { %6538 = vmatprep.mubr.msk.bf16.mxu1 %vm285_vm1, %v6763_v6  ;;  %v2707_v27 = vor.u32 %v2706_v16, %v2703_v15  ;;  %v2716_v28 = vrot.slane %v2714_v17, 4  ;;  %v2725_v29 = vshrl.u32 %v5873_v13, 16  ;;  %v2694_v34 = vrot.slane %v2693_v25, 4  ;;  %v6765_v16 = vld [vmem:[%s6837_s23 + $0x18] sm:$0xff]  }
  0xb5   : > { %6568 = vmatprep.mubr.msk.bf16.mxu0 %vm285_vm1, %v5889_v22  ;;  %v2689_v33 = vsel %vm6910_vm7, %v2684_v23, %v2688_v1  ;;  %v2728_v35 = vshll.u32 %v5873_v13, 16  ;;  %v2734_v36 = vshll.u32 %v5874_v20, 16  ;;  %v2722_v39 = vrot.slane %v2720_v19, 5  ;;  %v5921_v13 = vld [vmem:[%s6837_s23 + $0x3c] sm:$0xe] }
  0xb6   : > { %v2708_v18 = vrot.slane %v2707_v27, 4  ;;  %v2717_v38 = vor.u32 %v2716_v28, %v2712_v21  ;;  %v2727_v40 = vrot.slane %v2725_v29, 4  ;;  %v2699_v41 = vsel %vm6910_vm7, %v2694_v34, %v2698_v11  ;;  %v5919_v11 = vld [vmem:[%s6837_s23 + $0x34] sm:$0xf]  ;;  %v5922_v22 = vld [vmem:[%s6837_s23 + $0x40] sm:$0xf] }
  0xb7   : > { %v2730_v44 = vrot.slane %v2728_v35, 5  ;;  %v2736_v45 = vrot.slane %v2734_v36, 5  ;;  %v2738_v46 = vshrl.u32 %v5874_v20, 16  ;;  %v5890_v49 = vcombine.low %v2689_v33, %v2699_v41  ;;  %v5923_v23 = vld [vmem:[%s6837_s23 + $0x44] sm:$0x1] }
  0xb8   : > { %v2713_v50 = vsel %vm6910_vm7, %v2708_v18, %v2712_v21  ;;  %v2718_v51 = vrot.slane %v2717_v38, 4  ;;  %v2744_v53 = vshll.u32 %v5875_v26, 16  ;;  %v5957_v60 = vrot.slane %v5909_v30, 9  ;;  %v5925_v28 = vld [vmem:[%s6837_s23 + $0x4c] sm:$0xf] }
  0xb9   : > { %v2731_v57 = vor.u32 %v2730_v44, %v2727_v40  ;;  %v2740_v59 = vrot.slane %v2738_v46, 4  ;;  %v3204_v61 = vrot.slane %v5910_v32, 5  ;;  %6569 = vmatmul.mubr.msk.bf16.gmra.mxu0 %vm285_vm1, %v5890_v49  ;;  %v3207_v0 = vrot.slane %v5911_v37, 5  ;;  %v5926_v32 = vld [vmem:[%s6837_s23 + $0x50] sm:$0x1] }
  0xba   : > { %v2723_v62 = vsel %vm6910_vm7, %v2718_v51, %v2722_v39  ;;  %v2746_v63 = vrot.slane %v2744_v53, 5  ;;  %v5958_v1 = vrot.slane %v5912_v24, 9  ;;  %v3211_v8 = vrot.slane %v5913_v47, 5  ;;  %v5927_v37 = vld [vmem:[%s6837_s23 + $0x54] sm:$0xe] }
  0xbb   : > { %v5891_v4 = vcombine.low %v2713_v50, %v2723_v62  ;;  %6539 = vmatmul.mubr.msk.bf16.gmra.mxu1 %vm285_vm1, %v6764_v43  ;;  %v2732_v5 = vrot.slane %v2731_v57, 4  ;;  %v2741_v6 = vor.u32 %v2740_v59, %v2736_v45  ;;  %v3205_v7 = vsel %vm6896_vm6, %v5957_v60, %v3204_v61  ;;  %v5928_v18 = vld [vmem:[%s6837_s23 + $0x58] sm:$0xf]  ;;  %v5929_v41 = vld [vmem:[%s6837_s23 + $0x5c] sm:$0x1]  ;;  %v6766_v59 = vld [vmem:[%s6837_s23 + $0x24] sm:$0xff]  }
  0xbc   : > { %v3206_v56 = vrot.slane %v3204_v61, 4  ;;  %v3214_v9 = vrot.slane %v5914_v48, 5  ;;  %v4626_v10 = vsel %vm334_vm0, %v7267_v31, 0  ;;  %v7369_v17 = vsel %vm334_vm0, %v7286_v52, 0  ;;  %v5924_v31 = vld [vmem:[%s6837_s23 + $0x48] sm:$0xe] }
  0xbd   : > { %6572 = vmatprep.mubr.msk.bf16.mxu0 %vm285_vm1, %v5891_v4  ;;  %v2737_v14 = vsel %vm6910_vm7, %v2732_v5, %v2736_v45  ;;  %v2742_v15 = vrot.slane %v2741_v6, 4  ;;  %v5959_v20 = vrot.slane %v5915_v54, 9  ;;  %v3212_v21 = vsel %vm6896_vm6, %v5958_v1, %v3211_v8  ;;  %v5930_v43 = vld [vmem:[%s6837_s23 + $0x60] sm:$0xe]  ;;  %v5931_v53 = vld [vmem:[%s6837_s23 + $0x64] sm:$0xf] }
  0xbe   : > { %v3208_v25 = vsel %vm6896_vm6, %v3206_v56, %v3207_v0  ;;  %v3213_v26 = vrot.slane %v3211_v8, 4  ;;  %v3218_v27 = vrot.slane %v5916_v58, 5  ;;  %v3221_v29 = vrot.slane %v5917_v2, 5  ;;  %v5932_v54 = vld [vmem:[%s6837_s23 + $0x68] sm:$0x1] }
  0xbf   : > { %v2747_v19 = vsel %vm6910_vm7, %v2742_v15, %v2746_v63  ;;  %v5974_v52 = vcombine.low %v3205_v7, %v3208_v25  ;;  %v5960_v30 = vrot.slane %v5918_v3, 9  ;;  %v3225_v39 = vrot.slane %v5919_v11, 5  ;;  %v5933_v57 = vld [vmem:[%s6837_s23 + $0x6c] sm:$0xe]  ;;  %v5934_v63 = vld [vmem:[%s6837_s23 + $0x70] sm:$0xf] }
  0xc0   : > { %v5892_v33 = vcombine.low %v2737_v14, %v2747_v19  ;;  %v3215_v34 = vsel %vm6896_vm6, %v3213_v26, %v3214_v9  ;;  %v3219_v35 = vsel %vm6896_vm6, %v5959_v20, %v3218_v27  ;;  %v3220_v36 = vrot.slane %v3218_v27, 4  ;;  %v5935_v0 = vld [vmem:[%s6837_s23 + $0x74] sm:$0x1]  ;;  %v5936_v1 = vld [vmem:[%s6837_s23 + $0x78] sm:$0xe] }
  0xc1   : > { %6578 = vmatprep.mubr.msk.bf16.mxu1 %vm285_vm1, %v5974_v52  ;;  %v5975_v38 = vcombine.low %v3212_v21, %v3215_v34  ;;  %v3228_v40 = vrot.slane %v5920_v12, 5  ;;  %v5961_v24 = vrot.slane %v5921_v13, 9  ;;  %v3232_v45 = vrot.slane %v5922_v22, 5  ;;  %v5937_v6 = vld [vmem:[%s6837_s23 + $0x7c] sm:$0xf]  ;;  %v6767_v12 = vld [vmem:[%s6837_s23 + $0x30] sm:$0xff]  }
  0xc2   : > { %6573 = vmatmul.mubr.msk.bf16.gmra.mxu0 %vm285_vm1, %v5892_v33  ;;  %v3222_v44 = vsel %vm6896_vm6, %v3220_v36, %v3221_v29  ;;  %v3235_v46 = vrot.slane %v5923_v23, 5  ;;  %v5962_v47 = vrot.slane %v5924_v31, 9  ;;  %v7398_v49 = vsel %vm6896_vm6, %v5960_v30, %v3225_v39  ;;  %v5939_v11 = vld [vmem:[%s6837_s23 + $0x84] sm:$0xe]  ;;  %v5940_v20 = vld [vmem:[%s6837_s23 + $0x88] sm:$0xf] }
  0xc3   : > { %6612 = vmatprep.mubr.msk.bf16.mxu0 %vm285_vm1, %v6765_v16  ;;  %6579 = vmatmul.mubr.msk.bf16.vlgmr.msra.gmra.mxu1 %vm285_vm1, %v5975_v38  ;;  %v5976_v48 = vcombine.low %v3219_v35, %v3222_v44  ;;  %v3227_v50 = vrot.slane %v3225_v39, 4  ;;  %v3239_v51 = vrot.slane %v5925_v28, 5  ;;  %v3233_v60 = vsel %vm6896_vm6, %v5961_v24, %v3232_v45  ;;  %v5941_v21 = vld [vmem:[%s6837_s23 + $0x8c] sm:$0x1]  ;;  %v5942_v52 = vld [vmem:[%s6837_s23 + $0x90] sm:$0xe] }
  0xc4   : > { %6645 = vmatpush3.bf16.msra.mxu1 %v4626_v10  ;;  %v3234_v61 = vrot.slane %v3232_v45, 4  ;;  %v3242_v58 = vrot.slane %v5926_v32, 5  ;;  %v5963_v62 = vrot.slane %v5927_v37, 9  ;;  %v3246_v5 = vrot.slane %v5928_v18, 5  ;;  %v5938_v10 = vld [vmem:[%s6837_s23 + $0x80] sm:$0x1] }
  0xc5   : > { %6582 = vmatprep.mubr.msk.bf16.mxu1 %vm285_vm1, %v5976_v48  ;;  %v3229_v2 = vsel %vm6896_vm6, %v3227_v50, %v3228_v40  ;;  %v7414_v3 = vsel %vm6896_vm6, %v5962_v47, %v3239_v51  ;;  %v3241_v4 = vrot.slane %v3239_v51, 4  ;;  %v3249_v8 = vrot.slane %v5929_v41, 5  ;;  %v5943_v35 = vld [vmem:[%s6837_s23 + $0x94] sm:$0xf]  ;;  %v7451_v36 = vld [vmem:[%s6837_s23 + $0x98] sm:$0x1] }
  0xc6   : > { %v5977_v7 = vcombine.low %v7398_v49, %v3229_v2  ;;  %v3236_v56 = vsel %vm6896_vm6, %v3234_v61, %v3235_v46  ;;  %v5964_v9 = vrot.slane %v5930_v43, 9  ;;  %v7429_v15 = vsel %vm6896_vm6, %v5963_v62, %v3246_v5  ;;  %v5945_v37 = vld [vmem:[%s6837_s23 + $0x9c] sm:$0xe]  ;;  %v5946_v41 = vld [vmem:[%s6837_s23 + $0xa0] sm:$0xf] }
  0xc7   : > { %v5978_v13 = vcombine.low %v3233_v60, %v3236_v56  ;;  %v7425_v14 = vsel %vm6896_vm6, %v3241_v4, %v3242_v58  ;;  %v3248_v16 = vrot.slane %v3246_v5, 4  ;;  %v3253_v23 = vrot.slane %v5931_v53, 5  ;;  %v5947_v43 = vld [vmem:[%s6837_s23 + $0xa4] sm:$0x1]  ;;  %v5948_v44 = vld [vmem:[%s6837_s23 + $0xa8] sm:$0xe] }
  0xc8   : > { %v5979_v22 = vcombine.low %v7414_v3, %v7425_v14  ;;  %v3256_v31 = vrot.slane %v5932_v54, 5  ;;  %v5965_v25 = vrot.slane %v5933_v57, 9  ;;  %v3260_v27 = vrot.slane %v5934_v63, 5  ;;  %v5949_v49 = vld [vmem:[%s6837_s23 + $0xac] sm:$0xf]  ;;  %v6768_v61 = vld [vmem:[%s6837_s23 + $0x3c] sm:$0xff]  }
  0xc9   : > { %v7437_v26 = vsel %vm6896_vm6, %v3248_v16, %v3249_v8  ;;  %v3263_v28 = vrot.slane %v5935_v0, 5  ;;  %v5966_v19 = vrot.slane %v5936_v1, 9  ;;  %v7445_v30 = vsel %vm6896_vm6, %v5964_v9, %v3253_v23  ;;  %v5951_v60 = vld [vmem:[%s6837_s23 + $0xb4] sm:$0xe]  ;;  %v5952_v2 = vld [vmem:[%s6837_s23 + $0xb8] sm:$0xf] }
  0xca   : > { %6613 = vmatmul.mubr.msk.bf16.vlgmr.msra.gmra.mxu0 %vm285_vm1, %v6766_v59  ;;  %v5980_v29 = vcombine.low %v7429_v15, %v7437_v26  ;;  %v3255_v32 = vrot.slane %v3253_v23, 4  ;;  %v3267_v34 = vrot.slane %v5937_v6, 5  ;;  %v7458_v18 = vsel %vm6896_vm6, %v5965_v25, %v3260_v27  ;;  %v5950_v59 = vld [vmem:[%s6837_s23 + $0xb0] sm:$0x1]  ;;  %v6769_v4 = vld [vmem:[%s6837_s23 + $0x48] sm:$0xff]   ;;  %v6770_v26 = vld [vmem:[%s6837_s23 + $0x54] sm:$0xff]  }
  0xcb   : > { %6679 = vmatpush3.bf16.msra.mxu0 %v7369_v17  ;;  %6616 = vmatprep.mubr.msk.bf16.mxu0 %vm285_vm1, %v6767_v12  ;;  %v3262_v38 = vrot.slane %v3260_v27, 4  ;;  %v3270_v40 = vrot.slane %v5938_v10, 5  ;;  %v5967_v24 = vrot.slane %v5939_v11, 9  ;;  %v3274_v48 = vrot.slane %v5940_v20, 5  ;;  %v5953_v9 = vld [vmem:[%s6837_s23 + $0xbc] sm:$0x1] }
  0xcc   : > { %6583 = vmatmul.mubr.msk.bf16.gmra.mxu1 %vm285_vm1, %v5977_v7  ;;  %v7468_v17 = vsel %vm6896_vm6, %v3255_v32, %v3256_v31  ;;  %v7472_v45 = vsel %vm6896_vm6, %v5966_v19, %v3267_v34  ;;  %v3269_v46 = vrot.slane %v3267_v34, 4  ;;  %v3277_v54 = vrot.slane %v5941_v21, 5  ;;  %v5954_v20 = vld [vmem:[%s6837_s23 + $0xc0] sm:$0xe]  ;;  %v6152_v15 = vld [vmem:[%s6837_s23 + $0x18] sm:$0xe] }
  0xcd   : > { %6586 = vmatprep.mubr.msk.bf16.mxu1 %vm285_vm1, %v5978_v13  ;;  %v5981_v50 = vcombine.low %v7445_v30, %v7468_v17  ;;  %v7482_v51 = vsel %vm6896_vm6, %v3262_v38, %v3263_v28  ;;  %v5968_v57 = vrot.slane %v5942_v52, 9  ;;  %v7499_v0 = vsel %vm6896_vm6, %v5967_v24, %v3274_v48  ;;  %v5955_v28 = vld [vmem:[%s6837_s23 + $0xc4] sm:$0xf]  ;;  %v6076_v14 = vld [vmem:[%s6837_s23 + $0x2c] sm:$0x1] }
  0xce   : > { %v5982_v58 = vcombine.low %v7458_v18, %v7482_v51  ;;  %v7493_v62 = vsel %vm6896_vm6, %v3269_v46, %v3270_v40  ;;  %v3276_v1 = vrot.slane %v3274_v48, 4  ;;  %v3281_v7 = vrot.slane %v5943_v35, 5  ;;  %v6077_v51 = vld [vmem:[%s6837_s23 + $0x30] sm:$0xf] }
  0xcf   : > { %v3284_v56 = vrot.slane %v7451_v36, 5  ;;  %v5969_v8 = vrot.slane %v5945_v37, 9  ;;  %v3288_v12 = vrot.slane %v5946_v41, 5  ;;  %v3291_v13 = vrot.slane %v5947_v43, 5  ;;  %v5956_v41 = vld [vmem:[%s6837_s23 + $0xc8] sm:$0x1] }
  0xd0   : > { %v7513_v11 = vsel %vm6896_vm6, %v3276_v1, %v3277_v54  ;;  %v5970_v16 = vrot.slane %v5948_v44, 9  ;;  %v7522_v25 = vsel %vm6896_vm6, %v5968_v57, %v3281_v7  ;;  %v3283_v21 = vrot.slane %v3281_v7, 4  ;;  %v6071_v43 = vld [vmem:[%s6837_s23 + $0x18] sm:$0xf]  ;;  %v6072_v57 = vld [vmem:[%s6837_s23 + $0x1c] sm:$0xf] }
  0xd1   : > { %v3295_v27 = vrot.slane %v5949_v49, 5  ;;  %v7530_v52 = vsel %vm6896_vm6, %v5969_v8, %v3288_v12  ;;  %v3290_v32 = vrot.slane %v3288_v12, 4  ;;  %v3298_v34 = vrot.slane %v5950_v59, 5  ;;  %v6771_v8 = vld [vmem:[%s6837_s23 + $0x60] sm:$0xff]  }
  0xd2   : > { %6617 = vmatmul.mubr.msk.bf16.gmra.mxu0 %vm285_vm1, %v6768_v61  ;;  %v5971_v35 = vrot.slane %v5951_v60, 9  ;;  %v7537_v37 = vsel %vm6896_vm6, %v3283_v21, %v3284_v56  ;;  %v3302_v24 = vrot.slane %v5952_v2, 5  ;;  %v3305_v49 = vrot.slane %v5953_v9, 5  ;;  %v6073_v61 = vld [vmem:[%s6837_s23 + $0x20] sm:$0x1] }
  0xd3   : > { %v7447_v33 = vpop.f32.mrf.mxu0  ;;  %6620 = vmatprep.mubr.msk.bf16.mxu0 %vm285_vm1, %v6769_v4  ;;  %v7541_v38 = vsel %vm6896_vm6, %v5970_v16, %v3295_v27  ;;  %v3297_v40 = vrot.slane %v3295_v27, 4  ;;  %v7555_v48 = vsel %vm6896_vm6, %v3290_v32, %v3291_v13  ;;  %v5972_v54 = vrot.slane %v5954_v20, 9  ;;  %v6153_v56 = vld [vmem:[%s6837_s23 + $0x1c] sm:$0xf]  ;;  %v6154_v21 = vld [vmem:[%s6837_s23 + $0x20] sm:$0x1] }
  0xd4   : > { %v7460_v39 = vpop.f32.mrf.mxu1  ;;  %6587 = vmatmul.mubr.msk.bf16.gmra.mxu1 %vm285_vm1, %v5979_v22  ;;  %v7572_v59 = vsel %vm6896_vm6, %v5971_v35, %v3302_v24  ;;  %v3304_v60 = vrot.slane %v3302_v24, 4  ;;  %v3309_v2 = vrot.slane %v5955_v28, 5  ;;  %v3312_v4 = vrot.slane %v5956_v41, 5 }
  0xd5   : > { %v7474_v47 = vpop.f32.mrf.mxu0  ;;  %6590 = vmatprep.mubr.msk.bf16.mxu1 %vm285_vm1, %v5980_v29  ;;  %v7568_v22 = vsel %vm6896_vm6, %v3297_v40, %v3298_v34  ;;  %v4144_v7 = vshrl.u32 %v6071_v43, 16  ;;  %v4147_v13 = vshll.u32 %v6071_v43, 16  ;;  %v4153_v16 = vshll.u32 %v6072_v57, 16 }
  0xd6   : > { %v7484_v53 = vpop.f32.mrf.mxu1  ;;  %v7587_v12 = vsel %vm6896_vm6, %v3304_v60, %v3305_v49  ;;  %v4157_v20 = vshrl.u32 %v6072_v57, 16  ;;  %v7596_v32 = vsel %vm6896_vm6, %v5972_v54, %v3309_v2  ;;  %v3311_v34 = vrot.slane %v3309_v2, 4  ;;  %v6074_v57 = vld [vmem:[%s6837_s23 + $0x24] sm:$0xf] }
  0xd7   : > { %v7495_v63 = vpop.f32.mrf.mxu0  ;;  %v4146_v35 = vrot.slane %v4144_v7, 4  ;;  %v4149_v24 = vrot.slane %v4147_v13, 5  ;;  %v4155_v41 = vrot.slane %v4153_v16, 5  ;;  %v4163_v49 = vshll.u32 %v6073_v61, 16  ;;  %v6075_v7 = vld [vmem:[%s6837_s23 + $0x28] sm:$0xf] }
  0xd8   : > { %v7505_v6 = vpop.f32.mrf.mxu1  ;;  %v4159_v43 = vrot.slane %v4157_v20, 4  ;;  %v7606_v28 = vsel %vm6896_vm6, %v3311_v34, %v3312_v4  ;;  %v6200_v54 = vrot.slane %v6152_v15, 9  ;;  %v4983_v29 = vrot.slane %v6153_v56, 5  ;;  %v6155_v34 = vld [vmem:[%s6837_s23 + $0x24] sm:$0xe] }
  0xd9   : > { %v7509_v10 = vpop.f32.mrf.mxu0  ;;  %v4986_v2 = vrot.slane %v6154_v21, 5  ;;  %v4165_v20 = vrot.slane %v4163_v49, 5  ;;  %v4171_v21 = vshll.u32 %v6074_v57, 16  ;;  %v6157_v49 = vld [vmem:[%s6837_s23 + $0x2c] sm:$0x1]  ;;  %v4187_v18 = vshll.u32 %v6076_v14, 16 }
  0xda   : > { %v7516_v23 = vpop.f32.mrf.mxu1  ;;  %6621 = vmatmul.mubr.msk.bf16.gmra.mxu0 %vm285_vm1, %v6770_v26  ;;  %v4150_v26 = vor.u32 %v4149_v24, %v4146_v35  ;;  %v4160_v16 = vor.u32 %v4159_v43, %v4155_v41  ;;  %v7623_v4 = vsel %vm6896_vm6, %v6200_v54, %v4983_v29  ;;  %v4985_v56 = vrot.slane %v4983_v29, 4  ;;  %v6156_v35 = vld [vmem:[%s6837_s23 + $0x28] sm:$0xf]  ;;  %v6772_v29 = vld [vmem:[%s6837_s23 + $0x6c] sm:$0xff]  }
  0xdb   : > { %8533 = vst [vmem:[#allocation3_spill] sm:$0xff] %v7516_v23  ;;  %v7526_v19 = vpop.f32.mrf.mxu0  ;;  %6624 = vmatprep.mubr.msk.bf16.mxu0 %vm285_vm1, %v6771_v8  ;;  %v4168_v8 = vshrl.u32 %v6074_v57, 16  ;;  %v4177_v24 = vshll.u32 %v6075_v7, 16  ;;  %v4181_v43 = vshrl.u32 %v6075_v7, 16  ;;  %v4173_v44 = vrot.slane %v4171_v21, 5 }
  0xdc   : > { %v7533_v36 = vpop.f32.mrf.mxu1  ;;  %6591 = vmatmul.mubr.msk.bf16.gmra.mxu1 %vm285_vm1, %v5981_v50  ;;  %v4151_v17 = vrot.slane %v4150_v26, 4  ;;  %v4161_v50 = vrot.slane %v4160_v16, 4  ;;  %v7639_v57 = vsel %vm6896_vm6, %v4985_v56, %v4986_v2  ;;  %v6078_v2 = vld [vmem:[%s6837_s23 + $0x34] sm:$0xf] }
  0xdd   : > { %8534 = vst [vmem:[#allocation4_spill] sm:$0xff] %v7533_v36  ;;  %v7551_v46 = vpop.f32.mrf.mxu0  ;;  %6594 = vmatprep.mubr.msk.bf16.mxu1 %vm285_vm1, %v5982_v58  ;;  %v4170_v61 = vrot.slane %v4168_v8, 4  ;;  %v6773_v58 = vld [vmem:[%s6837_s23 + $0x78] sm:$0xff]   ;;  %v4179_v5 = vrot.slane %v4177_v24, 5  ;;  %v4183_v21 = vrot.slane %v4181_v43, 4 }
  0xde   : > { %v7562_v3 = vpop.f32.mrf.mxu1  ;;  %v4156_v26 = vsel %vm6910_vm7, %v4151_v17, %v4155_v41  ;;  %v4166_v7 = vsel %vm6910_vm7, %v4161_v50, %v4165_v20  ;;  %v4990_v41 = vrot.slane %v6156_v35, 5  ;;  %v4993_v17 = vrot.slane %v6157_v49, 5  ;;  %v6079_v20 = vld [vmem:[%s6837_s23 + $0x38] sm:$0x1] }
  0xdf   : > { %8535 = vst [vmem:[#allocation5_spill] sm:$0xff] %v7562_v3  ;;  %v7577_v1 = vpop.f32.mrf.mxu0  ;;  %v7654_v8 = vcombine.low %v4156_v26, %v4166_v7  ;;  %v4174_v14 = vor.u32 %v4173_v44, %v4170_v61  ;;  %v4192_v50 = vshrl.u32 %v6077_v51, 16  ;;  %v4195_v26 = vshll.u32 %v6077_v51, 16  ;;  %v6158_v44 = vld [vmem:[%s6837_s23 + $0x30] sm:$0xe] }
  0xe0   : > { %v7583_v9 = vpop.f32.mrf.mxu1  ;;  %v4201_v7 = vshll.u32 %v6078_v2, 16  ;;  %v4992_v35 = vrot.slane %v4990_v41, 4  ;;  %v4205_v49 = vshrl.u32 %v6078_v2, 16  ;;  %v8544_v2 = vcombine.low %v7499_v0, %v7513_v11 }
  0xe1   : > { %8536 = vst [vmem:[#allocation6_spill] sm:$0xff] %v7583_v9  ;;  %v7590_v27 = vpop.f32.mrf.mxu0  ;;  %v4175_v16 = vrot.slane %v4174_v14, 4  ;;  %v4194_v43 = vrot.slane %v4192_v50, 4 }
  0xe2   : > { %v7598_v40 = vpop.f32.mrf.mxu1  ;;  %6625 = vmatmul.mubr.msk.bf16.gmra.mxu0 %vm285_vm1, %v6772_v29  ;;  %v6159_v29 = vld [vmem:[%s6837_s23 + $0x34] sm:$0xf] }
  0xe3   : > { %8537 = vst [vmem:[#allocation7_spill] sm:$0xff] %v7598_v40  ;;  %v7602_v60 = vpop.f32.mrf.mxu0  ;;  %v4184_v40 = vor.u32 %v4183_v21, %v4179_v5  ;;  %6628 = vmatprep.mubr.msk.bf16.mxu0 %vm285_vm1, %v6773_v58  ;;  %v4180_v58 = vsel %vm6910_vm7, %v4175_v16, %v4179_v5  ;;  %v4197_v21 = vrot.slane %v4195_v26, 5  ;;  %v6202_v5 = vrot.slane %v6158_v44, 9  ;;  %v6774_v16 = vld [vmem:[%s6837_s23 + $0x84] sm:$0xff]  }
  0xe4   : > { %v7610_v13 = vpop.f32.mrf.mxu1 }
  0xe5   : > { %8538 = vst [vmem:[#allocation8_spill] sm:$0xff] %v7610_v13  ;;  %v7619_v15 = vpop.f32.mrf.mxu0  ;;  %v6201_v13 = vrot.slane %v6155_v34, 9  ;;  %v4185_v14 = vrot.slane %v4184_v40, 4  ;;  %v6080_v40 = vld [vmem:[%s6837_s23 + $0x3c] sm:$0xf]  ;;  %v4198_v11 = vor.u32 %v4197_v21, %v4194_v43 }
  0xe6   : > { %v7631_v30 = vpop.f32.mrf.mxu1 }
  0xe7   : > { %8539 = vst [vmem:[#allocation9_spill] sm:$0xff] %v7631_v30  ;;  %v7635_v54 = vpop.f32.mrf.mxu0  ;;  %v4189_v30 = vrot.slane %v4187_v18, 5  ;;  %v7668_v34 = vsel %vm6896_vm6, %v6201_v13, %v4990_v41  ;;  %v8543_v18 = vcombine.low %v7472_v45, %v7493_v62  ;;  %v4203_v13 = vrot.slane %v4201_v7, 5  ;;  %v6160_v41 = vld [vmem:[%s6837_s23 + $0x38] sm:$0x1] }
  0xe8   : > { %v7643_v31 = vpop.f32.mrf.mxu1  ;;  %v7688_v45 = vsel %vm6896_vm6, %v4992_v35, %v4993_v17  ;;  %v4207_v62 = vrot.slane %v4205_v49, 4  ;;  %v5000_v49 = vrot.slane %v6160_v41, 5  ;;  %v4199_v3 = vrot.slane %v4198_v11, 4  ;;  %v6161_v41 = vld [vmem:[%s6837_s23 + $0x3c] sm:$0xe] }
  0xe9   : > { %8540 = vst [vmem:[#allocation10_spill] sm:$0xff] %v7643_v31  ;;  %v7652_v56 = vpop.f32.mrf.mxu0  ;;  %6595 = vmatmul.mubr.msk.bf16.gmra.mxu1 %vm285_vm1, %v8543_v18  ;;  %v4211_v18 = vshll.u32 %v6079_v20, 16  ;;  %v4190_v7 = vsel %vm6910_vm7, %v4185_v14, %v4189_v30 }
  0xea   : > { %v7656_v31 = vpop.f32.mrf.mxu1  ;;  %6598 = vmatprep.mubr.msk.bf16.mxu1 %vm285_vm1, %v8544_v2  ;;  %v4997_v2 = vrot.slane %v6159_v29, 5  ;;  %v7702_v20 = vcombine.low %v4180_v58, %v4190_v7  ;;  %v4208_v44 = vor.u32 %v4207_v62, %v4203_v13  ;;  %v4216_v29 = vshrl.u32 %v6080_v40, 16  ;;  %6629 = vmatmul.mubr.msk.bf16.gmra.mxu0 %vm285_vm1, %v6774_v16 }
  0xeb   : > { %8541 = vst [vmem:[#allocation11_spill] sm:$0xff] %v7656_v31  ;;  %v7660_v24 = vpop.f32.mrf.mxu0  ;;  %v4213_v35 = vrot.slane %v4211_v18, 5  ;;  %v6082_v31 = vld [vmem:[%s6837_s23 + $0x44] sm:$0x1]  ;;  %v4219_v58 = vshll.u32 %v6080_v40, 16  ;;  %v4204_v11 = vsel %vm6910_vm7, %v4199_v3, %v4203_v13  ;;  %v6203_v16 = vrot.slane %v6161_v41, 9 }
  0xec   : > { %v7664_v61 = vpop.f32.mrf.mxu1  ;;  %v7709_v30 = vsel %vm6896_vm6, %v6202_v5, %v4997_v2  ;;  %v4999_v43 = vrot.slane %v4997_v2, 4  ;;  %v4209_v21 = vrot.slane %v4208_v44, 4  ;;  %v4218_v2 = vrot.slane %v4216_v29, 4  ;;  %v6083_v13 = vld [vmem:[%s6837_s23 + $0x48] sm:$0xf] }
  0xed   : > { %8542 = vst [vmem:[#allocation12_spill] sm:$0xff] %v7664_v61  ;;  %v7675_v51 = vpop.f32.mrf.mxu0  ;;  %v6775_v61 = vld [vmem:[%s6837_s23 + $0x90] sm:$0xff]   ;;  %v4235_v0 = vshll.u32 %v6082_v31, 16  ;;  %v4221_v44 = vrot.slane %v4219_v58, 5 }
  0xee   : > { %v7684_v50 = vpop.f32.mrf.mxu1  ;;  %v7719_v5 = vsel %vm6896_vm6, %v4999_v43, %v5000_v49  ;;  %6632 = vmatprep.mubr.msk.bf16.mxu0 %vm285_vm1, %v6775_v61  ;;  %v8548_v49 = vcombine.low %v7522_v25, %v7537_v37 }
  0xef   : > { %8545 = vst [vmem:[#allocation13_spill] sm:$0xff] %v7684_v50  ;;  %v7692_v26 = vpop.f32.mrf.mxu0  ;;  %v6081_v50 = vld [vmem:[%s6837_s23 + $0x40] sm:$0xf]  ;;  %v4237_v29 = vrot.slane %v4235_v0, 5  ;;  %v4240_v0 = vshrl.u32 %v6083_v13, 16 }
  0xf0   : > { %v7700_v17 = vpop.f32.mrf.mxu1  ;;  %v4225_v7 = vshll.u32 %v6081_v50, 16  ;;  %v4229_v62 = vshrl.u32 %v6081_v50, 16  ;;  %v4214_v50 = vsel %vm6910_vm7, %v4209_v21, %v4213_v35  ;;  %v8549_v21 = vcombine.low %v7530_v52, %v7555_v48 }
  0xf1   : > { %8546 = vst [vmem:[#allocation14_spill] sm:$0xff] %v7700_v17  ;;  %v7705_v9 = vpop.f32.mrf.mxu0  ;;  %v6162_v17 = vld [vmem:[%s6837_s23 + $0x40] sm:$0xf]  ;;  %6599 = vmatmul.mubr.msk.bf16.gmra.mxu1 %vm285_vm1, %v8548_v49  ;;  %v7734_v43 = vcombine.low %v4204_v11, %v4214_v50  ;;  %v6084_v50 = vld [vmem:[%s6837_s23 + $0x4c] sm:$0xf] }
  0xf2   : > { %v7711_v14 = vpop.f32.mrf.mxu1  ;;  %v4227_v3 = vrot.slane %v4225_v7, 5  ;;  %v4231_v35 = vrot.slane %v4229_v62, 4  ;;  %6602 = vmatprep.mubr.msk.bf16.mxu1 %vm285_vm1, %v8549_v21  ;;  %v4222_v7 = vor.u32 %v4221_v44, %v4218_v2  ;;  %v5004_v25 = vrot.slane %v6162_v17, 5  ;;  %v6776_v49 = vld [vmem:[%s6837_s23 + $0x9c] sm:$0xff]   ;;  %v6777_v62 = vld [vmem:[%s6837_s23 + $0xa8] sm:$0xff]  }
  0xf3   : > { %8547 = vst [vmem:[#allocation15_spill] sm:$0xff] %v7711_v14  ;;  %v6478_v18 = vpop.f32.mrf.mxu0  ;;  %v6163_v14 = vld [vmem:[%s6837_s23 + $0x44] sm:$0x1]  ;;  %v4242_v44 = vrot.slane %v4240_v0, 4  ;;  %6633 = vmatmul.mubr.msk.bf16.gmra.mxu0 %vm285_vm1, %v6776_v49 }
  0xf4   : > { %v6444_v40 = vpop.f32.mrf.mxu1  ;;  %v5007_v37 = vrot.slane %v6163_v14, 5  ;;  %v4223_v52 = vrot.slane %v4222_v7, 4  ;;  %v7748_v48 = vsel %vm6896_vm6, %v6203_v16, %v5004_v25  ;;  %v5006_v17 = vrot.slane %v5004_v25, 4  ;;  %v6085_v16 = vld [vmem:[%s6837_s23 + $0x50] sm:$0x1]  ;;  %6636 = vmatprep.mubr.msk.bf16.mxu0 %vm285_vm1, %v6777_v62 }
  0xf5   : > { %v1262_v31 = vadd.f32 %v6444_v40, %v7447_v33  ;;  %v1670_v61 = vpop.f32.mrf.mxu0  ;;  %v4232_v40 = vor.u32 %v4231_v35, %v4227_v3  ;;  %v4243_v14 = vshll.u32 %v6083_v13, 16  ;;  %v4249_v13 = vshll.u32 %v6084_v50, 16  ;;  %v6165_v25 = vld [vmem:[%s6837_s23 + $0x4c] sm:$0xf] }
  0xf6   : > { %v1101_v58 = vpop.f32.mrf.mxu1  ;;  %v4228_v35 = vsel %vm6910_vm7, %v4223_v52, %v4227_v3  ;;  %v7757_v21 = vsel %vm6896_vm6, %v5006_v17, %v5007_v37  ;;  %v6166_v37 = vld [vmem:[%s6837_s23 + $0x50] sm:$0x1]  ;;  %v6086_v17 = vld [vmem:[%s6837_s23 + $0x54] sm:$0xf]  ;;  %v4259_v62 = vshll.u32 %v6085_v16, 16 }
  0xf7   : > { %v7741_v36 = vadd.f32 %v6478_v18, %v1262_v31  ;;  %v1260_v33 = vadd.f32 %v1101_v58, %v7474_v47  ;;  %v6479_v11 = vpop.f32.mrf.mxu0  ;;  %v4233_v2 = vrot.slane %v4232_v40, 4  ;;  %v4245_v58 = vrot.slane %v4243_v14, 5 }
  0xf8   : > { %v6445_v23 = vpop.f32.mrf.mxu1  ;;  %v6220_v3 = vcombine.low %v7748_v48, %v7757_v21  ;;  %v4251_v49 = vrot.slane %v4249_v13, 5  ;;  %v4261_v16 = vrot.slane %v4259_v62, 5  ;;  %v6087_v13 = vld [vmem:[%s6837_s23 + $0x58] sm:$0xf] }
  0xf9   : > { %v7750_v41 = vadd.f32 %v1670_v61, %v1260_v33  ;;  %v1263_v18 = vadd.f32 %v6445_v23, %v7495_v63  ;;  %v1673_v47 = vpop.f32.mrf.mxu0  ;;  %v6164_v61 = vld [vmem:[%s6837_s23 + $0x48] sm:$0xe]  ;;  %v4238_v7 = vsel %vm6910_vm7, %v4233_v2, %v4237_v29  ;;  %v4246_v52 = vor.u32 %v4245_v58, %v4242_v44  ;;  %v6778_v58 = vld [vmem:[%s6837_s23 + $0xb4] sm:$0xff]  }
  0xfa   : > { %v1104_v31 = vpop.f32.mrf.mxu1  ;;  %v7772_v0 = vcombine.low %v4228_v35, %v4238_v7  ;;  %v8551_v2 = vcombine.low %v7572_v59, %v7587_v12 }
  0xfb   : > { %v7762_v63 = vadd.f32 %v6479_v11, %v1263_v18  ;;  %v1261_v23 = vadd.f32 %v1104_v31, %v7509_v10  ;;  %v6482_v40 = vpop.f32.mrf.mxu0  ;;  %v4253_v11 = vshrl.u32 %v6084_v50, 16  ;;  %v8550_v10 = vcombine.low %v7541_v38, %v7568_v22  ;;  %6637 = vmatmul.mubr.msk.bf16.gmra.mxu0 %vm285_vm1, %v6778_v58 }
  0xfc   : > { %v6448_v33 = vpop.f32.mrf.mxu1  ;;  %v6204_v18 = vrot.slane %v6164_v61, 9  ;;  %v4247_v31 = vrot.slane %v4246_v52, 4  ;;  %v5011_v38 = vrot.slane %v6165_v25, 5  ;;  %v5014_v22 = vrot.slane %v6166_v37, 5  ;;  %v6088_v52 = vld [vmem:[%s6837_s23 + $0x5c] sm:$0x1] }
  0xfd   : > { %6603 = vmatmul.mubr.msk.bf16.gmra.mxu1 %vm285_vm1, %v8550_v10  ;;  %v7779_v29 = vadd.f32 %v1673_v47, %v1261_v23  ;;  %v1266_v14 = vadd.f32 %v6448_v33, %v7526_v19  ;;  %v1686_v44 = vpop.f32.mrf.mxu0  ;;  %v4255_v35 = vrot.slane %v4253_v11, 4  ;;  %v4264_v61 = vshrl.u32 %v6086_v17, 16  ;;  %v6779_v23 = vld [vmem:[%s6837_s23 + $0xc0] sm:$0xff]  }
  0xfe   : > { %6606 = vmatprep.mubr.msk.bf16.mxu1 %vm285_vm1, %v8551_v2  ;;  %v1117_v50 = vpop.f32.mrf.mxu1  ;;  %v4252_v7 = vsel %vm6910_vm7, %v4247_v31, %v4251_v49  ;;  %v7796_v25 = vsel %vm6896_vm6, %v6204_v18, %v5011_v38  ;;  %v5013_v37 = vrot.slane %v5011_v38, 4  ;;  %v4267_v10 = vshll.u32 %v6086_v17, 16  ;;  %v6168_v31 = vld [vmem:[%s6837_s23 + $0x58] sm:$0xf]  ;;  %v6169_v38 = vld [vmem:[%s6837_s23 + $0x5c] sm:$0x1]  ;;  %6640 = vmatprep.mubr.msk.bf16.mxu0 %vm285_vm1, %v6779_v23 }
  0xff   : > { %v7787_v47 = vadd.f32 %v6482_v40, %v1266_v14  ;;  %v1264_v19 = vadd.f32 %v1117_v50, %v7551_v46  ;;  %v6483_v12 = vpop.f32.mrf.mxu0  ;;  %v4256_v33 = vor.u32 %v4255_v35, %v4251_v49  ;;  %v4266_v11 = vrot.slane %v4264_v61, 4  ;;  %v6167_v14 = vld [vmem:[%s6837_s23 + $0x54] sm:$0xe] }
 0x100   : > { %v6449_v59 = vpop.f32.mrf.mxu1  ;;  %v7805_v49 = vsel %vm6896_vm6, %v5013_v37, %v5014_v22  ;;  %v4273_v50 = vshll.u32 %v6087_v13, 16  ;;  %v4277_v18 = vshrl.u32 %v6087_v13, 16  ;;  %v4269_v35 = vrot.slane %v4267_v10, 5 }
 0x101   : > { %v7798_v40 = vadd.f32 %v1686_v44, %v1264_v19  ;;  %v1267_v46 = vadd.f32 %v6449_v59, %v7577_v1  ;;  %v4257_v2 = vrot.slane %v4256_v33, 4  ;;  %v6221_v17 = vcombine.low %v7796_v25, %v7805_v49  ;;  %v6089_v19 = vld [vmem:[%s6837_s23 + $0x60] sm:$0xf]  ;;  %v1689_v22 = vpop.f32.mrf.mxu0 }
 0x102   : > { %v1120_v62 = vpop.f32.mrf.mxu1  ;;  %v4275_v61 = vrot.slane %v4273_v50, 5  ;;  %v4279_v59 = vrot.slane %v4277_v18, 4  ;;  %v4283_v58 = vshll.u32 %v6088_v52, 16  ;;  %v6205_v23 = vrot.slane %v6167_v14, 9 }
 0x103   : > { %v7809_v44 = vadd.f32 %v6483_v12, %v1267_v46  ;;  %v1265_v1 = vadd.f32 %v1120_v62, %v7590_v27  ;;  %v4262_v13 = vsel %vm6910_vm7, %v4257_v2, %v4261_v16  ;;  %v6090_v12 = vld [vmem:[%s6837_s23 + $0x64] sm:$0xf]  ;;  %v8552_v27 = vcombine.low %v7596_v32, %v7606_v28  ;;  %v6780_v2 = vld [vmem:[%s6837_s23 + $0xcc] sm:$0xff]  }
 0x104   : > { %v7826_v37 = vcombine.low %v4252_v7, %v4262_v13  ;;  %v4270_v46 = vor.u32 %v4269_v35, %v4266_v11  ;;  %v4280_v10 = vor.u32 %v4279_v59, %v4275_v61  ;;  %v4285_v16 = vrot.slane %v4283_v58, 5  ;;  %v6170_v59 = vld [vmem:[%s6837_s23 + $0x60] sm:$0xe]  ;;  %6641 = vmatmul.mubr.msk.bf16.gmra.mxu0 %vm285_vm1, %v6780_v2 }
 0x105   : > { %6607 = vmatmul.mubr.msk.bf16.gmra.mxu1 %vm285_vm1, %v8552_v27  ;;  %v7824_v33 = vadd.f32 %v1689_v22, %v1265_v1  ;;  %v5018_v62 = vrot.slane %v6168_v31, 5  ;;  %v5021_v52 = vrot.slane %v6169_v38, 5  ;;  %v4288_v28 = vshrl.u32 %v6089_v19, 16  ;;  %v6452_v1 = vpop.f32.mrf.mxu1  ;;  %v6486_v22 = vpop.f32.mrf.mxu0  ;;  %v6091_v38 = vld [vmem:[%s6837_s23 + $0x68] sm:$0x1] }
 0x106   : > { %6646 = vmatprep.mubr.msk.bf16.mxu1 %vm285_vm1, %v7654_v8  ;;  %v4271_v50 = vrot.slane %v4270_v46, 4  ;;  %v4291_v32 = vshll.u32 %v6089_v19, 16  ;;  %v4297_v18 = vshll.u32 %v6090_v12, 16  ;;  %v4281_v7 = vrot.slane %v4280_v10, 4 }
 0x107   : > { %v7833_v11 = vsel %vm6896_vm6, %v6205_v23, %v5018_v62  ;;  %v5020_v8 = vrot.slane %v5018_v62, 4  ;;  %v4301_v14 = vshrl.u32 %v6090_v12, 16  ;;  %v1270_v31 = vadd.f32 %v6452_v1, %v7602_v60  ;;  %v1133_v46 = vpop.f32.mrf.mxu1  ;;  %v1702_v23 = vpop.f32.mrf.mxu0  ;;  %v6171_v60 = vld [vmem:[%s6837_s23 + $0x64] sm:$0xf]  ;;  %v6172_v62 = vld [vmem:[%s6837_s23 + $0x68] sm:$0x1] }
 0x108   : > { %v4276_v35 = vsel %vm6910_vm7, %v4271_v50, %v4275_v61  ;;  %v4290_v13 = vrot.slane %v4288_v28, 4  ;;  %v4293_v19 = vrot.slane %v4291_v32, 5  ;;  %v4286_v58 = vsel %vm6910_vm7, %v4281_v7, %v4285_v16  ;;  %v6092_v32 = vld [vmem:[%s6837_s23 + $0x6c] sm:$0xf] }
 0x109   : > { %v7844_v27 = vsel %vm6896_vm6, %v5020_v8, %v5021_v52  ;;  %v4299_v12 = vrot.slane %v4297_v18, 5  ;;  %v4303_v10 = vrot.slane %v4301_v14, 4  ;;  %v7849_v61 = vadd.f32 %v6486_v22, %v1270_v31  ;;  %v6453_v18 = vpop.f32.mrf.mxu1  ;;  %v6487_v1 = vpop.f32.mrf.mxu0 }
 0x10a   : > { %v7851_v50 = vcombine.low %v4276_v35, %v4286_v58  ;;  %v6222_v28 = vcombine.low %v7833_v11, %v7844_v27  ;;  %v1268_v16 = vadd.f32 %v1133_v46, %v7619_v15  ;;  %v8553_v52 = vcombine.low %v7623_v4, %v7639_v57 }
 0x10b   : > { %v4294_v7 = vor.u32 %v4293_v19, %v4290_v13  ;;  %v4304_v2 = vor.u32 %v4303_v10, %v4299_v12  ;;  %v4307_v22 = vshll.u32 %v6091_v38, 16  ;;  %v6206_v8 = vrot.slane %v6170_v59, 9  ;;  %v1136_v57 = vpop.f32.mrf.mxu1  ;;  %v6093_v19 = vld [vmem:[%s6837_s23 + $0x70] sm:$0xf]  ;;  %v1705_v10 = vpop.f32.mrf.mxu0 }
 0x10c   : > { %6680 = vmatprep.mubr.msk.bf16.mxu0 %vm285_vm1, %v8553_v52  ;;  %v7863_v14 = vadd.f32 %v1702_v23, %v1268_v16  ;;  %v1271_v15 = vadd.f32 %v6453_v18, %v7635_v54  ;;  %v5025_v31 = vrot.slane %v6171_v60, 5  ;;  %v5028_v4 = vrot.slane %v6172_v62, 5  ;;  %v6094_v23 = vld [vmem:[%s6837_s23 + $0x74] sm:$0x1]  ;;  %v6174_v18 = vld [vmem:[%s6837_s23 + $0x70] sm:$0xf] }
 0x10d   : > { %6647 = vmatmul.mubr.msk.bf16.vlgmr.msra.gmra.mxu1 %vm285_vm1, %v7702_v20  ;;  %v4295_v35 = vrot.slane %v4294_v7, 4  ;;  %v4305_v13 = vrot.slane %v4304_v2, 4  ;;  %v4309_v38 = vrot.slane %v4307_v22, 5  ;;  %v4312_v59 = vshrl.u32 %v6092_v32, 16 }
 0x10e   : > { %6650 = vmatprep.mubr.msk.bf16.mxu1 %vm285_vm1, %v7734_v43  ;;  %v7869_v20 = vadd.f32 %v6487_v1, %v1271_v15  ;;  %v1269_v58 = vadd.f32 %v1136_v57, %v7652_v56  ;;  %v7874_v54 = vsel %vm6896_vm6, %v6206_v8, %v5025_v31  ;;  %v5027_v46 = vrot.slane %v5025_v31, 4  ;;  %v6173_v43 = vld [vmem:[%s6837_s23 + $0x6c] sm:$0xe]  ;;  %v6175_v56 = vld [vmem:[%s6837_s23 + $0x74] sm:$0x1] }
 0x10f   : > { %v4300_v60 = vsel %vm6910_vm7, %v4295_v35, %v4299_v12  ;;  %v4310_v62 = vsel %vm6910_vm7, %v4305_v13, %v4309_v38  ;;  %v4314_v16 = vrot.slane %v4312_v59, 4  ;;  %v4315_v52 = vshll.u32 %v6092_v32, 16  ;;  %v6095_v8 = vld [vmem:[%s6837_s23 + $0x78] sm:$0xf] }
 0x110   : > { %v7884_v1 = vadd.f32 %v1705_v10, %v1269_v58  ;;  %v7886_v7 = vcombine.low %v4300_v60, %v4310_v62  ;;  %v7890_v2 = vsel %vm6896_vm6, %v5027_v46, %v5028_v4  ;;  %v4321_v22 = vshll.u32 %v6093_v19, 16  ;;  %v6096_v58 = vld [vmem:[%s6837_s23 + $0x7c] sm:$0xf]  ;;  %v6456_v46 = vpop.f32.mrf.mxu1  ;;  %v6490_v10 = vpop.f32.mrf.mxu0 }
 0x111   : > { %v6223_v12 = vcombine.low %v7874_v54, %v7890_v2  ;;  %v4317_v15 = vrot.slane %v4315_v52, 5  ;;  %v4325_v31 = vshrl.u32 %v6093_v19, 16  ;;  %v4331_v57 = vshll.u32 %v6094_v23, 16 }
 0x112   : > { %v8554_v32 = vcombine.low %v7668_v34, %v7688_v45  ;;  %v4323_v35 = vrot.slane %v4321_v22, 5  ;;  %v6207_v13 = vrot.slane %v6173_v43, 9  ;;  %v5032_v38 = vrot.slane %v6174_v18, 5  ;;  %v1149_v52 = vpop.f32.mrf.mxu1  ;;  %v1718_v18 = vpop.f32.mrf.mxu0 }
 0x113   : > { %v5035_v59 = vrot.slane %v6175_v56, 5  ;;  %v8555_v4 = vcombine.low %v7709_v30, %v7719_v5  ;;  %v4318_v19 = vor.u32 %v4317_v15, %v4314_v16  ;;  %v4327_v23 = vrot.slane %v4325_v31, 4  ;;  %v6097_v56 = vld [vmem:[%s6837_s23 + $0x80] sm:$0x1] }
 0x114   : > { %6681 = vmatmul.mubr.msk.bf16.vlgmr.msra.gmra.mxu0 %vm285_vm1, %v8554_v32  ;;  %v4333_v60 = vrot.slane %v4331_v57, 5  ;;  %v4336_v62 = vshrl.u32 %v6095_v8, 16  ;;  %v1274_v34 = vadd.f32 %v6456_v46, %v7660_v24  ;;  %v7909_v45 = vsel %vm6896_vm6, %v6207_v13, %v5032_v38  ;;  %v6176_v57 = vld [vmem:[%s6837_s23 + $0x78] sm:$0xe]  ;;  %v6177_v32 = vld [vmem:[%s6837_s23 + $0x7c] sm:$0xf]  ;;  %v6491_v46 = vpop.f32.mrf.mxu0 }
 0x115   : > { %6684 = vmatprep.mubr.msk.bf16.mxu0 %vm285_vm1, %v8555_v4  ;;  %6651 = vmatmul.mubr.msk.bf16.gmra.mxu1 %vm285_vm1, %v7772_v0  ;;  %v5034_v30 = vrot.slane %v5032_v38, 4  ;;  %v4339_v5 = vshll.u32 %v6095_v8, 16  ;;  %v4319_v43 = vrot.slane %v4318_v19, 4  ;;  %v4328_v16 = vor.u32 %v4327_v23, %v4323_v35  ;;  %v6457_v4 = vpop.f32.mrf.mxu1 }
 0x116   : > { %6654 = vmatprep.mubr.msk.bf16.mxu1 %vm285_vm1, %v7826_v37  ;;  %v4338_v22 = vrot.slane %v4336_v62, 4  ;;  %v4345_v0 = vshll.u32 %v6096_v58, 16  ;;  %v7914_v15 = vadd.f32 %v6490_v10, %v1274_v34  ;;  %v1272_v31 = vadd.f32 %v1149_v52, %v7675_v51  ;;  %v6178_v62 = vld [vmem:[%s6837_s23 + $0x80] sm:$0x1] }
 0x117   : > { %v7918_v24 = vsel %vm6896_vm6, %v5034_v30, %v5035_v59  ;;  %v4341_v8 = vrot.slane %v4339_v5, 5  ;;  %v4324_v37 = vsel %vm6910_vm7, %v4319_v43, %v4323_v35  ;;  %v4329_v13 = vrot.slane %v4328_v16, 4  ;;  %v1152_v34 = vpop.f32.mrf.mxu1  ;;  %v6098_v16 = vld [vmem:[%s6837_s23 + $0x84] sm:$0xf] }
 0x118   : > { %v6224_v38 = vcombine.low %v7909_v45, %v7918_v24  ;;  %v4347_v10 = vrot.slane %v4345_v0, 5  ;;  %v7927_v19 = vadd.f32 %v1718_v18, %v1272_v31  ;;  %v1275_v59 = vadd.f32 %v6457_v4, %v7692_v26  ;;  %v6179_v31 = vld [vmem:[%s6837_s23 + $0x84] sm:$0xe]  ;;  %v6181_v4 = vld [vmem:[%s6837_s23 + $0x8c] sm:$0x1] }
 0x119   : > { %v4342_v51 = vor.u32 %v4341_v8, %v4338_v22  ;;  %v4349_v23 = vshrl.u32 %v6096_v58, 16  ;;  %v4334_v35 = vsel %vm6910_vm7, %v4329_v13, %v4333_v60  ;;  %v4355_v30 = vshll.u32 %v6097_v56, 16  ;;  %v6099_v22 = vld [vmem:[%s6837_s23 + $0x88] sm:$0xf]  ;;  %v6100_v60 = vld [vmem:[%s6837_s23 + $0x8c] sm:$0x1]  ;;  %v1721_v56 = vpop.f32.mrf.mxu0 }
 0x11a   : > { %v6208_v5 = vrot.slane %v6176_v57, 9  ;;  %v5039_v43 = vrot.slane %v6177_v32, 5  ;;  %v6127_v52 = vcombine.low %v4324_v37, %v4334_v35  ;;  %v7938_v26 = vadd.f32 %v6491_v46, %v1275_v59  ;;  %v6180_v8 = vld [vmem:[%s6837_s23 + $0x88] sm:$0xf] }
 0x11b   : > { %v1273_v58 = vadd.f32 %v1152_v34, %v7705_v9  ;;  %v4343_v18 = vrot.slane %v4342_v51, 4  ;;  %v4351_v0 = vrot.slane %v4349_v23, 4  ;;  %v4357_v48 = vrot.slane %v4355_v30, 5  ;;  %v6101_v23 = vld [vmem:[%s6837_s23 + $0x90] sm:$0xf]  ;;  %v6460_v34 = vpop.f32.mrf.mxu1 }
 0x11c   : > { %6685 = vmatmul.mubr.msk.bf16.gmra.mxu0 %vm285_vm1, %v6220_v3  ;;  %v7949_v21 = vsel %vm6896_vm6, %v6208_v5, %v5039_v43  ;;  %v5041_v3 = vrot.slane %v5039_v43, 4  ;;  %v5042_v49 = vrot.slane %v6178_v62, 5  ;;  %v4363_v32 = vshll.u32 %v6098_v16, 16 }
 0x11d   : > { %6688 = vmatprep.mubr.msk.bf16.mxu0 %vm285_vm1, %v6221_v17  ;;  %6655 = vmatmul.mubr.msk.bf16.gmra.mxu1 %vm285_vm1, %v7851_v50  ;;  %v7954_v9 = vadd.f32 %v1721_v56, %v1273_v58  ;;  %v4348_v25 = vsel %vm6910_vm7, %v4343_v18, %v4347_v10  ;;  %v4360_v17 = vshrl.u32 %v6098_v16, 16  ;;  %v4352_v57 = vor.u32 %v4351_v0, %v4347_v10  ;;  %v1165_v56 = vpop.f32.mrf.mxu1 }
 0x11e   : > { %6658 = vmatprep.mubr.msk.bf16.mxu1 %vm285_vm1, %v7886_v7  ;;  %v4369_v37 = vshll.u32 %v6099_v22, 16  ;;  %v4373_v13 = vshrl.u32 %v6099_v22, 16  ;;  %v7964_v50 = vsel %vm6896_vm6, %v5041_v3, %v5042_v49  ;;  %v4379_v59 = vshll.u32 %v6100_v60, 16  ;;  %v6494_v7 = vpop.f32.mrf.mxu0  ;;  %v6102_v3 = vld [vmem:[%s6837_s23 + $0x94] sm:$0xf] }
 0x11f   : > { %v4362_v46 = vrot.slane %v4360_v17, 4  ;;  %v6209_v51 = vrot.slane %v6179_v31, 9  ;;  %v4353_v62 = vrot.slane %v4352_v57, 4  ;;  %v6225_v35 = vcombine.low %v7949_v21, %v7964_v50  ;;  %v6461_v27 = vpop.f32.mrf.mxu1  ;;  %v6186_v21 = vld [vmem:[%s6837_s23 + $0xa0] sm:$0xf] }
 0x120   : > { %v4365_v10 = vrot.slane %v4363_v32, 5  ;;  %v4371_v30 = vrot.slane %v4369_v37, 5  ;;  %v1278_v5 = vadd.f32 %v6460_v34, %v7460_v39  ;;  %v4375_v43 = vrot.slane %v4373_v13, 4  ;;  %v1734_v0 = vpop.f32.mrf.mxu0  ;;  %v6103_v13 = vld [vmem:[%s6837_s23 + $0x98] sm:$0x1]  ;;  %v8556_v34 = vld [vmem:[#allocation3_spill] sm:$0xff] }
 0x121   : > { %v4381_v16 = vrot.slane %v4379_v59, 5  ;;  %v5046_v58 = vrot.slane %v6180_v8, 5  ;;  %v4358_v18 = vsel %vm6910_vm7, %v4353_v62, %v4357_v48  ;;  %v5049_v60 = vrot.slane %v6181_v4, 5  ;;  %v6182_v59 = vld [vmem:[%s6837_s23 + $0x90] sm:$0xe] }
 0x122   : > { %v4366_v22 = vor.u32 %v4365_v10, %v4362_v46  ;;  %v4384_v31 = vshrl.u32 %v6101_v23, 16  ;;  %v6128_v49 = vcombine.low %v4348_v25, %v4358_v18  ;;  %v7977_v39 = vadd.f32 %v6494_v7, %v1278_v5  ;;  %v6184_v10 = vld [vmem:[%s6837_s23 + $0x98] sm:$0x1]  ;;  %v6187_v50 = vld [vmem:[%s6837_s23 + $0xa4] sm:$0x1] }
 0x123   : > { %v4376_v17 = vor.u32 %v4375_v43, %v4371_v30  ;;  %v7981_v8 = vsel %vm6896_vm6, %v6209_v51, %v5046_v58  ;;  %v5048_v57 = vrot.slane %v5046_v58, 4  ;;  %v1276_v11 = vadd.f32 %v1165_v56, %v7484_v53 }
 0x124   : > { %6689 = vmatmul.mubr.msk.bf16.gmra.mxu0 %vm285_vm1, %v6222_v28  ;;  %v4367_v48 = vrot.slane %v4366_v22, 4  ;;  %v6495_v28 = vpop.f32.mrf.mxu0  ;;  %v4386_v25 = vrot.slane %v4384_v31, 4  ;;  %v1279_v37 = vadd.f32 %v6461_v27, %v7505_v6  ;;  %v4387_v54 = vshll.u32 %v6101_v23, 16  ;;  %v6183_v6 = vld [vmem:[%s6837_s23 + $0x94] sm:$0xf] }
 0x125   : > { %6692 = vmatprep.mubr.msk.bf16.mxu0 %vm285_vm1, %v6223_v12  ;;  %6659 = vmatmul.mubr.msk.bf16.gmra.mxu1 %vm285_vm1, %v6127_v52  ;;  %v4377_v32 = vrot.slane %v4376_v17, 4  ;;  %v4393_v2 = vshll.u32 %v6102_v3, 16  ;;  %v7996_v12 = vsel %vm6896_vm6, %v5048_v57, %v5049_v60  ;;  %v7998_v4 = vadd.f32 %v1734_v0, %v1276_v11  ;;  %v1168_v52 = vpop.f32.mrf.mxu1 }
 0x126   : > { %6662 = vmatprep.mubr.msk.bf16.mxu1 %vm285_vm1, %v6128_v49  ;;  %v4372_v53 = vsel %vm6910_vm7, %v4367_v48, %v4371_v30  ;;  %v4397_v46 = vshrl.u32 %v6102_v3, 16  ;;  %v6226_v23 = vcombine.low %v7981_v8, %v7996_v12  ;;  %v8006_v62 = vadd.f32 %v6495_v28, %v1279_v37  ;;  %v6104_v30 = vld [vmem:[%s6837_s23 + $0x9c] sm:$0xf]  ;;  %v1737_v43 = vpop.f32.mrf.mxu0  ;;  %v6105_v3 = vld [vmem:[%s6837_s23 + $0xa0] sm:$0xf] }
 0x127   : > { %v4382_v51 = vsel %vm6910_vm7, %v4377_v32, %v4381_v16  ;;  %v1277_v7 = vadd.f32 %v1168_v52, %v8556_v34  ;;  %v4389_v58 = vrot.slane %v4387_v54, 5  ;;  %v4395_v18 = vrot.slane %v4393_v2, 5  ;;  %v6106_v28 = vld [vmem:[%s6837_s23 + $0xa4] sm:$0x1]  ;;  %v6185_v54 = vld [vmem:[%s6837_s23 + $0x9c] sm:$0xe] }
 0x128   : > { %v6129_v5 = vcombine.low %v4372_v53, %v4382_v51  ;;  %v4399_v22 = vrot.slane %v4397_v46, 4  ;;  %v4403_v56 = vshll.u32 %v6103_v13, 16  ;;  %v6210_v0 = vrot.slane %v6182_v59, 9  ;;  %v6464_v13 = vpop.f32.mrf.mxu1  ;;  %v6498_v45 = vpop.f32.mrf.mxu0  ;;  %v8557_v53 = vld [vmem:[#allocation4_spill] sm:$0xff] }
 0x129   : > { %v8011_v60 = vadd.f32 %v1737_v43, %v1277_v7  ;;  %v5053_v16 = vrot.slane %v6183_v6, 5  ;;  %v4390_v31 = vor.u32 %v4389_v58, %v4386_v25  ;;  %v5056_v17 = vrot.slane %v6184_v10, 5 }
 0x12a   : > { %v4400_v49 = vor.u32 %v4399_v22, %v4395_v18  ;;  %v4408_v48 = vshrl.u32 %v6104_v30, 16  ;;  %v4405_v57 = vrot.slane %v4403_v56, 5  ;;  %v4411_v32 = vshll.u32 %v6104_v30, 16  ;;  %v1181_v7 = vpop.f32.mrf.mxu1  ;;  %v1750_v10 = vpop.f32.mrf.mxu0  ;;  %v6107_v22 = vld [vmem:[%s6837_s23 + $0xa8] sm:$0xf] }
 0x12b   : > { %v5054_v11 = vsel %vm6896_vm6, %v6210_v0, %v5053_v16  ;;  %v5055_v27 = vrot.slane %v5053_v16, 4  ;;  %v4391_v25 = vrot.slane %v4390_v31, 4  ;;  %v1282_v52 = vadd.f32 %v6464_v13, %v8557_v53  ;;  %v6108_v13 = vld [vmem:[%s6837_s23 + $0xac] sm:$0xf]  ;;  %v6109_v53 = vld [vmem:[%s6837_s23 + $0xb0] sm:$0x1] }
 0x12c   : > { %6693 = vmatmul.mubr.msk.bf16.gmra.mxu0 %vm285_vm1, %v6224_v38  ;;  %v4401_v37 = vrot.slane %v4400_v49, 4  ;;  %v4410_v24 = vrot.slane %v4408_v48, 4  ;;  %v4417_v38 = vshll.u32 %v6105_v3, 16  ;;  %v4413_v46 = vrot.slane %v4411_v32, 5  ;;  %v6465_v31 = vpop.f32.mrf.mxu1  ;;  %v8558_v48 = vld [vmem:[#allocation5_spill] sm:$0xff] }
 0x12d   : > { %6696 = vmatprep.mubr.msk.bf16.mxu0 %vm285_vm1, %v6225_v35  ;;  %6663 = vmatmul.mubr.msk.bf16.gmra.mxu1 %vm285_vm1, %v6129_v5  ;;  %v5057_v2 = vsel %vm6896_vm6, %v5055_v27, %v5056_v17  ;;  %v4421_v59 = vshrl.u32 %v6105_v3, 16  ;;  %v4396_v35 = vsel %vm6910_vm7, %v4391_v25, %v4395_v18  ;;  %v8036_v5 = vadd.f32 %v6498_v45, %v1282_v52  ;;  %v6499_v18 = vpop.f32.mrf.mxu0 }
 0x12e   : > { %v4406_v6 = vsel %vm6910_vm7, %v4401_v37, %v4405_v57  ;;  %v6227_v51 = vcombine.low %v5054_v11, %v5057_v2  ;;  %v4419_v34 = vrot.slane %v4417_v38, 5  ;;  %v4414_v43 = vor.u32 %v4413_v46, %v4410_v24  ;;  %v8559_v11 = vld [vmem:[#allocation6_spill] sm:$0xff]  ;;  %v8560_v46 = vld [vmem:[#allocation7_spill] sm:$0xff] }
 0x12f   : > { %v6130_v30 = vcombine.low %v4396_v35, %v4406_v6  ;;  %v4423_v58 = vrot.slane %v4421_v59, 4  ;;  %v4427_v56 = vshll.u32 %v6106_v28, 16  ;;  %v6211_v0 = vrot.slane %v6185_v54, 9  ;;  %v1184_v28 = vpop.f32.mrf.mxu1  ;;  %v1753_v12 = vpop.f32.mrf.mxu0 }
 0x130   : > { %v5060_v16 = vrot.slane %v6186_v21, 5  ;;  %v5063_v3 = vrot.slane %v6187_v50, 5  ;;  %v4415_v49 = vrot.slane %v4414_v43, 4  ;;  %v1280_v57 = vadd.f32 %v1181_v7, %v8558_v48  ;;  %v6188_v21 = vld [vmem:[%s6837_s23 + $0xa8] sm:$0xe] }
 0x131   : > { %6666 = vmatprep.mubr.msk.bf16.mxu1 %vm285_vm1, %v6130_v30  ;;  %v4424_v17 = vor.u32 %v4423_v58, %v4419_v34  ;;  %v1283_v27 = vadd.f32 %v6465_v31, %v8559_v11  ;;  %v4429_v32 = vrot.slane %v4427_v56, 5  ;;  %v4432_v45 = vshrl.u32 %v6107_v22, 16  ;;  %v6189_v50 = vld [vmem:[%s6837_s23 + $0xac] sm:$0xf]  ;;  %v6110_v30 = vld [vmem:[%s6837_s23 + $0xb4] sm:$0xf]  ;;  %v6468_v48 = vpop.f32.mrf.mxu1 }
 0x132   : > { %v5061_v25 = vsel %vm6896_vm6, %v6211_v0, %v5060_v16  ;;  %v5062_v37 = vrot.slane %v5060_v16, 4  ;;  %v4420_v24 = vsel %vm6910_vm7, %v4415_v49, %v4419_v34  ;;  %v8051_v54 = vadd.f32 %v1750_v10, %v1280_v57  ;;  %v6190_v10 = vld [vmem:[%s6837_s23 + $0xb0] sm:$0x1]  ;;  %v6111_v31 = vld [vmem:[%s6837_s23 + $0xb8] sm:$0xf]  ;;  %v6502_v57 = vpop.f32.mrf.mxu0 }
 0x133   : > { %v4425_v38 = vrot.slane %v4424_v17, 4  ;;  %v8053_v2 = vadd.f32 %v6499_v18, %v1283_v27  ;;  %v1281_v8 = vadd.f32 %v1184_v28, %v8560_v46  ;;  %v4435_v59 = vshll.u32 %v6107_v22, 16  ;;  %v1197_v46 = vpop.f32.mrf.mxu1 }
 0x134   : > { %6697 = vmatmul.mubr.msk.bf16.gmra.mxu0 %vm285_vm1, %v6226_v23  ;;  %v5064_v52 = vsel %vm6896_vm6, %v5062_v37, %v5063_v3  ;;  %v4434_v23 = vrot.slane %v4432_v45, 4  ;;  %v4441_v34 = vshll.u32 %v6108_v13, 16  ;;  %v4445_v7 = vshrl.u32 %v6108_v13, 16  ;;  %v8561_v37 = vld [vmem:[#allocation8_spill] sm:$0xff]  ;;  %v6112_v13 = vld [vmem:[%s6837_s23 + $0xbc] sm:$0x1] }
 0x135   : > { %6700 = vmatprep.mubr.msk.bf16.mxu0 %vm285_vm1, %v6227_v51  ;;  %v4430_v35 = vsel %vm6910_vm7, %v4425_v38, %v4429_v32  ;;  %v6228_v6 = vcombine.low %v5061_v25, %v5064_v52  ;;  %v8066_v43 = vadd.f32 %v1753_v12, %v1281_v8  ;;  %v4437_v58 = vrot.slane %v4435_v59, 5  ;;  %v6191_v52 = vld [vmem:[%s6837_s23 + $0xb4] sm:$0xe]  ;;  %v1766_v8 = vpop.f32.mrf.mxu0 }
 0x136   : > { %v6131_v51 = vcombine.low %v4420_v24, %v4430_v35  ;;  %v4451_v56 = vshll.u32 %v6109_v53, 16  ;;  %v4443_v0 = vrot.slane %v4441_v34, 5  ;;  %v4447_v16 = vrot.slane %v4445_v7, 4  ;;  %v6193_v35 = vld [vmem:[%s6837_s23 + $0xbc] sm:$0x1] }
 0x137   : > { %v6212_v22 = vrot.slane %v6188_v21, 9  ;;  %v5067_v3 = vrot.slane %v6189_v50, 5  ;;  %v4438_v18 = vor.u32 %v4437_v58, %v4434_v23  ;;  %v5070_v17 = vrot.slane %v6190_v10, 5  ;;  %v6192_v50 = vld [vmem:[%s6837_s23 + $0xb8] sm:$0xf]  ;;  %v6503_v58 = vpop.f32.mrf.mxu0 }
 0x138   : > { %6667 = vmatmul.mubr.msk.bf16.gmra.mxu1 %vm285_vm1, %v6131_v51  ;;  %v4453_v49 = vrot.slane %v4451_v56, 5  ;;  %v4456_v11 = vshrl.u32 %v6110_v30, 16  ;;  %v4448_v27 = vor.u32 %v4447_v16, %v4443_v0  ;;  %v1286_v28 = vadd.f32 %v6468_v48, %v8561_v37  ;;  %v6469_v51 = vpop.f32.mrf.mxu1  ;;  %v6113_v48 = vld [vmem:[%s6837_s23 + $0xc0] sm:$0xf] }
 0x139   : > { %v5068_v32 = vsel %vm6896_vm6, %v6212_v22, %v5067_v3  ;;  %v5069_v25 = vrot.slane %v5067_v3, 4  ;;  %v4439_v45 = vrot.slane %v4438_v18, 4  ;;  %v4459_v38 = vshll.u32 %v6110_v30, 16 }
 0x13a   : > { %v4458_v24 = vrot.slane %v4456_v11, 4  ;;  %v4465_v53 = vshll.u32 %v6111_v31, 16  ;;  %v4449_v12 = vrot.slane %v4448_v27, 4  ;;  %v8078_v59 = vadd.f32 %v6502_v57, %v1286_v28  ;;  %v8562_v27 = vld [vmem:[#allocation9_spill] sm:$0xff] }
 0x13b   : > { %v5071_v23 = vsel %vm6896_vm6, %v5069_v25, %v5070_v17  ;;  %v4469_v21 = vshrl.u32 %v6111_v31, 16  ;;  %v4444_v34 = vsel %vm6910_vm7, %v4439_v45, %v4443_v0  ;;  %v4461_v10 = vrot.slane %v4459_v38, 5  ;;  %v1200_v0 = vpop.f32.mrf.mxu1  ;;  %v8563_v25 = vld [vmem:[#allocation10_spill] sm:$0xff]  ;;  %v8564_v45 = vld [vmem:[#allocation11_spill] sm:$0xff]  ;;  %v1769_v38 = vpop.f32.mrf.mxu0 }
 0x13c   : > { %6701 = vmatmul.mubr.msk.bf16.gmra.mxu0 %vm285_vm1, %v6228_v6  ;;  %v6229_v7 = vcombine.low %v5068_v32, %v5071_v23  ;;  %v4467_v30 = vrot.slane %v4465_v53, 5  ;;  %v4454_v6 = vsel %vm6910_vm7, %v4449_v12, %v4453_v49  ;;  %v4475_v16 = vshll.u32 %v6112_v13, 16  ;;  %v6114_v53 = vld [vmem:[%s6837_s23 + $0xc4] sm:$0xf] }
 0x13d   : > { %v4471_v56 = vrot.slane %v4469_v21, 4  ;;  %v6213_v22 = vrot.slane %v6191_v52, 9  ;;  %v6132_v3 = vcombine.low %v4444_v34, %v4454_v6  ;;  %v4462_v31 = vor.u32 %v4461_v10, %v4458_v24  ;;  %v6196_v6 = vld [vmem:[%s6837_s23 + $0xc8] sm:$0x1] }
 0x13e   : > { %6704 = vmatprep.mubr.msk.bf16.mxu0 %vm285_vm1, %v6229_v7  ;;  %v5074_v18 = vrot.slane %v6192_v50, 5  ;;  %v5077_v17 = vrot.slane %v6193_v35, 5  ;;  %v4477_v11 = vrot.slane %v4475_v16, 5  ;;  %v1284_v32 = vadd.f32 %v1197_v46, %v8562_v27  ;;  %v6115_v46 = vld [vmem:[%s6837_s23 + $0xc8] sm:$0x1] }
 0x13f   : > { %v4472_v57 = vor.u32 %v4471_v56, %v4467_v30  ;;  %v1287_v49 = vadd.f32 %v6469_v51, %v8563_v25  ;;  %6670 = vmatprep.mubr.msk.bf16.mxu1 %vm285_vm1, %v6132_v3  ;;  %v4463_v37 = vrot.slane %v4462_v31, 4  ;;  %v1285_v24 = vadd.f32 %v1200_v0, %v8564_v45  ;;  %v6194_v50 = vld [vmem:[%s6837_s23 + $0xc0] sm:$0xe]  ;;  %v6195_v51 = vld [vmem:[%s6837_s23 + $0xc4] sm:$0xf]  ;;  %v6506_v0 = vpop.f32.mrf.mxu0 }
 0x140   : > { %v5075_v28 = vsel %vm6896_vm6, %v6213_v22, %v5074_v18  ;;  %v5076_v13 = vrot.slane %v5074_v18, 4  ;;  %v8095_v12 = vadd.f32 %v1766_v8, %v1284_v32  ;;  %v4480_v21 = vshrl.u32 %v6113_v48, 16  ;;  %v6472_v18 = vpop.f32.mrf.mxu1  ;;  %v6117_v25 = vld [vmem:[%s6837_s23 + $0xd0] sm:$0xf] }
 0x141   : > { %v4473_v52 = vrot.slane %v4472_v57, 4  ;;  %v8097_v23 = vadd.f32 %v6503_v58, %v1287_v49  ;;  %v4468_v35 = vsel %vm6910_vm7, %v4463_v37, %v4467_v30  ;;  %v8105_v7 = vadd.f32 %v1769_v38, %v1285_v24  ;;  %v6116_v57 = vld [vmem:[%s6837_s23 + $0xcc] sm:$0xf]  ;;  %v1782_v24 = vpop.f32.mrf.mxu0 }
 0x142   : > { %v5078_v34 = vsel %vm6896_vm6, %v5076_v13, %v5077_v17  ;;  %v4483_v10 = vshll.u32 %v6113_v48, 16  ;;  %v4482_v56 = vrot.slane %v4480_v21, 4  ;;  %v4489_v16 = vshll.u32 %v6114_v53, 16  ;;  %v1213_v45 = vpop.f32.mrf.mxu1 }
 0x143   : > { %v4478_v8 = vsel %vm6910_vm7, %v4473_v52, %v4477_v11  ;;  %v6230_v58 = vcombine.low %v5075_v28, %v5078_v34  ;;  %v4493_v31 = vshrl.u32 %v6114_v53, 16  ;;  %v4499_v30 = vshll.u32 %v6115_v46, 16  ;;  %v8565_v28 = vld [vmem:[#allocation12_spill] sm:$0xff]  ;;  %v6118_v52 = vld [vmem:[%s6837_s23 + $0xd4] sm:$0x1] }
 0x144   : > { %v6133_v22 = vcombine.low %v4468_v35, %v4478_v8  ;;  %v4485_v3 = vrot.slane %v4483_v10, 5  ;;  %v4491_v17 = vrot.slane %v4489_v16, 5  ;;  %v6214_v48 = vrot.slane %v6194_v50, 9  ;;  %v6473_v8 = vpop.f32.mrf.mxu1 }
 0x145   : > { %6705 = vmatmul.mubr.msk.bf16.gmra.mxu0 %vm285_vm1, %v6230_v58  ;;  %v5081_v27 = vrot.slane %v6195_v51, 5  ;;  %v5084_v32 = vrot.slane %v6196_v6, 5  ;;  %v4495_v49 = vrot.slane %v4493_v31, 4  ;;  %v4501_v37 = vrot.slane %v4499_v30, 5  ;;  %v6197_v51 = vld [vmem:[%s6837_s23 + $0xcc] sm:$0xe]  ;;  %v6507_v58 = vpop.f32.mrf.mxu0 }
 0x146   : > { %6671 = vmatmul.mubr.msk.bf16.gmra.mxu1 %vm285_vm1, %v6133_v22  ;;  %v4486_v11 = vor.u32 %v4485_v3, %v4482_v56  ;;  %v1290_v13 = vadd.f32 %v6472_v18, %v8565_v28  ;;  %v4504_v46 = vshrl.u32 %v6116_v57, 16  ;;  %v4507_v21 = vshll.u32 %v6116_v57, 16  ;;  %v6198_v6 = vld [vmem:[%s6837_s23 + $0xd0] sm:$0xf]  ;;  %v6199_v31 = vld [vmem:[%s6837_s23 + $0xd4] sm:$0x1] }
 0x147   : > { %v5082_v38 = vsel %vm6896_vm6, %v6214_v48, %v5081_v27  ;;  %v5083_v53 = vrot.slane %v5081_v27, 4  ;;  %v4496_v35 = vor.u32 %v4495_v49, %v4491_v17  ;;  %v4513_v10 = vshll.u32 %v6117_v25, 16 }
 0x148   : > { %v4487_v50 = vrot.slane %v4486_v11, 4  ;;  %v8119_v34 = vadd.f32 %v6506_v0, %v1290_v13  ;;  %v4506_v16 = vrot.slane %v4504_v46, 4  ;;  %v4509_v22 = vrot.slane %v4507_v21, 5  ;;  %v1216_v0 = vpop.f32.mrf.mxu1  ;;  %v1785_v13 = vpop.f32.mrf.mxu0 }
 0x149   : > { %v5085_v56 = vsel %vm6896_vm6, %v5083_v53, %v5084_v32  ;;  %v4517_v3 = vshrl.u32 %v6117_v25, 16  ;;  %v4497_v18 = vrot.slane %v4496_v35, 4  ;;  %v4515_v48 = vrot.slane %v4513_v10, 5  ;;  %v8567_v53 = vld [vmem:[#allocation13_spill] sm:$0xff] }
 0x14a   : > { %8566 = vst [vmem:[#allocation3_spill] sm:$0xff] %v8119_v34  ;;  %v4492_v30 = vsel %vm6910_vm7, %v4487_v50, %v4491_v17  ;;  %v6231_v57 = vcombine.low %v5082_v38, %v5085_v56  ;;  %v4510_v27 = vor.u32 %v4509_v22, %v4506_v16  ;;  %v4523_v49 = vshll.u32 %v6118_v52, 16  ;;  %v6512_v21 = vpop.f32.mrf.mxu1  ;;  %v8568_v56 = vld [vmem:[#allocation14_spill] sm:$0xff]  ;;  %v8569_v22 = vld [vmem:[#allocation15_spill] sm:$0xff] }
 0x14b   : > { %v4519_v11 = vrot.slane %v4517_v3, 4  ;;  %v6215_v28 = vrot.slane %v6197_v51, 9  ;;  %v4502_v34 = vsel %vm6910_vm7, %v4497_v18, %v4501_v37  ;;  %v5088_v32 = vrot.slane %v6198_v6, 5 }
 0x14c   : > { %6708 = vmatprep.mubr.msk.bf16.mxu0 %vm285_vm1, %v6231_v57  ;;  %v5091_v25 = vrot.slane %v6199_v31, 5  ;;  %v1288_v46 = vadd.f32 %v1213_v45, %v8567_v53  ;;  %v6134_v17 = vcombine.low %v4492_v30, %v4502_v34  ;;  %v4511_v50 = vrot.slane %v4510_v27, 4  ;;  %v2093_v37 = vpop.f32.mrf.mxu1  ;;  %v6546_v31 = vpop.f32.mrf.mxu0 }
 0x14d   : > { %v4520_v38 = vor.u32 %v4519_v11, %v4515_v48  ;;  %v4525_v35 = vrot.slane %v4523_v49, 5  ;;  %v5089_v10 = vsel %vm6896_vm6, %v6215_v28, %v5088_v32  ;;  %v5090_v52 = vrot.slane %v5088_v32, 4 }
 0x14e   : > { %v8134_v51 = vadd.f32 %v1782_v24, %v1288_v46  ;;  %v1291_v16 = vadd.f32 %v6473_v8, %v8568_v56  ;;  %6674 = vmatprep.mubr.msk.bf16.mxu1 %vm285_vm1, %v6134_v17  ;;  %v4516_v6 = vsel %vm6910_vm7, %v4511_v50, %v4515_v48  ;;  %v1289_v34 = vadd.f32 %v1216_v0, %v8569_v22  ;;  %v6513_v8 = vpop.f32.mrf.mxu1  ;;  %v2883_v0 = vpop.f32.mrf.mxu0 }
 0x14f   : > { %v4521_v45 = vrot.slane %v4520_v38, 4  ;;  %v2254_v3 = vadd.f32 %v6512_v21, %v7741_v36  ;;  %v5092_v30 = vsel %vm6896_vm6, %v5090_v52, %v5091_v25  ;;  %v2252_v24 = vadd.f32 %v2093_v37, %v7750_v41 }
 0x150   : > { %v8144_v18 = vadd.f32 %v6507_v58, %v1291_v16  ;;  %v6232_v27 = vcombine.low %v5089_v10, %v5092_v30  ;;  %v8149_v11 = vadd.f32 %v1785_v13, %v1289_v34  ;;  %v2255_v42 = vadd.f32 %v6513_v8, %v7762_v63  ;;  %v2096_v28 = vpop.f32.mrf.mxu1  ;;  %v6547_v58 = vpop.f32.mrf.mxu0 }
 0x151   : > { %v4526_v57 = vsel %vm6910_vm7, %v4521_v45, %v4525_v35  ;;  %v8151_v48 = vadd.f32 %v6546_v31, %v2254_v3  ;;  %v8153_v36 = vadd.f32 %v2883_v0, %v2252_v24  ;;  %v2253_v41 = vadd.f32 %v2096_v28, %v7779_v29 }
 0x152   : > { %v6135_v49 = vcombine.low %v4516_v6, %v4526_v57  ;;  %6709 = vmatmul.mubr.msk.bf16.gmra.mxu0 %vm285_vm1, %v6232_v27  ;;  %v8159_v55 = vadd.f32 %v6547_v58, %v2255_v42  ;;  %v6516_v13 = vpop.f32.mrf.mxu1  ;;  %v2886_v32 = vpop.f32.mrf.mxu0 }
 0x153   : > { %v2258_v25 = vadd.f32 %v6516_v13, %v7787_v47  ;;  %v8162_v53 = vadd.f32 %v2886_v32, %v2253_v41 }
 0x154   : > { %6675 = vmatmul.mubr.msk.bf16.gmra.mxu1 %vm285_vm1, %v6135_v49  ;;  %v2109_v46 = vpop.f32.mrf.mxu1  ;;  %v6550_v21 = vpop.f32.mrf.mxu0 }
 0x155   : > { %v2256_v63 = vadd.f32 %v2109_v46, %v7798_v40  ;;  %v8165_v17 = vadd.f32 %v6550_v21, %v2258_v25 }
 0x156   : > { %v6517_v50 = vpop.f32.mrf.mxu1  ;;  %v2899_v38 = vpop.f32.mrf.mxu0 }
 0x157   : > { %v2259_v29 = vadd.f32 %v6517_v50, %v7809_v44  ;;  %v8168_v35 = vadd.f32 %v2899_v38, %v2256_v63 }
 0x158   : > { %v2112_v10 = vpop.f32.mrf.mxu1  ;;  %v6551_v52 = vpop.f32.mrf.mxu0 }
 0x159   : > { %v2257_v56 = vadd.f32 %v2112_v10, %v7824_v33  ;;  %v8171_v16 = vadd.f32 %v6551_v52, %v2259_v29 }
 0x15a   : > { %v6520_v47 = vpop.f32.mrf.mxu1  ;;  %v2902_v37 = vpop.f32.mrf.mxu0 }
 0x15b   : > { %v2262_v6 = vadd.f32 %v6520_v47, %v7849_v61  ;;  %v8174_v45 = vadd.f32 %v2902_v37, %v2257_v56 }
 0x15c   : > { %v2125_v40 = vpop.f32.mrf.mxu1  ;;  %v6554_v3 = vpop.f32.mrf.mxu0 }
 0x15d   : > { %v2260_v22 = vadd.f32 %v2125_v40, %v7863_v14  ;;  %v8178_v31 = vadd.f32 %v6554_v3, %v2262_v6 }
 0x15e   : > { %v6521_v34 = vpop.f32.mrf.mxu1  ;;  %v2915_v24 = vpop.f32.mrf.mxu0 }
 0x15f   : > { %v2263_v44 = vadd.f32 %v6521_v34, %v7869_v20  ;;  %v8181_v8 = vadd.f32 %v2915_v24, %v2260_v22 }
 0x160   : > { %v2128_v30 = vpop.f32.mrf.mxu1  ;;  %v6555_v27 = vpop.f32.mrf.mxu0 }
 0x161   : > { %v2261_v33 = vadd.f32 %v2128_v30, %v7884_v1  ;;  %v8184_v0 = vadd.f32 %v6555_v27, %v2263_v44 }
 0x162   : > { %v6524_v57 = vpop.f32.mrf.mxu1  ;;  %v2918_v14 = vpop.f32.mrf.mxu0 }
 0x163   : > { %v2266_v61 = vadd.f32 %v6524_v57, %v7914_v15  ;;  %v8187_v28 = vadd.f32 %v2918_v14, %v2261_v33 }
 0x164   : > { %v2141_v49 = vpop.f32.mrf.mxu1  ;;  %v6558_v58 = vpop.f32.mrf.mxu0 }
 0x165   : > { %v2264_v42 = vadd.f32 %v2141_v49, %v7927_v19  ;;  %v8190_v13 = vadd.f32 %v6558_v58, %v2266_v61 }
 0x166   : > { %v6525_v20 = vpop.f32.mrf.mxu1  ;;  %v2931_v32 = vpop.f32.mrf.mxu0 }
 0x167   : > { %v2267_v41 = vadd.f32 %v6525_v20, %v7938_v26  ;;  %v8193_v46 = vadd.f32 %v2931_v32, %v2264_v42 }
 0x168   : > { %v2144_v1 = vpop.f32.mrf.mxu1  ;;  %v6559_v21 = vpop.f32.mrf.mxu0 }
 0x169   : > { %v2265_v25 = vadd.f32 %v2144_v1, %v7954_v9  ;;  %v8196_v50 = vadd.f32 %v6559_v21, %v2267_v41 }
 0x16a   : > { %v6528_v15 = vpop.f32.mrf.mxu1  ;;  %v2934_v38 = vpop.f32.mrf.mxu0 }
 0x16b   : > { %v2270_v63 = vadd.f32 %v6528_v15, %v7977_v39  ;;  %8570 = vst [vmem:[#allocation4_spill] sm:$0xff] %v8196_v50  ;;  %v8199_v10 = vadd.f32 %v2934_v38, %v2265_v25 }
 0x16c   : > { %v2157_v19 = vpop.f32.mrf.mxu1  ;;  %v6562_v52 = vpop.f32.mrf.mxu0 }
 0x16d   : > { %v2268_v29 = vadd.f32 %v2157_v19, %v7998_v4  ;;  %8571 = vst [vmem:[#allocation5_spill] sm:$0xff] %v8199_v10  ;;  %v8202_v47 = vadd.f32 %v6562_v52, %v2270_v63 }
 0x16e   : > { %v6529_v26 = vpop.f32.mrf.mxu1  ;;  %v2947_v37 = vpop.f32.mrf.mxu0 }
 0x16f   : > { %v2271_v56 = vadd.f32 %v6529_v26, %v8006_v62  ;;  %8572 = vst [vmem:[#allocation6_spill] sm:$0xff] %v8202_v47  ;;  %v8205_v40 = vadd.f32 %v2947_v37, %v2268_v29 }
 0x170   : > { %v2160_v9 = vpop.f32.mrf.mxu1  ;;  %v6563_v22 = vpop.f32.mrf.mxu0 }
 0x171   : > { %v2269_v6 = vadd.f32 %v2160_v9, %v8011_v60  ;;  %8573 = vst [vmem:[#allocation7_spill] sm:$0xff] %v8205_v40  ;;  %v8208_v3 = vadd.f32 %v6563_v22, %v2271_v56 }
 0x172   : > { %v6532_v39 = vpop.f32.mrf.mxu1  ;;  %v2950_v44 = vpop.f32.mrf.mxu0 }
 0x173   : > { %v2274_v34 = vadd.f32 %v6532_v39, %v8036_v5  ;;  %8574 = vst [vmem:[#allocation8_spill] sm:$0xff] %v8208_v3  ;;  %v8211_v24 = vadd.f32 %v2950_v44, %v2269_v6 }
 0x174   : > { %v2173_v4 = vpop.f32.mrf.mxu1  ;;  %v6566_v33 = vpop.f32.mrf.mxu0 }
 0x175   : > { %v2272_v30 = vadd.f32 %v2173_v4, %v8051_v54  ;;  %8575 = vst [vmem:[#allocation9_spill] sm:$0xff] %v8211_v24  ;;  %v8214_v27 = vadd.f32 %v6566_v33, %v2274_v34 }
 0x176   : > { %v6533_v62 = vpop.f32.mrf.mxu1  ;;  %v2963_v61 = vpop.f32.mrf.mxu0 }
 0x177   : > { %v2275_v57 = vadd.f32 %v6533_v62, %v8053_v2  ;;  %8576 = vst [vmem:[#allocation10_spill] sm:$0xff] %v8214_v27  ;;  %v8217_v14 = vadd.f32 %v2963_v61, %v2272_v30 }
 0x178   : > { %v2176_v60 = vpop.f32.mrf.mxu1  ;;  %v6567_v42 = vpop.f32.mrf.mxu0 }
 0x179   : > { %v2273_v49 = vadd.f32 %v2176_v60, %v8066_v43  ;;  %8577 = vst [vmem:[#allocation11_spill] sm:$0xff] %v8217_v14  ;;  %v8220_v58 = vadd.f32 %v6567_v42, %v2275_v57 }
 0x17a   : > { %v6536_v5 = vpop.f32.mrf.mxu1  ;;  %v2966_v41 = vpop.f32.mrf.mxu0 }
 0x17b   : > { %v2278_v20 = vadd.f32 %v6536_v5, %v8078_v59  ;;  %8578 = vst [vmem:[#allocation12_spill] sm:$0xff] %v8220_v58  ;;  %v8223_v32 = vadd.f32 %v2966_v41, %v2273_v49  ;;  %v8580_v59 = vld [vmem:[#allocation3_spill] sm:$0xff] }
 0x17c   : > { %v2189_v54 = vpop.f32.mrf.mxu1  ;;  %v6570_v21 = vpop.f32.mrf.mxu0 }
 0x17d   : > { %v2276_v1 = vadd.f32 %v2189_v54, %v8095_v12  ;;  %8579 = vst [vmem:[#allocation13_spill] sm:$0xff] %v8223_v32  ;;  %v8227_v63 = vadd.f32 %v6570_v21, %v2278_v20 }
 0x17e   : > { %v6537_v2 = vpop.f32.mrf.mxu1  ;;  %v2979_v38 = vpop.f32.mrf.mxu0 }
 0x17f   : > { %v2279_v25 = vadd.f32 %v6537_v2, %v8097_v23  ;;  %v8230_v26 = vadd.f32 %v2979_v38, %v2276_v1 }
 0x180   : > { %v2192_v15 = vpop.f32.mrf.mxu1  ;;  %v6571_v56 = vpop.f32.mrf.mxu0 }
 0x181   : > { %v2277_v43 = vadd.f32 %v2192_v15, %v8105_v7  ;;  %v8233_v9 = vadd.f32 %v6571_v56, %v2279_v25 }
 0x182   : > { %v6540_v19 = vpop.f32.mrf.mxu1  ;;  %v2982_v23 = vpop.f32.mrf.mxu0 }
 0x183   : > { %v2282_v29 = vadd.f32 %v6540_v19, %v8580_v59  ;;  %v8236_v39 = vadd.f32 %v2982_v23, %v2277_v43 }
 0x184   : > { %v2205_v52 = vpop.f32.mrf.mxu1  ;;  %v6574_v22 = vpop.f32.mrf.mxu0 }
 0x185   : > { %v2280_v12 = vadd.f32 %v2205_v52, %v8134_v51  ;;  %v8239_v4 = vadd.f32 %v6574_v22, %v2282_v29 }
 0x186   : > { %v6541_v37 = vpop.f32.mrf.mxu1  ;;  %v2995_v30 = vpop.f32.mrf.mxu0 }
 0x187   : > { %v2283_v6 = vadd.f32 %v6541_v37, %v8144_v18  ;;  %v8243_v62 = vadd.f32 %v2995_v30, %v2280_v12 }
 0x188   : > { %v2208_v7 = vpop.f32.mrf.mxu1  ;;  %v6575_v33 = vpop.f32.mrf.mxu0 }
 0x189   : > { %v2281_v34 = vadd.f32 %v2208_v7, %v8149_v11  ;;  %v8247_v57 = vadd.f32 %v6575_v33, %v2283_v6 }
 0x18a   : > { %v8241_v44 = vpop.f32.mrf.mxu1  ;;  %v2998_v18 = vpop.f32.mrf.mxu0 }
 0x18b   : > { %v8251_v61 = vadd.f32 %v2998_v18, %v2281_v34 }
 0x18c   : > { %v8245_v51 = vpop.f32.mrf.mxu1  ;;  %v8255_v11 = vpop.f32.mrf.mxu0 }
 0x18e   : > { %v8249_v60 = vpop.f32.mrf.mxu1  ;;  %v8257_v5 = vpop.f32.mrf.mxu0 }
 0x190   : > { %v8253_v49 = vpop.f32.mrf.mxu1  ;;  %v8261_v20 = vpop.f32.mrf.mxu0 }
 0x192   : > { %v8259_v42 = vpop.f32.mrf.mxu1  ;;  %v8265_v41 = vpop.f32.mrf.mxu0 }
 0x194   : > { %v8263_v54 = vpop.f32.mrf.mxu1  ;;  %v8269_v2 = vpop.f32.mrf.mxu0 }
 0x196   : > { %v8267_v1 = vpop.f32.mrf.mxu1  ;;  %v8273_v15 = vpop.f32.mrf.mxu0 }
 0x198   : > { %v8271_v25 = vpop.f32.mrf.mxu1  ;;  %v8277_v43 = vpop.f32.mrf.mxu0 }
 0x19a   : > { %v8275_v21 = vpop.f32.mrf.mxu1  ;;  %v8281_v38 = vpop.f32.mrf.mxu0 }
 0x19c   : > { %v8279_v19 = vpop.f32.mrf.mxu1  ;;  %v8285_v29 = vpop.f32.mrf.mxu0 }
 0x19e   : > { %v8283_v59 = vpop.f32.mrf.mxu1  ;;  %v8289_v56 = vpop.f32.mrf.mxu0 }
 0x1a0   : > { %v8287_v52 = vpop.f32.mrf.mxu1  ;;  %v8293_v37 = vpop.f32.mrf.mxu0 }
 0x1a2   : > { %v8291_v12 = vpop.f32.mrf.mxu1  ;;  %v8297_v6 = vpop.f32.mrf.mxu0 }
 0x1a4   : > { %v8295_v23 = vpop.f32.mrf.mxu1  ;;  %v8301_v22 = vpop.f32.mrf.mxu0 }
 0x1a6   : > { %v8299_v7 = vpop.f32.mrf.mxu1  ;;  %v8305_v30 = vpop.f32.mrf.mxu0 }
 0x1a7   : > { %8581 = vst [vmem:[#allocation14_spill] sm:$0xff] %v8299_v7  ;;  %8583 = vst [vmem:[#allocation3_spill] sm:$0xff] %v8305_v30 }
 0x1a8   : > { %v8303_v34 = vpop.f32.mrf.mxu1  ;;  %v8309_v18 = vpop.f32.mrf.mxu0 }
 0x1a9   : > { %8582 = vst [vmem:[#allocation15_spill] sm:$0xff] %v8303_v34  ;;  %8585 = vst [vmem:[#allocation17_spill] sm:$0xff] %v8309_v18 }
 0x1aa   : > { %v8307_v33 = vpop.f32.mrf.mxu1  ;;  %v8313_v58 = vpop.f32.mrf.mxu0 }
 0x1ab   : > { %8584 = vst [vmem:[#allocation16_spill] sm:$0xff] %v8307_v33  ;;  %8587 = vst [vmem:[#allocation19_spill] sm:$0xff] %v8313_v58 }
 0x1ac   : > { %v8311_v32 = vpop.f32.mrf.mxu1  ;;  %v8317_v27 = vpop.f32.mrf.mxu0 }
 0x1ad   : > { %8586 = vst [vmem:[#allocation18_spill] sm:$0xff] %v8311_v32  ;;  %8589 = vst [vmem:[#allocation21_spill] sm:$0xff] %v8317_v27 }
 0x1ae   : > { %v8315_v14 = vpop.f32.mrf.mxu1  ;;  %v8321_v3 = vpop.f32.mrf.mxu0 }
 0x1af   : > { %8588 = vst [vmem:[#allocation20_spill] sm:$0xff] %v8315_v14  ;;  %8591 = vst [vmem:[#allocation23_spill] sm:$0xff] %v8321_v3 }
 0x1b0   : > { %v8319_v24 = vpop.f32.mrf.mxu1  ;;  %v8325_v47 = vpop.f32.mrf.mxu0 }
 0x1b1   : > { %8590 = vst [vmem:[#allocation22_spill] sm:$0xff] %v8319_v24  ;;  %8593 = vst [vmem:[#allocation25_spill] sm:$0xff] %v8325_v47 }
 0x1b2   : > { %v8323_v40 = vpop.f32.mrf.mxu1  ;;  %v8329_v33 = vpop.f32.mrf.mxu0 }
 0x1b3   : > { %8592 = vst [vmem:[#allocation24_spill] sm:$0xff] %v8323_v40  ;;  %8595 = vst [vmem:[#allocation27_spill] sm:$0xff] %v8329_v33 }
 0x1b4   : > { %v8327_v34 = vpop.f32.mrf.mxu1  ;;  %v8333_v32 = vpop.f32.mrf.mxu0 }
 0x1b5   : > { %8594 = vst [vmem:[#allocation26_spill] sm:$0xff] %v8327_v34  ;;  %8597 = vst [vmem:[#allocation29_spill] sm:$0xff] %v8333_v32 }
 0x1b6   : > { %v8331_v18 = vpop.f32.mrf.mxu1  ;;  %v8337_v14 = vpop.f32.mrf.mxu0 }
 0x1b7   : > { %8596 = vst [vmem:[#allocation28_spill] sm:$0xff] %v8331_v18  ;;  %8599 = vst [vmem:[#allocation31_spill] sm:$0xff] %v8337_v14 }
 0x1b8   : > { %v8335_v58 = vpop.f32.mrf.mxu1  ;;  %v8340_v3 = vpop.f32.mrf.mxu0 }
 0x1b9   : > { %8598 = vst [vmem:[#allocation30_spill] sm:$0xff] %v8335_v58  ;;  %8600 = vst [vmem:[#allocation32_spill] sm:$0xff] %v8340_v3 }
 0x1ba   : > { %v8343_v10 = vpop.f32.mrf.mxu0 }
 0x1bb   : > { %8601 = vst [vmem:[#allocation33_spill] sm:$0xff] %v8343_v10 }
 0x1bc   : > { %v6638_v18 = vpop.f32.mrf.mxu0 }
 0x1bd   : > { %v6604_v27 = vpop.f32.mrf.mxu1 }
 0x1be   : > { %v3634_v24 = vadd.f32 %v6604_v27, %v8227_v63  ;;  %v3968_v14 = vpop.f32.mrf.mxu0 }
 0x1bf   : > { %v3545_v40 = vpop.f32.mrf.mxu1 }
 0x1c0   : > { %v3632_v47 = vadd.f32 %v3545_v40, %v8230_v26  ;;  %v8346_v32 = vadd.f32 %v6638_v18, %v3634_v24  ;;  %v6639_v63 = vpop.f32.mrf.mxu0  ;;  %v3610_v24 = vadd.f32 %v8241_v44, %v8151_v48  ;;  %v3611_v48 = vadd.f32 %v8249_v60, %v8159_v55 }
 0x1c1   : > { %v6605_v34 = vpop.f32.mrf.mxu1  ;;  %v3614_v55 = vadd.f32 %v8259_v42, %v8165_v17  ;;  %v3615_v17 = vadd.f32 %v8267_v1, %v8171_v16 }
 0x1c2   : > { %v3635_v33 = vadd.f32 %v6605_v34, %v8233_v9  ;;  %v8349_v50 = vadd.f32 %v3968_v14, %v3632_v47  ;;  %v3971_v10 = vpop.f32.mrf.mxu0  ;;  %v3608_v14 = vadd.f32 %v8245_v51, %v8153_v36  ;;  %v3609_v36 = vadd.f32 %v8253_v49, %v8162_v53  ;;  %v8385_v53 = vld [vmem:[%s8527_s2] ss:$0 sm:$0xff] }
 0x1c3   : > { %v3548_v30 = vpop.f32.mrf.mxu1 }
 0x1c4   : > { %v3633_v58 = vadd.f32 %v3548_v30, %v8236_v39  ;;  %v8352_v40 = vadd.f32 %v6639_v63, %v3635_v33  ;;  %v6642_v30 = vpop.f32.mrf.mxu0 }
 0x1c5   : > { %v6608_v7 = vpop.f32.mrf.mxu1 }
 0x1c6   : > { %v3638_v27 = vadd.f32 %v6608_v7, %v8239_v4  ;;  %v8357_v34 = vadd.f32 %v3971_v10, %v3633_v58  ;;  %v3984_v33 = vpop.f32.mrf.mxu0 }
 0x1c7   : > { %v3561_v3 = vpop.f32.mrf.mxu1 }
 0x1c8   : > { %v3636_v26 = vadd.f32 %v3561_v3, %v8243_v62  ;;  %v8362_v4 = vadd.f32 %v6642_v30, %v3638_v27  ;;  %v4033_v62 = vadd.f32 %v8255_v11, %v3610_v24  ;;  %v6643_v58 = vpop.f32.mrf.mxu0  ;;  %v4034_v11 = vadd.f32 %v8261_v20, %v3611_v48 }
 0x1c9   : > { %v6609_v9 = vpop.f32.mrf.mxu1  ;;  %v4037_v30 = vadd.f32 %v8269_v2, %v3614_v55 }
 0x1ca   : > { %v3639_v39 = vadd.f32 %v6609_v9, %v8247_v57  ;;  %v8368_v10 = vadd.f32 %v3984_v33, %v3636_v26  ;;  %v4031_v57 = vadd.f32 %v8257_v5, %v3608_v14  ;;  %v3987_v18 = vpop.f32.mrf.mxu0  ;;  %v3612_v26 = vadd.f32 %v8263_v54, %v8168_v35 }
 0x1cb   : > { %v3564_v47 = vpop.f32.mrf.mxu1  ;;  %v4032_v9 = vadd.f32 %v8265_v41, %v3609_v36 }
 0x1cc   : > { %v3637_v7 = vadd.f32 %v3564_v47, %v8251_v61  ;;  %v8373_v51 = vadd.f32 %v6643_v58, %v3639_v39  ;;  %v4035_v14 = vadd.f32 %v8273_v15, %v3612_v26  ;;  %v3618_v15 = vadd.f32 %v8275_v21, %v8178_v31 }
 0x1cd   : > { %v6648_v3 = vpop.f32.mrf.mxu1 }
 0x1ce   : > { %v4823_v61 = vadd.f32 %v6648_v3, %v4033_v62  ;;  %v8378_v60 = vadd.f32 %v3987_v18, %v3637_v7  ;;  %v3613_v7 = vadd.f32 %v8271_v25, %v8174_v45  ;;  %v4038_v62 = vadd.f32 %v8277_v43, %v3615_v17 }
 0x1cf   : > { %v4662_v44 = vpop.f32.mrf.mxu1  ;;  %v4041_v55 = vadd.f32 %v8285_v29, %v3618_v15 }
 0x1d0   : > { %v4821_v63 = vadd.f32 %v4662_v44, %v4031_v57  ;;  %v4036_v36 = vadd.f32 %v8281_v38, %v3613_v7  ;;  %v3620_v7 = vadd.f32 %v8295_v23, %v8193_v46 }
 0x1d1   : > { %v6649_v27 = vpop.f32.mrf.mxu1 }
 0x1d2   : > { %v4824_v24 = vadd.f32 %v6649_v27, %v4034_v11 }
 0x1d3   : > { %v4665_v49 = vpop.f32.mrf.mxu1 }
 0x1d4   : > { %v6682_v5 = vpop.f32.mrf.mxu0  ;;  %v4822_v47 = vadd.f32 %v4665_v49, %v4032_v9 }
 0x1d5   : > { %v5389_v20 = vadd.f32 %v6682_v5, %v4823_v61  ;;  %v6652_v39 = vpop.f32.mrf.mxu1  ;;  %v3616_v61 = vadd.f32 %v8279_v19, %v8181_v8 }
 0x1d6   : > { %v5228_v42 = vpop.f32.mrf.mxu0  ;;  %v4827_v3 = vadd.f32 %v6652_v39, %v4037_v30  ;;  %v3622_v30 = vadd.f32 %v8291_v12, %v8190_v13 }
 0x1d7   : > { %v5492_v35 = vadd.f32 %v8385_v53, %v5389_v20  ;;  %v5387_v54 = vadd.f32 %v5228_v42, %v4821_v63  ;;  %v4678_v41 = vpop.f32.mrf.mxu1  ;;  %v3619_v63 = vadd.f32 %v8283_v59, %v8184_v0  ;;  %v4039_v9 = vadd.f32 %v8289_v56, %v3616_v61 }
 0x1d8   : > { %v6683_v16 = vpop.f32.mrf.mxu0  ;;  %v4825_v57 = vadd.f32 %v4678_v41, %v4035_v14  ;;  %v3617_v20 = vadd.f32 %v8287_v52, %v8187_v28 }
 0x1d9   : > { %v5524_v1 = vmax.f32 %v5492_v35, 0.0  ;;  %v5490_v2 = vadd.f32 %v8385_v53, %v5387_v54  ;;  %v5390_v33 = vadd.f32 %v6683_v16, %v4824_v24  ;;  %v6653_v25 = vpop.f32.mrf.mxu1  ;;  %v4042_v39 = vadd.f32 %v8293_v37, %v3619_v63  ;;  %v8609_v63 = vld [vmem:[#allocation16_spill] sm:$0xff] }
 0x1da   : > { %v5231_v45 = vpop.f32.mrf.mxu0  ;;  %v4828_v11 = vadd.f32 %v6653_v25, %v4038_v62  ;;  %v4040_v14 = vadd.f32 %v8297_v6, %v3617_v20  ;;  %v8610_v20 = vld [vmem:[#allocation19_spill] sm:$0xff] }
 0x1db   : > { %5556 = vst [vmem:[%s8399_s15 + $0x10] sm:$0xff] %v5524_v1  ;;  %v5522_v48 = vmax.f32 %v5490_v2, 0.0  ;;  %v5493_v58 = vadd.f32 %v8385_v53, %v5390_v33  ;;  %v5388_v44 = vadd.f32 %v5231_v45, %v4822_v47  ;;  %v4681_v27 = vpop.f32.mrf.mxu1  ;;  %v4045_v2 = vadd.f32 %v8301_v22, %v3622_v30  ;;  %v8602_v33 = vld [vmem:[#allocation4_spill] sm:$0xff] }
 0x1dc   : > { %v6686_v18 = vpop.f32.mrf.mxu0  ;;  %v4826_v49 = vadd.f32 %v4681_v27, %v4036_v36 }
 0x1dd   : > { %5554 = vst [vmem:[%s8399_s15] sm:$0xff] %v5522_v48  ;;  %v5525_v43 = vmax.f32 %v5493_v58, 0.0  ;;  %v5491_v31 = vadd.f32 %v8385_v53, %v5388_v44  ;;  %v5393_v21 = vadd.f32 %v6686_v18, %v4827_v3  ;;  %v6656_v5 = vpop.f32.mrf.mxu1  ;;  %v8603_v3 = vld [vmem:[#allocation14_spill] sm:$0xff]  ;;  %v8604_v48 = vld [vmem:[#allocation3_spill] sm:$0xff]  ;;  %v8605_v44 = vld [vmem:[#allocation5_spill] sm:$0xff] }
 0x1de   : > { %v5244_v26 = vpop.f32.mrf.mxu0  ;;  %v4831_v42 = vadd.f32 %v6656_v5, %v4041_v55  ;;  %v3623_v62 = vadd.f32 %v8603_v3, %v8602_v33  ;;  %v4043_v58 = vadd.f32 %v8604_v48, %v3620_v7  ;;  %v8608_v55 = vld [vmem:[#allocation6_spill] sm:$0xff]  ;;  %v8617_v33 = vld [vmem:[#allocation9_spill] sm:$0xff] }
 0x1df   : > { %5557 = vst [vmem:[%s8399_s15 + $0x18] sm:$0xff] %v5525_v43  ;;  %v5523_v38 = vmax.f32 %v5491_v31, 0.0  ;;  %v5496_v8 = vadd.f32 %v8385_v53, %v5393_v21  ;;  %v5391_v19 = vadd.f32 %v5244_v26, %v4825_v57  ;;  %v4694_v17 = vpop.f32.mrf.mxu1  ;;  %v8606_v57 = vld [vmem:[#allocation15_spill] sm:$0xff]  ;;  %v8607_v21 = vld [vmem:[#allocation17_spill] sm:$0xff]  ;;  %v3626_v26 = vadd.f32 %v8609_v63, %v8608_v55  ;;  %v8618_v3 = vld [vmem:[#allocation22_spill] sm:$0xff] }
 0x1e0   : > { %v6687_v24 = vpop.f32.mrf.mxu0  ;;  %v4829_v47 = vadd.f32 %v4694_v17, %v4039_v9  ;;  %v3621_v36 = vadd.f32 %v8606_v57, %v8605_v44  ;;  %v8611_v17 = vld [vmem:[#allocation7_spill] sm:$0xff]  ;;  %v8619_v48 = vld [vmem:[#allocation25_spill] sm:$0xff] }
 0x1e1   : > { %5555 = vst [vmem:[%s8399_s15 + $0x8] sm:$0xff] %v5523_v38  ;;  %v5528_v29 = vmax.f32 %v5496_v8, 0.0  ;;  %v5494_v0 = vadd.f32 %v8385_v53, %v5391_v19  ;;  %v5394_v59 = vadd.f32 %v6687_v24, %v4828_v11  ;;  %v6657_v54 = vpop.f32.mrf.mxu1  ;;  %v4046_v11 = vadd.f32 %v8607_v21, %v3623_v62  ;;  %v8622_v21 = vld [vmem:[#allocation24_spill] sm:$0xff] }
 0x1e2   : > { %v5247_v35 = vpop.f32.mrf.mxu0  ;;  %v4832_v1 = vadd.f32 %v6657_v54, %v4042_v39  ;;  %v4044_v24 = vadd.f32 %v8610_v20, %v3621_v36  ;;  %v3625_v62 = vadd.f32 %v8618_v3, %v8617_v33 }
 0x1e3   : > { %5560 = vst [vmem:[%s8399_s15 + $0x30] sm:$0xff] %v5528_v29  ;;  %v5526_v56 = vmax.f32 %v5494_v0, 0.0  ;;  %v5497_v28 = vadd.f32 %v8385_v53, %v5394_v59  ;;  %v5392_v52 = vadd.f32 %v5247_v35, %v4826_v49  ;;  %v4697_v41 = vpop.f32.mrf.mxu1  ;;  %v8612_v29 = vld [vmem:[#allocation18_spill] sm:$0xff] }
 0x1e4   : > { %v6690_v16 = vpop.f32.mrf.mxu0  ;;  %v4830_v25 = vadd.f32 %v4697_v41, %v4040_v14  ;;  %v3624_v0 = vadd.f32 %v8612_v29, %v8611_v17 }
 0x1e5   : > { %5558 = vst [vmem:[%s8399_s15 + $0x20] sm:$0xff] %v5526_v56  ;;  %v5529_v37 = vmax.f32 %v5497_v28, 0.0  ;;  %v5495_v13 = vadd.f32 %v8385_v53, %v5392_v52  ;;  %v5397_v12 = vadd.f32 %v6690_v16, %v4831_v42  ;;  %v6660_v45 = vpop.f32.mrf.mxu1  ;;  %v8613_v56 = vld [vmem:[#allocation21_spill] sm:$0xff]  ;;  %v8614_v52 = vld [vmem:[#allocation8_spill] sm:$0xff] }
 0x1e6   : > { %v5260_v15 = vpop.f32.mrf.mxu0  ;;  %v4835_v31 = vadd.f32 %v6660_v45, %v4045_v2  ;;  %v4049_v28 = vadd.f32 %v8613_v56, %v3626_v26 }
 0x1e7   : > { %5561 = vst [vmem:[%s8399_s15 + $0x38] sm:$0xff] %v5529_v37  ;;  %v5527_v6 = vmax.f32 %v5495_v13, 0.0  ;;  %v5500_v46 = vadd.f32 %v8385_v53, %v5397_v12  ;;  %v5395_v23 = vadd.f32 %v5260_v15, %v4829_v47  ;;  %v4710_v18 = vpop.f32.mrf.mxu1  ;;  %v8615_v47 = vld [vmem:[#allocation20_spill] sm:$0xff] }
 0x1e8   : > { %v6691_v61 = vpop.f32.mrf.mxu0  ;;  %v4833_v9 = vadd.f32 %v4710_v18, %v4043_v58  ;;  %v3627_v14 = vadd.f32 %v8615_v47, %v8614_v52 }
 0x1e9   : > { %5559 = vst [vmem:[%s8399_s15 + $0x28] sm:$0xff] %v5527_v6  ;;  %v5532_v22 = vmax.f32 %v5500_v46, 0.0  ;;  %v5498_v27 = vadd.f32 %v8385_v53, %v5395_v23  ;;  %v5398_v43 = vadd.f32 %v6691_v61, %v4832_v1  ;;  %v6661_v38 = vpop.f32.mrf.mxu1  ;;  %v8616_v1 = vld [vmem:[#allocation23_spill] sm:$0xff] }
 0x1ea   : > { %v5263_v5 = vpop.f32.mrf.mxu0  ;;  %v4836_v54 = vadd.f32 %v6661_v38, %v4046_v11  ;;  %v4047_v2 = vadd.f32 %v8616_v1, %v3624_v0  ;;  %v4050_v58 = vadd.f32 %v8619_v48, %v3627_v14  ;;  %v8628_v14 = vld [vmem:[#allocation31_spill] sm:$0xff] }
 0x1eb   : > { %5564 = vst [vmem:[%s8399_s15 + $0x50] sm:$0xff] %v5532_v22  ;;  %v5530_v8 = vmax.f32 %v5498_v27, 0.0  ;;  %v5501_v19 = vadd.f32 %v8385_v53, %v5398_v43  ;;  %v5396_v49 = vadd.f32 %v5263_v5, %v4830_v25  ;;  %v4713_v42 = vpop.f32.mrf.mxu1  ;;  %v8620_v27 = vld [vmem:[#allocation27_spill] sm:$0xff] }
 0x1ec   : > { %v6694_v59 = vpop.f32.mrf.mxu0  ;;  %v4834_v12 = vadd.f32 %v4713_v42, %v4044_v24  ;;  %v4048_v43 = vadd.f32 %v8620_v27, %v3625_v62  ;;  %v8631_v62 = vld [vmem:[#allocation32_spill] sm:$0xff] }
 0x1ed   : > { %5562 = vst [vmem:[%s8399_s15 + $0x40] sm:$0xff] %v5530_v8  ;;  %v5533_v39 = vmax.f32 %v5501_v19, 0.0  ;;  %v5499_v30 = vadd.f32 %v8385_v53, %v5396_v49  ;;  %v5401_v35 = vadd.f32 %v6694_v59, %v4835_v31  ;;  %v6664_v16 = vpop.f32.mrf.mxu1  ;;  %v8621_v31 = vld [vmem:[#allocation10_spill] sm:$0xff]  ;;  %v8623_v19 = vld [vmem:[#allocation11_spill] sm:$0xff]  ;;  %v8625_v59 = vld [vmem:[#allocation29_spill] sm:$0xff] }
 0x1ee   : > { %v5276_v7 = vpop.f32.mrf.mxu0  ;;  %v4839_v25 = vadd.f32 %v6664_v16, %v4049_v28  ;;  %v3630_v11 = vadd.f32 %v8622_v21, %v8621_v31  ;;  %v8624_v49 = vld [vmem:[#allocation26_spill] sm:$0xff]  ;;  %v8629_v16 = vld [vmem:[#allocation13_spill] sm:$0xff] }
 0x1ef   : > { %5565 = vst [vmem:[%s8399_s15 + $0x58] sm:$0xff] %v5533_v39  ;;  %v5531_v41 = vmax.f32 %v5499_v30, 0.0  ;;  %v5504_v37 = vadd.f32 %v8385_v53, %v5401_v35  ;;  %v5399_v13 = vadd.f32 %v5276_v7, %v4833_v9  ;;  %v4726_v45 = vpop.f32.mrf.mxu1  ;;  %v3628_v9 = vadd.f32 %v8624_v49, %v8623_v19  ;;  %v8626_v39 = vld [vmem:[#allocation12_spill] sm:$0xff] }
 0x1f0   : > { %v6695_v15 = vpop.f32.mrf.mxu0  ;;  %v4837_v22 = vadd.f32 %v4726_v45, %v4047_v2  ;;  %v4053_v42 = vadd.f32 %v8625_v59, %v3630_v11  ;;  %v8627_v30 = vld [vmem:[#allocation28_spill] sm:$0xff] }
 0x1f1   : > { %5563 = vst [vmem:[%s8399_s15 + $0x48] sm:$0xff] %v5531_v41  ;;  %v5536_v6 = vmax.f32 %v5504_v37, 0.0  ;;  %v5502_v46 = vadd.f32 %v8385_v53, %v5399_v13  ;;  %v5402_v23 = vadd.f32 %v6695_v15, %v4836_v54  ;;  %v6665_v57 = vpop.f32.mrf.mxu1  ;;  %v3631_v35 = vadd.f32 %v8627_v30, %v8626_v39  ;;  %v8630_v41 = vld [vmem:[#allocation30_spill] sm:$0xff] }
 0x1f2   : > { %v5279_v44 = vpop.f32.mrf.mxu0  ;;  %v4840_v8 = vadd.f32 %v6665_v57, %v4050_v58  ;;  %v4051_v7 = vadd.f32 %v8628_v14, %v3628_v9  ;;  %v3629_v37 = vadd.f32 %v8630_v41, %v8629_v16  ;;  %v8632_v58 = vld [vmem:[#allocation33_spill] sm:$0xff] }
 0x1f3   : > { %5568 = vst [vmem:[%s8399_s15 + $0x70] sm:$0xff] %v5536_v6  ;;  %v5534_v36 = vmax.f32 %v5502_v46, 0.0  ;;  %v5505_v61 = vadd.f32 %v8385_v53, %v5402_v23  ;;  %v5400_v18 = vadd.f32 %v5279_v44, %v4834_v12  ;;  %v4729_v63 = vpop.f32.mrf.mxu1  ;;  %v4054_v15 = vadd.f32 %v8631_v62, %v3631_v35 }
 0x1f4   : > { %v6698_v55 = vpop.f32.mrf.mxu0  ;;  %v4838_v0 = vadd.f32 %v4729_v63, %v4048_v43  ;;  %v4052_v44 = vadd.f32 %v8632_v58, %v3629_v37 }
 0x1f5   : > { %5566 = vst [vmem:[%s8399_s15 + $0x60] sm:$0xff] %v5534_v36  ;;  %v5537_v26 = vmax.f32 %v5505_v61, 0.0  ;;  %v5503_v5 = vadd.f32 %v8385_v53, %v5400_v18  ;;  %v5405_v38 = vadd.f32 %v6698_v55, %v4839_v25 }
 0x1f6   : > { %v5292_v20 = vpop.f32.mrf.mxu0 }
 0x1f7   : > { %5569 = vst [vmem:[%s8399_s15 + $0x78] sm:$0xff] %v5537_v26  ;;  %v5535_v24 = vmax.f32 %v5503_v5, 0.0  ;;  %v5508_v17 = vadd.f32 %v8385_v53, %v5405_v38  ;;  %v5403_v29 = vadd.f32 %v5292_v20, %v4837_v22 }
 0x1f8   : > { %v6699_v54 = vpop.f32.mrf.mxu0  ;;  %v6668_v47 = vpop.f32.mrf.mxu1 }
 0x1f9   : > { %5567 = vst [vmem:[%s8399_s15 + $0x68] sm:$0xff] %v5535_v24  ;;  %v5540_v56 = vmax.f32 %v5508_v17, 0.0  ;;  %v5506_v28 = vadd.f32 %v8385_v53, %v5403_v29  ;;  %v5406_v52 = vadd.f32 %v6699_v54, %v4840_v8  ;;  %v4843_v12 = vadd.f32 %v6668_v47, %v4053_v42 }
 0x1fa   : > { %v5295_v13 = vpop.f32.mrf.mxu0  ;;  %v4742_v3 = vpop.f32.mrf.mxu1 }
 0x1fb   : > { %5572 = vst [vmem:[%s8399_s15 + $0x90] sm:$0xff] %v5540_v56  ;;  %v5538_v1 = vmax.f32 %v5506_v28, 0.0  ;;  %v5509_v2 = vadd.f32 %v8385_v53, %v5406_v52  ;;  %v5404_v33 = vadd.f32 %v5295_v13, %v4838_v0  ;;  %v4841_v6 = vadd.f32 %v4742_v3, %v4051_v7 }
 0x1fc   : > { %v6702_v45 = vpop.f32.mrf.mxu0  ;;  %v6669_v48 = vpop.f32.mrf.mxu1 }
 0x1fd   : > { %5570 = vst [vmem:[%s8399_s15 + $0x80] sm:$0xff] %v5538_v1  ;;  %v5541_v46 = vmax.f32 %v5509_v2, 0.0  ;;  %v5507_v23 = vadd.f32 %v8385_v53, %v5404_v33  ;;  %v5409_v25 = vadd.f32 %v6702_v45, %v4843_v12  ;;  %v4844_v36 = vadd.f32 %v6669_v48, %v4054_v15 }
 0x1fe   : > { %v5308_v57 = vpop.f32.mrf.mxu0  ;;  %v4745_v27 = vpop.f32.mrf.mxu1 }
 0x1ff   : > { %5573 = vst [vmem:[%s8399_s15 + $0x98] sm:$0xff] %v5541_v46  ;;  %v5539_v61 = vmax.f32 %v5507_v23, 0.0  ;;  %v5512_v18 = vadd.f32 %v8385_v53, %v5409_v25  ;;  %v5407_v22 = vadd.f32 %v5308_v57, %v4841_v6  ;;  %v4842_v31 = vadd.f32 %v4745_v27, %v4052_v44 }
 0x200   : > { %v6703_v43 = vpop.f32.mrf.mxu0 }
 0x201   : > { %5571 = vst [vmem:[%s8399_s15 + $0x88] sm:$0xff] %v5539_v61  ;;  %v5544_v21 = vmax.f32 %v5512_v18, 0.0  ;;  %v5510_v11 = vadd.f32 %v8385_v53, %v5407_v22  ;;  %v5410_v55 = vadd.f32 %v6703_v43, %v4844_v36 }
 0x202   : > { %v5311_v63 = vpop.f32.mrf.mxu0 }
 0x203   : > { %5576 = vst [vmem:[%s8399_s15 + $0xb0] sm:$0xff] %v5544_v21  ;;  %v5542_v26 = vmax.f32 %v5510_v11, 0.0  ;;  %v5513_v5 = vadd.f32 %v8385_v53, %v5410_v55  ;;  %v5408_v38 = vadd.f32 %v5311_v63, %v4842_v31 }
 0x205   : > { %5574 = vst [vmem:[%s8399_s15 + $0xa0] sm:$0xff] %v5542_v26  ;;  %v5545_v8 = vmax.f32 %v5513_v5, 0.0  ;;  %v5511_v19 = vadd.f32 %v8385_v53, %v5408_v38  ;;  %v6706_v49 = vpop.f32.mrf.mxu0 }
 0x206   : > { %v6672_v20 = vpop.f32.mrf.mxu1 }
 0x207   : > { %5577 = vst [vmem:[%s8399_s15 + $0xb8] sm:$0xff] %v5545_v8  ;;  %v5543_v9 = vmax.f32 %v5511_v19, 0.0  ;;  %v4847_v24 = vadd.f32 %v6672_v20, %v8346_v32  ;;  %v5324_v17 = vpop.f32.mrf.mxu0 }
 0x208   : > { %v4758_v29 = vpop.f32.mrf.mxu1 }
 0x209   : > { %5575 = vst [vmem:[%s8399_s15 + $0xa8] sm:$0xff] %v5543_v9  ;;  %v5413_v0 = vadd.f32 %v6706_v49, %v4847_v24  ;;  %v4845_v59 = vadd.f32 %v4758_v29, %v8349_v50  ;;  %v6707_v39 = vpop.f32.mrf.mxu0 }
 0x20a   : > { %v6673_v42 = vpop.f32.mrf.mxu1 }
 0x20b   : > { %v5516_v30 = vadd.f32 %v8385_v53, %v5413_v0  ;;  %v5411_v35 = vadd.f32 %v5324_v17, %v4845_v59  ;;  %v4848_v54 = vadd.f32 %v6673_v42, %v8352_v40  ;;  %v5327_v14 = vpop.f32.mrf.mxu0 }
 0x20c   : > { %v4761_v56 = vpop.f32.mrf.mxu1 }
 0x20d   : > { %v5548_v28 = vmax.f32 %v5516_v30, 0.0  ;;  %v5514_v32 = vadd.f32 %v8385_v53, %v5411_v35  ;;  %v5414_v52 = vadd.f32 %v6707_v39, %v4848_v54  ;;  %v4846_v47 = vadd.f32 %v4761_v56, %v8357_v34 }
 0x20f   : > { %5580 = vst [vmem:[%s8399_s15 + $0xd0] sm:$0xff] %v5548_v28  ;;  %v5546_v50 = vmax.f32 %v5514_v32, 0.0  ;;  %v5517_v7 = vadd.f32 %v8385_v53, %v5414_v52  ;;  %v5412_v16 = vadd.f32 %v5327_v14, %v4846_v47 }
 0x211   : > { %5578 = vst [vmem:[%s8399_s15 + $0xc0] sm:$0xff] %v5546_v50  ;;  %v5549_v41 = vmax.f32 %v5517_v7, 0.0  ;;  %v5515_v37 = vadd.f32 %v8385_v53, %v5412_v16 }
 0x212   : > { %v6710_v13 = vpop.f32.mrf.mxu0 }
 0x213   : > { %5581 = vst [vmem:[%s8399_s15 + $0xd8] sm:$0xff] %v5549_v41  ;;  %v5547_v40 = vmax.f32 %v5515_v37, 0.0 }
 0x214   : > { %v6676_v12 = vpop.f32.mrf.mxu1  ;;  %v5340_v2 = vpop.f32.mrf.mxu0 }
 0x215   : > { %5579 = vst [vmem:[%s8399_s15 + $0xc8] sm:$0xff] %v5547_v40  ;;  %v4851_v1 = vadd.f32 %v6676_v12, %v8362_v4 }
 0x216   : > { %v4774_v34 = vpop.f32.mrf.mxu1  ;;  %v6711_v15 = vpop.f32.mrf.mxu0 }
 0x217   : > { %v5417_v33 = vadd.f32 %v6710_v13, %v4851_v1  ;;  %v4849_v3 = vadd.f32 %v4774_v34, %v8368_v10 }
 0x218   : > { %v6677_v62 = vpop.f32.mrf.mxu1  ;;  %v5343_v44 = vpop.f32.mrf.mxu0 }
 0x219   : > { %v5520_v45 = vadd.f32 %v8385_v53, %v5417_v33  ;;  %v5415_v6 = vadd.f32 %v5340_v2, %v4849_v3  ;;  %v4852_v46 = vadd.f32 %v6677_v62, %v8373_v51 }
 0x21a   : > { %v4777_v23 = vpop.f32.mrf.mxu1 }
 0x21b   : > { %v5552_v25 = vmax.f32 %v5520_v45, 0.0  ;;  %v5518_v4 = vadd.f32 %v8385_v53, %v5415_v6  ;;  %v5418_v48 = vadd.f32 %v6711_v15, %v4852_v46  ;;  %v4850_v58 = vadd.f32 %v4777_v23, %v8378_v60 }
 0x21d   : > { %5584 = vst [vmem:[%s8399_s15 + $0xf0] sm:$0xff] %v5552_v25  ;;  %v5550_v10 = vmax.f32 %v5518_v4, 0.0  ;;  %v5521_v57 = vadd.f32 %v8385_v53, %v5418_v48  ;;  %v5416_v36 = vadd.f32 %v5343_v44, %v4850_v58 }
 0x21f   : > { %5582 = vst [vmem:[%s8399_s15 + $0xe0] sm:$0xff] %v5550_v10  ;;  %v5553_v61 = vmax.f32 %v5521_v57, 0.0  ;;  %v5519_v18 = vadd.f32 %v8385_v53, %v5416_v36 }
 0x221   : > { %5585 = vst [vmem:[%s8399_s15 + $0xf8] sm:$0xff] %v5553_v61  ;;  %v5551_v51 = vmax.f32 %v5519_v18, 0.0 }
 0x223   : > { %5583 = vst [vmem:[%s8399_s15 + $0xe8] sm:$0xff] %v5551_v51 }
 0x224 PF: > { %s13_s12 = sadd.s32 1, %s6787_s12  }
 0x225   : > { %p10_p4 = scmp.ge.s32.totalorder %s13_s12, 4  }
 0x227   :  { %12 = sbr.rel (!%p10_p4) target bundleno = 1 (0x1), region = 72 }

</bundles_post_ra>
